<compile_context>
chip_gen: v7x
topology: tpu7x:2x2x1
jax: 0.10.0
libtpu: 0.0.40
codegen_flags: <defaults>
</compile_context>

<pallas_src>
import jax
import jax.numpy as jnp
from jax.experimental import pallas as pl
from jax.experimental.pallas import tpu as pltpu


def mlp_kernel(x_ref, w1_ref, b1_ref, w2_ref, b2_ref, o_ref, acc_ref):
    k = pl.program_id(0)

    @pl.when(k == 0)
    def _():
        acc_ref[...] = jnp.zeros_like(acc_ref)

    # First linear (chunk of hidden dim): (M, Cin) @ (Cin, tk) + (1, tk)
    h = jnp.dot(x_ref[...], w1_ref[...], preferred_element_type=jnp.float32)
    h = h + b1_ref[...]

    # Exact GELU (approximate='none'): 0.5 * x * (1 + erf(x / sqrt(2)))
    inv_sqrt2 = jnp.float32(0.7071067811865476)
    h = 0.5 * h * (1.0 + jax.lax.erf(h * inv_sqrt2))

    # Dropout p=0.0 -> identity (no-op).

    # Second linear, accumulated over hidden chunks: (M, tk) @ (tk, Cout)
    acc_ref[...] += jnp.dot(h.astype(w2_ref.dtype), w2_ref[...],
                            preferred_element_type=jnp.float32)

    @pl.when(k == pl.num_programs(0) - 1)
    def _():
        o_ref[...] = (acc_ref[...] + b2_ref[...]).astype(o_ref.dtype)


def mlp_forward(x, w1, b1, w2, b2, *, tk=512):
    """x: (B, H, W, Cin). w1: (Cin, Chid), b1: (Chid,), w2: (Chid, Cout), b2: (Cout,)."""
    B, H, W, Cin = x.shape
    Chid = w1.shape[1]
    Cout = w2.shape[1]
    M = B * H * W
    assert Chid % tk == 0, (Chid, tk)
    n_k = Chid // tk

    xf = x.reshape(M, Cin)
    b1r = b1.reshape(1, Chid)
    b2r = b2.reshape(1, Cout)

    cost = pl.CostEstimate(
        flops=2 * M * Cin * Chid + 2 * M * Chid * Cout,
        transcendentals=M * Chid,
        bytes_accessed=4 * (M * Cin + Cin * Chid + Chid * Cout
                            + M * Cout + Chid + Cout),
    )

    out = pl.pallas_call(
        mlp_kernel,
        out_shape=jax.ShapeDtypeStruct((M, Cout), x.dtype),
        grid_spec=pltpu.PrefetchScalarGridSpec(
            num_scalar_prefetch=0,
            grid=(n_k,),
            in_specs=[
                # x: same full block every step -> fetched once, stays resident.
                pl.BlockSpec((M, Cin), lambda k: (0, 0)),
                # Streamed weight / bias chunks along the hidden dimension.
                pl.BlockSpec((Cin, tk), lambda k: (0, k)),
                pl.BlockSpec((1, tk), lambda k: (0, k)),
                pl.BlockSpec((tk, Cout), lambda k: (k, 0)),
                pl.BlockSpec((1, Cout), lambda k: (0, 0)),
            ],
            # Output block revisited across the reduction axis (accumulator).
            out_specs=pl.BlockSpec((M, Cout), lambda k: (0, 0)),
            scratch_shapes=[pltpu.VMEM((M, Cout), jnp.float32)],
        ),
        compiler_params=pltpu.CompilerParams(
            dimension_semantics=("arbitrary",)),
        cost_estimate=cost,
    )(xf, w1, b1r, w2, b2r)

    return out.reshape(B, H, W, Cout)


def reference_forward(x, w1, b1, w2, b2):
    h = jnp.einsum("bhwc,cd->bhwd", x, w1) + b1
    h = jax.nn.gelu(h, approximate=False)
    return jnp.einsum("bhwd,de->bhwe", h, w2) + b2


if __name__ == "__main__":
    key = jax.random.PRNGKey(0)
    k_x, k_w1, k_b1, k_w2, k_b2 = jax.random.split(key, 5)

    B, H, W = 1, 14, 14
    Cin, Chid, Cout = 512, 2048, 512

    # Deterministic synthetic parameters (PyTorch Linear-like scale).
    x = jax.random.normal(k_x, (B, H, W, Cin), dtype=jnp.float32)
    w1 = jax.random.uniform(k_w1, (Cin, Chid), dtype=jnp.float32,
                            minval=-1.0, maxval=1.0) * (Cin ** -0.5)
    b1 = jax.random.uniform(k_b1, (Chid,), dtype=jnp.float32,
                            minval=-1.0, maxval=1.0) * (Cin ** -0.5)
    w2 = jax.random.uniform(k_w2, (Chid, Cout), dtype=jnp.float32,
                            minval=-1.0, maxval=1.0) * (Chid ** -0.5)
    b2 = jax.random.uniform(k_b2, (Cout,), dtype=jnp.float32,
                            minval=-1.0, maxval=1.0) * (Chid ** -0.5)

    out = mlp_forward(x, w1, b1, w2, b2)
    out = jax.block_until_ready(out)

    ref = reference_forward(x, w1, b1, w2, b2)
    assert out.shape == (B, H, W, Cout), out.shape
    assert jnp.allclose(out, ref, atol=1e-4, rtol=1e-4), "mismatch vs reference"

    print("KERNEL_OK")
</pallas_src>

<mosaic_0001>
module attributes {stable_mosaic.version = 11 : i64} {
  func.func @mlp_kernel(%arg0: i32, %arg1: memref<196x512xf32, #tpu.memory_space<vmem>>, %arg2: memref<512x512xf32, #tpu.memory_space<vmem>>, %arg3: memref<1x512xf32, #tpu.memory_space<vmem>>, %arg4: memref<512x512xf32, #tpu.memory_space<vmem>>, %arg5: memref<1x512xf32, #tpu.memory_space<vmem>>, %arg6: memref<196x512xf32, #tpu.memory_space<vmem>>, %arg7: memref<196x512xf32, #tpu.memory_space<vmem>>) attributes {dimension_semantics = [#tpu.dimension_semantics<arbitrary>], iteration_bounds = array<i64: 4>, scalar_prefetch = 0 : i64, scratch_operands = 1 : i64, tpu.core_type = #tpu.core_type<tc>, window_params = [{pipeline_mode = #tpu.pipeline_mode<synchronous>, transform_indices = @transform_0, window_bounds = array<i64: 196, 512>}, {transform_indices = @transform_1, window_bounds = array<i64: 512, 512>}, {transform_indices = @transform_2, window_bounds = array<i64: 1, 512>}, {transform_indices = @transform_3, window_bounds = array<i64: 512, 512>}, {pipeline_mode = #tpu.pipeline_mode<synchronous>, transform_indices = @transform_4, window_bounds = array<i64: 1, 512>}, {pipeline_mode = #tpu.pipeline_mode<synchronous>, transform_indices = @transform_5, window_bounds = array<i64: 196, 512>}]} {
    %c0_i32 = arith.constant 0 : i32
    %0 = arith.cmpi eq, %arg0, %c0_i32 : i32
    %1 = arith.extui %0 : i1 to i32
    %c0_i32_0 = arith.constant 0 : i32
    %2 = arith.cmpi ne, %1, %c0_i32_0 : i32
    scf.if %2 {
      %cst_17 = arith.constant 0.000000e+00 : f32
      %25 = vector.broadcast %cst_17 : f32 to vector<196x512xf32>
      %c0_18 = arith.constant 0 : index
      %c0_19 = arith.constant 0 : index
      %26 = vector.load %arg7[%c0_18, %c0_19] : memref<196x512xf32, #tpu.memory_space<vmem>>, vector<196x512xf32>
      tpu.vector_store %arg7[%c0_18, %c0_19], %25 {strides = array<i32>} : memref<196x512xf32, #tpu.memory_space<vmem>>, vector<196x512xf32>,
    } else {
    }
    %c0 = arith.constant 0 : index
    %c0_1 = arith.constant 0 : index
    %3 = vector.load %arg1[%c0, %c0_1] : memref<196x512xf32, #tpu.memory_space<vmem>>, vector<196x512xf32>
    %c0_2 = arith.constant 0 : index
    %c0_3 = arith.constant 0 : index
    %4 = vector.load %arg2[%c0_2, %c0_3] : memref<512x512xf32, #tpu.memory_space<vmem>>, vector<512x512xf32>
    %cst = arith.constant dense<0.000000e+00> : vector<196x512xf32>
    %5 = tpu.matmul %3, %4, %cst {dimension_numbers = #tpu.dot_dimension_numbers<[1], [0], [0], [1], [0, 0, 1, 1], [], []>} : vector<196x512xf32>, vector<512x512xf32>, vector<196x512xf32> -> vector<196x512xf32>
    %c0_4 = arith.constant 0 : index
    %c0_5 = arith.constant 0 : index
    %6 = vector.load %arg3[%c0_4, %c0_5] : memref<1x512xf32, #tpu.memory_space<vmem>>, vector<1x512xf32>
    %7 = vector.broadcast %6 : vector<1x512xf32> to vector<196x512xf32>
    %8 = arith.addf %5, %7 : vector<196x512xf32>
    %cst_6 = arith.constant 5.000000e-01 : f32
    %9 = vector.broadcast %cst_6 : f32 to vector<196x512xf32>
    %10 = arith.mulf %9, %8 : vector<196x512xf32>
    %cst_7 = arith.constant 0.707106769 : f32
    %11 = vector.broadcast %cst_7 : f32 to vector<196x512xf32>
    %12 = arith.mulf %8, %11 : vector<196x512xf32>
    %13 = math.erf %12 : vector<196x512xf32>
    %cst_8 = arith.constant 1.000000e+00 : f32
    %14 = vector.broadcast %cst_8 : f32 to vector<196x512xf32>
    %15 = arith.addf %14, %13 : vector<196x512xf32>
    %16 = arith.mulf %10, %15 : vector<196x512xf32>
    %c0_9 = arith.constant 0 : index
    %c0_10 = arith.constant 0 : index
    %17 = vector.load %arg7[%c0_9, %c0_10] : memref<196x512xf32, #tpu.memory_space<vmem>>, vector<196x512xf32>
    %c0_11 = arith.constant 0 : index
    %c0_12 = arith.constant 0 : index
    %18 = vector.load %arg4[%c0_11, %c0_12] : memref<512x512xf32, #tpu.memory_space<vmem>>, vector<512x512xf32>
    %cst_13 = arith.constant dense<0.000000e+00> : vector<196x512xf32>
    %19 = tpu.matmul %16, %18, %cst_13 {dimension_numbers = #tpu.dot_dimension_numbers<[1], [0], [0], [1], [0, 0, 1, 1], [], []>} : vector<196x512xf32>, vector<512x512xf32>, vector<196x512xf32> -> vector<196x512xf32>
    %20 = arith.addf %17, %19 : vector<196x512xf32>
    %c0_14 = arith.constant 0 : index
    %c0_15 = arith.constant 0 : index
    %21 = vector.load %arg7[%c0_14, %c0_15] : memref<196x512xf32, #tpu.memory_space<vmem>>, vector<196x512xf32>
    tpu.vector_store %arg7[%c0_14, %c0_15], %20 {strides = array<i32>} : memref<196x512xf32, #tpu.memory_space<vmem>>, vector<196x512xf32>,
    %c3_i32 = arith.constant 3 : i32
    %22 = arith.cmpi eq, %arg0, %c3_i32 : i32
    %23 = arith.extui %22 : i1 to i32
    %c0_i32_16 = arith.constant 0 : i32
    %24 = arith.cmpi ne, %23, %c0_i32_16 : i32
    scf.if %24 {
      %c0_17 = arith.constant 0 : index
      %c0_18 = arith.constant 0 : index
      %25 = vector.load %arg7[%c0_17, %c0_18] : memref<196x512xf32, #tpu.memory_space<vmem>>, vector<196x512xf32>
      %c0_19 = arith.constant 0 : index
      %c0_20 = arith.constant 0 : index
      %26 = vector.load %arg5[%c0_19, %c0_20] : memref<1x512xf32, #tpu.memory_space<vmem>>, vector<1x512xf32>
      %27 = vector.broadcast %26 : vector<1x512xf32> to vector<196x512xf32>
      %28 = arith.addf %25, %27 : vector<196x512xf32>
      %c0_21 = arith.constant 0 : index
      %c0_22 = arith.constant 0 : index
      %29 = vector.load %arg6[%c0_21, %c0_22] : memref<196x512xf32, #tpu.memory_space<vmem>>, vector<196x512xf32>
      tpu.vector_store %arg6[%c0_21, %c0_22], %28 {strides = array<i32>} : memref<196x512xf32, #tpu.memory_space<vmem>>, vector<196x512xf32>,
    } else {
    }
    return
  }
  func.func @transform_0(%arg0: i32) -> (i32, i32) {
    %c0_i32 = arith.constant 0 : i32
    %c0_i32_0 = arith.constant 0 : i32
    %c0_i32_1 = arith.constant 0 : i32
    return %c0_i32, %c0_i32_0 : i32, i32
  }
  func.func @transform_1(%arg0: i32) -> (i32, i32) {
    %c0_i32 = arith.constant 0 : i32
    %c0_i32_0 = arith.constant 0 : i32
    return %c0_i32, %arg0 : i32, i32
  }
  func.func @transform_2(%arg0: i32) -> (i32, i32) {
    %c0_i32 = arith.constant 0 : i32
    %c0_i32_0 = arith.constant 0 : i32
    return %c0_i32, %arg0 : i32, i32
  }
  func.func @transform_3(%arg0: i32) -> (i32, i32) {
    %c0_i32 = arith.constant 0 : i32
    %c0_i32_0 = arith.constant 0 : i32
    return %arg0, %c0_i32 : i32, i32
  }
  func.func @transform_4(%arg0: i32) -> (i32, i32) {
    %c0_i32 = arith.constant 0 : i32
    %c0_i32_0 = arith.constant 0 : i32
    %c0_i32_1 = arith.constant 0 : i32
    return %c0_i32, %c0_i32_0 : i32, i32
  }
  func.func @transform_5(%arg0: i32) -> (i32, i32) {
    %c0_i32 = arith.constant 0 : i32
    %c0_i32_0 = arith.constant 0 : i32
    %c0_i32_1 = arith.constant 0 : i32
    return %c0_i32, %c0_i32_0 : i32, i32
  }
}

</mosaic_0001>

<bundles_post_ra>
// kernel: tpu_custom_call.1
= control target key start
LH: loop header
LB: loop body
LE: loop exit
PB: predicated region body
PF: predicated region fallthrough
CT: control target
= control target key end

     0   :  { %s7327_s0 = inlined_call_operand.hbm [shape: f32[196,512], index: 0, kind: input, shape index: {}]   ;;  %s7328_s1 = inlined_call_operand.hbm [shape: f32[512,2048], index: 1, kind: input, shape index: {}]   ;;  %s7329_s2 = inlined_call_operand.hbm [shape: f32[1,2048], index: 2, kind: input, shape index: {}]   ;;  %s7330_s3 = inlined_call_operand.hbm [shape: f32[2048,512], index: 3, kind: input, shape index: {}]   ;;  %s7331_s4 = inlined_call_operand.hbm [shape: f32[1,512], index: 4, kind: input, shape index: {}]   ;;  %s7332_s5 = inlined_call_operand.hbm [shape: f32[196,512], index: 5, kind: output, shape index: {}]  }
   0x1   :  { %7352 = sst [smem:[#allocation51_spill]] %s7328_s1 }
   0x2   :  { %7353 = sst [smem:[#allocation52_spill]] %s7331_s4 }
   0x3   :  { %10 = vsyncpa [#allocation4], 0 }
   0x4   :  { %11 = vsyncpa [#allocation7], 0 }
   0x5   :  { %13 = vsyncpa [#allocation7 + $0x1], 0 }
   0x6   :  { %14 = vsyncpa [#allocation10], 0 }
   0x7   :  { %16 = vsyncpa [#allocation10 + $0x1], 0 }
   0x8   :  { %17 = vsyncpa [#allocation5], 0  ;;  %s5437_s18 = smov 0   ;;  %s5439_s19 = smov 0  }
   0x9   :  { %s5441_s20 = smov 0   ;;  %s5443_s21 = smov 0  }
   0xa LB: > { %s5456_s22 = sadd.s32 4294967295, %s5393_s21   ;;  %s5459_s23 = sadd.s32 1, %s5393_s21   ;;  %s5393_s21 = sphi %s5443_s21, %s7444_s21   ;;  %s5389_s20 = sphi %s5441_s20, %s7448_s20   ;;  %s5385_s19 = sphi %s5439_s19, %s7447_s19   ;;  %s5381_s18 = sphi %s5437_s18, %s7446_s18  }
   0xb   : > { %7354 = sst [smem:[#allocation18_spill]] %s5459_s23  ;;  %s48_s24 = ssub.s32 %s5393_s21, %s5459_s23 }
   0xc   : > { %s51_s25 = sadd.s32 1, %s5389_s20  ;;  %p49_p0 = scmp.eq.s32.totalorder %s48_s24, 0 }
   0xd   : > { %p58_p1 = scmp.ne.s32.totalorder %s5389_s20, %s5385_s19  ;;  %p59_p2 = scmp.eq.s32.totalorder %s5393_s21, 0 }
   0xe   : > { %p64_p3 = scmp.ne.s32.totalorder %s5385_s19, %s5381_s18  ;;  %p7333_p5 = scmp.eq.s32.totalorder %s5456_s22, 0 }
   0xf   : > { %s5469_s26 = scalar_select %p49_p0, %s5389_s20, %s51_s25  }
  0x10   : > { %p5471_p4 = por %p59_p2, %p58_p1  ;;  %p4045_p6 = scmp.ge.s32.totalorder %s5393_s21, 1 }
  0x11   : > { %7355 = sst [smem:[#allocation19_spill]] %s5469_s26  ;;  %p169_p7 = scmp.lt.s32.totalorder %s5393_s21, 5 }
  0x12   : > { %p5480_p8 = por %p7333_p5, %p64_p3  ;;  %s5395_s30 = smov [#allocation11]  }
  0x13   : > { %p5485_p10 = pnand %p4045_p6, %p169_p7  ;;  %s195_s6 = sshll.u32 %s5395_s30, 4  ;;  %s196_s6 = int_to_ptr.vmem [resolvable:$true] %s195_s6 }
  0x14   : > { %s7357_s28 = scalar_select %p5480_p8, 1, 0 }
  0x15   : > { %s7358_s29 = scalar_select %p5485_p10, 1, 0 }
  0x16   : > { %p4905_p11 = pneg %p5485_p10  ;;  %p4924_p12 = scmp.lt.s32.totalorder %s5393_s21, 4 }
  0x17   : > { %s7340_s9 = sand.u32 1, %s5393_s21   ;;  %s7361_s4 = sld [smem:[#allocation52_spill]] }
  0x18   : > { %p5494_p13 = pnand %p4905_p11, %p7333_p5  ;;  %p5500_p0 = pnand %p4924_p12, %p5471_p4 }
  0x1a   : > { %s7359_s7 = scalar_select %p5494_p13, 1, 0 }
  0x1b   : > { %s7360_s8 = scalar_select %p5500_p0, 1, 0 }
  0x1c   : > { %p7337_p2 = pneg %p5494_p13 }
  0x1d   : > { %s5171_s12 = scalar_lea.hbm %s7361_s4, 64 }
  0x1e   : > { %p5172_p1 = scmp.ne.s32.totalorder %s7361_s4, %s5171_s12  ;;  %p5178_p4 = scmp.lt.u32.totalorder %s5171_s12, %s7361_s4 }
  0x20   : > { %p5174_p3 = pnand %p7337_p2, %p5172_p1 }
  0x22   : > { %p5175_p6 = pneg %p5174_p3 }
  0x24   : > { %p5180_p7 = pnand %p5178_p4, %p5175_p6 }
  0x26   : > { %5183 = shalt.err (!%p5180_p7)
}
  0x27   : > { %s5184_s17 = scalar_lea.vmem %s196_s6, 64  ;;  %p5192_p5 = scmp.lt.s32.totalorder %s196_s6, %s196_s6 }
  0x28   : > { %p5185_p11 = scmp.ne.s32.totalorder %s196_s6, %s5184_s17  ;;  %p5193_p8 = scmp.lt.s32.totalorder %s5184_s17, %s5184_s17 }
  0x2a   : > { %p5187_p12 = pnand %p5185_p11, %p7337_p2  ;;  %p5194_p10 = por %p5193_p8, %p5192_p5 }
  0x2c   : > { %p5188_p9 = pneg %p5187_p12 }
  0x2e   : > { %p5195_p0 = pnand %p5194_p10, %p5188_p9 }
  0x30   : > { %5198 = shalt.err (!%p5195_p0)
}
  0x31   : > { %4911 = dma.hbm_to_vmem [thread:$0]  (!%p5494_p13), %s7361_s4, 64, %s196_s6, [#allocation10]  }
  0x32   : > { %s208_s25 = sand.u32 1, %s5389_s20   ;;  %s4071_s30 = sshll.u32 %s5393_s21, 9 }
  0x33   : > { %s5530_s27 = sshll.u32 %s208_s25, 11  ;;  %s7362_s1 = sld [smem:[#allocation51_spill]] }
  0x34   : > { %s210_s13 = scalar_lea.vmem [#allocation6], %s5530_s27  ;;  %s5543_s6 = scalar_lea.sflag [#allocation7], %s7340_s9 }
  0x35   : > { %s217_s14 = sshll.u32 %s210_s13, 4  ;;  %p7363_p8 = scmp.ne.s32.totalorder %s7360_s8, 0  ;;  %s5539_s14 = int_to_ptr.vmem [resolvable:$true] %s217_s14 }
  0x37   : > { %p5549_p9 = pneg %p7363_p8 }
  0x39   : > { %s5536_s12 = scalar_lea.hbm %s7362_s1, %s4071_s30  ;;  %s5204_s24 = scalar_lea.hbm %s7362_s1, 131072 }
  0x3a   : > { %s5199_s15 = scalar_lea.hbm %s5536_s12, 32768  ;;  %p5205_p1 = scmp.lt.u32.totalorder %s5536_s12, %s7362_s1 }
  0x3b   : > { %p5200_p5 = scmp.ne.s32.totalorder %s5536_s12, %s5199_s15  ;;  %p5206_p3 = scmp.lt.u32.totalorder %s5204_s24, %s5199_s15 }
  0x3c   : > { %s7364_s16 = scalar_select %p5549_p9, 1, 0 }
  0x3d   : > { %p5202_p10 = pnand %p5549_p9, %p5200_p5  ;;  %p5207_p6 = por %p5206_p3, %p5205_p1 }
  0x3e   : > { %p5208_p4 = scmp.lt.u32.totalorder %s5199_s15, %s5536_s12 }
  0x3f   : > { %p5203_p0 = pneg %p5202_p10 }
  0x40   : > { %p5209_p7 = por %p5208_p4, %p5207_p6 }
  0x42   : > { %p5210_p11 = pnand %p5209_p7, %p5203_p0 }
  0x44   : > { %5213 = shalt.err (!%p5210_p11)
}
  0x45   : > { %s5214_s11 = scalar_lea.vmem %s5539_s14, 32768  ;;  %s5396_s13 = smov [#allocation6]  }
  0x46   : > { %p5215_p12 = scmp.ne.s32.totalorder %s5539_s14, %s5214_s11  ;;  %s5219_s17 = sshll.u32 %s5396_s13, 4  ;;  %s5220_s17 = int_to_ptr.vmem [resolvable:$false] %s5219_s17 }
  0x47   : > { %s5221_s18 = scalar_lea.vmem %s5220_s17, 65536  ;;  %p5222_p2 = scmp.lt.s32.totalorder %s5539_s14, %s5220_s17 }
  0x48   : > { %p5217_p5 = pnand %p5215_p12, %p5549_p9  ;;  %p5223_p13 = scmp.lt.s32.totalorder %s5221_s18, %s5214_s11 }
  0x4a   : > { %p5218_p10 = pneg %p5217_p5  ;;  %p5224_p1 = por %p5223_p13, %p5222_p2 }
  0x4c   : > { %p5225_p3 = pnand %p5224_p1, %p5218_p10 }
  0x4e   : > { %5228 = shalt.err (!%p5225_p3)
}
  0x4f   : > { %s5397_s15 = smov 2048   ;;  %s5398_s24 = smov 512  }
  0x50   : > { %s5399_s30 = smov 32   ;;  %s5400_s10 = smov [#allocation3]  }
  0x51   : > { %4915 = dma.hbm_to_vmem [thread:$0]  (!%p7363_p8), %s5536_s12, 32768, %s5539_s14, %s5543_s6, %s5397_s15, %s5398_s24, %s5399_s30  }
  0x52   : > { %s181_s13 = sshll.u32 %s5400_s10, 4  ;;  %s4052_s11 = sshll.u32 %s208_s25, 2  ;;  %s182_s13 = int_to_ptr.vmem [resolvable:$true] %s181_s13 }
  0x53   : > { %s5229_s9 = scalar_lea.hbm %s7327_s0, 12800  ;;  %p7365_p2 = scmp.ne.s32.totalorder %s7359_s7, 0 }
  0x54   : > { %p5230_p13 = scmp.ne.s32.totalorder %s7327_s0, %s5229_s9  ;;  %p5236_p7 = scmp.lt.u32.totalorder %s5229_s9, %s7327_s0 }
  0x55   : > { %p7366_p0 = pneg %p7365_p2 }
  0x57   : > { %p5232_p6 = pnand %p5230_p13, %p7366_p0 }
  0x59   : > { %p5233_p4 = pneg %p5232_p6 }
  0x5b   : > { %p5238_p11 = pnand %p5236_p7, %p5233_p4 }
  0x5d   : > { %5241 = shalt.err (!%p5238_p11)
}
  0x5e   : > { %s5242_s25 = scalar_lea.vmem %s182_s13, 12800  ;;  %p7367_p5 = pmov %p7366_p0 }
  0x5f   : > { %p5243_p12 = scmp.ne.s32.totalorder %s182_s13, %s5242_s25  ;;  %p5250_p3 = scmp.lt.s32.totalorder %s182_s13, %s182_s13 }
  0x60   : > { %p5251_p8 = scmp.lt.s32.totalorder %s5242_s25, %s5242_s25 }
  0x61   : > { %p5245_p10 = pnand %p5243_p12, %p7367_p5 }
  0x62   : > { %p5252_p9 = por %p5251_p8, %p5250_p3 }
  0x63   : > { %p5246_p1 = pneg %p5245_p10 }
  0x65   : > { %p5253_p0 = pnand %p5252_p9, %p5246_p1 }
  0x67   : > { %5256 = shalt.err (!%p5253_p0)
}
  0x68   : > { %4908 = dma.hbm_to_vmem [thread:$0]  (!%p7365_p2), %s7327_s0, 12800, %s182_s13, [#allocation4], %s5398_s24, %s5398_s24, %s5399_s30  }
  0x69   : > { %s4072_s23 = sshll.u32 %s5393_s21, 6  ;;  %s231_s26 = scalar_lea.vmem [#allocation8], %s4052_s11 }
  0x6a   : > { %s239_s9 = sshll.u32 %s231_s26, 4  ;;  %s237_s15 = scalar_lea.hbm %s7329_s2, %s4072_s23  ;;  %s240_s9 = int_to_ptr.vmem [resolvable:$true] %s239_s9 }
  0x6b   : > { %s5257_s10 = scalar_lea.hbm %s237_s15, 64  ;;  %p7368_p9 = scmp.ne.s32.totalorder %s7364_s16, 0 }
  0x6c   : > { %p5258_p8 = scmp.ne.s32.totalorder %s237_s15, %s5257_s10  ;;  %s5262_s18 = scalar_lea.hbm %s7329_s2, 256 }
  0x6d   : > { %p5263_p2 = scmp.lt.u32.totalorder %s237_s15, %s7329_s2  ;;  %p5264_p4 = scmp.lt.u32.totalorder %s5262_s18, %s5257_s10 }
  0x6e   : > { %p5260_p13 = pnand %p5258_p8, %p7368_p9  ;;  %p5266_p11 = scmp.lt.u32.totalorder %s5257_s10, %s237_s15 }
  0x6f   : > { %p5265_p7 = por %p5264_p4, %p5263_p2 }
  0x70   : > { %p5261_p6 = pneg %p5260_p13 }
  0x71   : > { %p5267_p12 = por %p5266_p11, %p5265_p7 }
  0x73   : > { %p5268_p5 = pnand %p5267_p12, %p5261_p6 }
  0x75   : > { %5271 = shalt.err (!%p5268_p5)
}
  0x76   : > { %s5272_s13 = scalar_lea.vmem %s240_s9, 64  ;;  %s5401_s11 = smov [#allocation8]  }
  0x77   : > { %p5273_p10 = scmp.ne.s32.totalorder %s240_s9, %s5272_s13  ;;  %s5277_s4 = sshll.u32 %s5401_s11, 4  ;;  %s5278_s4 = int_to_ptr.vmem [resolvable:$false] %s5277_s4 }
  0x78   : > { %s5279_s23 = scalar_lea.vmem %s5278_s4, 128  ;;  %p5280_p0 = scmp.lt.s32.totalorder %s240_s9, %s5278_s4 }
  0x79   : > { %p5275_p1 = pnand %p5273_p10, %p7368_p9  ;;  %p5281_p8 = scmp.lt.s32.totalorder %s5279_s23, %s5272_s13 }
  0x7b   : > { %p5276_p3 = pneg %p5275_p1  ;;  %p5282_p13 = por %p5281_p8, %p5280_p0 }
  0x7d   : > { %p5283_p2 = pnand %p5282_p13, %p5276_p3 }
  0x7f   : > { %5286 = shalt.err (!%p5283_p2)
}
  0x80   : > { %p7369_p4 = scmp.ne.s32.totalorder %s7360_s8, 0  ;;  %s4074_s26 = sshll.u32 %s5393_s21, 15 }
  0x81   : > { %s250_s12 = scalar_lea.vmem [#allocation9], %s5530_s27  ;;  %s5622_s17 = scalar_lea.hbm %s7330_s3, %s4074_s26 }
  0x82   : > { %4918 = dma.hbm_to_vmem [thread:$0]  (!%p7369_p4), %s237_s15, 64, %s240_s9, %s5543_s6  }
  0x83   : > { %s258_s14 = sshll.u32 %s250_s12, 4  ;;  %s7370_s18 = sand.u32 1, %s5393_s21   ;;  %s5624_s14 = int_to_ptr.vmem [resolvable:$true] %s258_s14 }
  0x84   : > { %s5628_s25 = scalar_lea.sflag [#allocation10], %s7370_s18  ;;  %s5287_s1 = scalar_lea.hbm %s5622_s17, 32768 }
  0x85   : > { %p5288_p6 = scmp.ne.s32.totalorder %s5622_s17, %s5287_s1  ;;  %s5292_s9 = scalar_lea.hbm %s7330_s3, 131072 }
  0x86   : > { %p5293_p12 = scmp.lt.u32.totalorder %s5622_s17, %s7330_s3  ;;  %p5294_p5 = scmp.lt.u32.totalorder %s5292_s9, %s5287_s1 }
  0x87   : > { %p5290_p7 = pnand %p5288_p6, %p7368_p9  ;;  %p5296_p1 = scmp.lt.u32.totalorder %s5287_s1, %s5622_s17 }
  0x88   : > { %p5295_p10 = por %p5294_p5, %p5293_p12 }
  0x89   : > { %p5291_p11 = pneg %p5290_p7 }
  0x8a   : > { %p5297_p3 = por %p5296_p1, %p5295_p10 }
  0x8c   : > { %p5298_p0 = pnand %p5297_p3, %p5291_p11 }
  0x8e   : > { %5301 = shalt.err (!%p5298_p0)
}
  0x8f   : > { %s5302_s21 = scalar_lea.vmem %s5624_s14, 32768  ;;  %s5402_s11 = smov [#allocation9]  }
  0x90   : > { %p5303_p8 = scmp.ne.s32.totalorder %s5624_s14, %s5302_s21  ;;  %s5307_s4 = sshll.u32 %s5402_s11, 4  ;;  %s5308_s4 = int_to_ptr.vmem [resolvable:$false] %s5307_s4 }
  0x91   : > { %s5309_s23 = scalar_lea.vmem %s5308_s4, 65536  ;;  %p5310_p6 = scmp.lt.s32.totalorder %s5624_s14, %s5308_s4 }
  0x92   : > { %p5305_p13 = pnand %p5303_p8, %p7368_p9  ;;  %p5311_p7 = scmp.lt.s32.totalorder %s5309_s23, %s5302_s21 }
  0x94   : > { %p5306_p2 = pneg %p5305_p13  ;;  %p5312_p12 = por %p5311_p7, %p5310_p6 }
  0x96   : > { %p5313_p5 = pnand %p5312_p12, %p5306_p2 }
  0x98   : > { %5316 = shalt.err (!%p5313_p5)
}
  0x99   : > { %4921 = dma.hbm_to_vmem [thread:$0]  (!%p7369_p4), %s5622_s17, 32768, %s5624_s14, %s5628_s25, %s5398_s24, %s5398_s24, %s5399_s30  }
  0x9a   : > { %p7371_p9 = scmp.ne.s32.totalorder %s7358_s29, 0 }
  0x9c   : > { %270 = sbr.rel (%p7371_p9) target bundleno = 1138 (0x472), region = 40 }
  0xa3   : > { %p7372_p11 = scmp.eq.s32.totalorder %s5456_s22, 0 }
  0xa5   : > { %5360 = dma.done.wait (%p7372_p11), [#allocation4], 12800   ;;  %p7373_p10 = pmov %p7372_p11 }
  0xa6   : > { %s276_s8 = sand.u32 1, %s5456_s22   ;;  %s278_s16 = sand.u32 1, %s5385_s19  }
  0xa7   : > { %5362 = vsyncadd (%p7373_p10), [#allocation4], 4294954496  ;;  %s4061_s26 = sshll.u32 %s278_s16, 11  ;;  %s277_s12 = scalar_lea.sflag [#allocation7], %s276_s8 }
  0xa8   : > { %s5663_s10 = scalar_lea.vmem [#allocation6], %s4061_s26  ;;  %p7374_p1 = scmp.ne.s32.totalorder %s7357_s28, 0 }
  0xaa   : > { %5364 = dma.done.wait (%p7374_p1), %s277_s12, 32832  }
  0xab   : > { %5366 = vsyncadd (%p7374_p1), %s277_s12, 4294934464  ;;  %s5669_s29 = sshll.u32 %s278_s16, 2  ;;  %s295_s30 = scalar_lea.sflag [#allocation10], %s276_s8 }
  0xac   : > { %s289_s24 = scalar_lea.vmem [#allocation8], %s5669_s29  ;;  %s5672_s14 = scalar_lea.vmem [#allocation9], %s4061_s26 }
  0xad   : > { %5368 = dma.done.wait (%p7374_p1), %s295_s30, 32768  }
  0xae   : > { %5370 = vsyncadd (%p7374_p1), %s295_s30, 4294934528  ;;  %p7375_p4 = pmov %p7373_p10 }
  0xb0   : > { %5372 = dma.done.wait (%p7375_p4), [#allocation10], 64   ;;  %p7376_p3 = pmov %p7375_p4 }
  0xb1   : > { %p7377_p0 = scmp.ne.s32.totalorder %s5456_s22, 0 }
  0xb2   : > { %5374 = vsyncadd (%p7376_p3), [#allocation10], 4294967232  ;;  %v5403_v0 = vmov (!%p7377_p0), 0.0  }
  0xb3   : > { %340 = sbr.rel (%p7377_p0) target bundleno = 229 (0xe5), region = 64  ;;  %341 = vst [vmem:[#allocation2] sm:$0xff] (!%p7377_p0), %v5403_v0  ;;  %342 = vst [vmem:[#allocation2 + $0x8] sm:$0xff] (!%p7377_p0), %v5403_v0 }
  0xb4   : > { %343 = vst [vmem:[#allocation2 + $0x10] sm:$0xff] (!%p7377_p0), %v5403_v0  ;;  %344 = vst [vmem:[#allocation2 + $0x18] sm:$0xff] (!%p7377_p0), %v5403_v0 }
  0xb5   : > { %345 = vst [vmem:[#allocation2 + $0x20] sm:$0xff] (!%p7377_p0), %v5403_v0  ;;  %346 = vst [vmem:[#allocation2 + $0x28] sm:$0xff] (!%p7377_p0), %v5403_v0 }
  0xb6   : > { %347 = vst [vmem:[#allocation2 + $0x30] sm:$0xff] (!%p7377_p0), %v5403_v0  ;;  %348 = vst [vmem:[#allocation2 + $0x38] sm:$0xff] (!%p7377_p0), %v5403_v0 }
  0xb7   : > { %349 = vst [vmem:[#allocation2 + $0x40] sm:$0xff] (!%p7377_p0), %v5403_v0  ;;  %350 = vst [vmem:[#allocation2 + $0x48] sm:$0xff] (!%p7377_p0), %v5403_v0 }
  0xb8   : > { %351 = vst [vmem:[#allocation2 + $0x50] sm:$0xff] (!%p7377_p0), %v5403_v0  ;;  %352 = vst [vmem:[#allocation2 + $0x58] sm:$0xff] (!%p7377_p0), %v5403_v0 }
  0xb9   : > { %353 = vst [vmem:[#allocation2 + $0x60] sm:$0xff] (!%p7377_p0), %v5403_v0  ;;  %354 = vst [vmem:[#allocation2 + $0x68] sm:$0xff] (!%p7377_p0), %v5403_v0 }
  0xba   : > { %355 = vst [vmem:[#allocation2 + $0x70] sm:$0xff] %v5403_v0  ;;  %356 = vst [vmem:[#allocation2 + $0x78] sm:$0xff] %v5403_v0 }
  0xbb   : > { %357 = vst [vmem:[#allocation2 + $0x80] sm:$0xff] %v5403_v0  ;;  %358 = vst [vmem:[#allocation2 + $0x88] sm:$0xff] %v5403_v0 }
  0xbc   : > { %359 = vst [vmem:[#allocation2 + $0x90] sm:$0xff] %v5403_v0  ;;  %360 = vst [vmem:[#allocation2 + $0x98] sm:$0xff] %v5403_v0 }
  0xbd   : > { %361 = vst [vmem:[#allocation2 + $0xa0] sm:$0xff] %v5403_v0  ;;  %362 = vst [vmem:[#allocation2 + $0xa8] sm:$0xff] %v5403_v0 }
  0xbe   : > { %363 = vst [vmem:[#allocation2 + $0xb0] sm:$0xff] %v5403_v0  ;;  %364 = vst [vmem:[#allocation2 + $0xb8] sm:$0xff] %v5403_v0 }
  0xbf   : > { %365 = vst [vmem:[#allocation2 + $0xc0] sm:$0xff] %v5403_v0  ;;  %366 = vst [vmem:[#allocation2 + $0xc8] sm:$0xff] %v5403_v0 }
  0xc0   : > { %367 = vst [vmem:[#allocation2 + $0xd0] sm:$0xff] %v5403_v0  ;;  %368 = vst [vmem:[#allocation2 + $0xd8] sm:$0xff] %v5403_v0 }
  0xc1   : > { %369 = vst [vmem:[#allocation2 + $0xe0] sm:$0xff] %v5403_v0  ;;  %370 = vst [vmem:[#allocation2 + $0xe8] sm:$0xff] %v5403_v0 }
  0xc2   : > { %371 = vst [vmem:[#allocation2 + $0xf0] sm:$0xff] %v5403_v0  ;;  %372 = vst [vmem:[#allocation2 + $0xf8] sm:$0xff] %v5403_v0 }
  0xc3   : > { %373 = vst [vmem:[#allocation2 + $0x100] sm:$0xff] %v5403_v0  ;;  %374 = vst [vmem:[#allocation2 + $0x108] sm:$0xff] %v5403_v0 }
  0xc4   : > { %375 = vst [vmem:[#allocation2 + $0x110] sm:$0xff] %v5403_v0  ;;  %376 = vst [vmem:[#allocation2 + $0x118] sm:$0xff] %v5403_v0 }
  0xc5   : > { %377 = vst [vmem:[#allocation2 + $0x120] sm:$0xff] %v5403_v0  ;;  %378 = vst [vmem:[#allocation2 + $0x128] sm:$0xff] %v5403_v0 }
  0xc6   : > { %379 = vst [vmem:[#allocation2 + $0x130] sm:$0xff] %v5403_v0  ;;  %380 = vst [vmem:[#allocation2 + $0x138] sm:$0xff] %v5403_v0 }
  0xc7   : > { %381 = vst [vmem:[#allocation2 + $0x140] sm:$0xff] %v5403_v0  ;;  %382 = vst [vmem:[#allocation2 + $0x148] sm:$0xff] %v5403_v0 }
  0xc8   : > { %383 = vst [vmem:[#allocation2 + $0x150] sm:$0xff] %v5403_v0  ;;  %384 = vst [vmem:[#allocation2 + $0x158] sm:$0xff] %v5403_v0 }
  0xc9   : > { %385 = vst [vmem:[#allocation2 + $0x160] sm:$0xff] %v5403_v0  ;;  %386 = vst [vmem:[#allocation2 + $0x168] sm:$0xff] %v5403_v0 }
  0xca   : > { %387 = vst [vmem:[#allocation2 + $0x170] sm:$0xff] %v5403_v0  ;;  %388 = vst [vmem:[#allocation2 + $0x178] sm:$0xff] %v5403_v0 }
  0xcb   : > { %389 = vst [vmem:[#allocation2 + $0x180] sm:$0xff] %v5403_v0  ;;  %390 = vst [vmem:[#allocation2 + $0x188] sm:$0xff] %v5403_v0 }
  0xcc   : > { %391 = vst [vmem:[#allocation2 + $0x190] sm:$0xff] %v5403_v0  ;;  %392 = vst [vmem:[#allocation2 + $0x198] sm:$0xff] %v5403_v0 }
  0xcd   : > { %393 = vst [vmem:[#allocation2 + $0x1a0] sm:$0xff] %v5403_v0  ;;  %394 = vst [vmem:[#allocation2 + $0x1a8] sm:$0xff] %v5403_v0 }
  0xce   : > { %395 = vst [vmem:[#allocation2 + $0x1b0] sm:$0xff] %v5403_v0  ;;  %396 = vst [vmem:[#allocation2 + $0x1b8] sm:$0xff] %v5403_v0 }
  0xcf   : > { %397 = vst [vmem:[#allocation2 + $0x1c0] sm:$0xff] %v5403_v0  ;;  %398 = vst [vmem:[#allocation2 + $0x1c8] sm:$0xff] %v5403_v0 }
  0xd0   : > { %399 = vst [vmem:[#allocation2 + $0x1d0] sm:$0xff] %v5403_v0  ;;  %400 = vst [vmem:[#allocation2 + $0x1d8] sm:$0xff] %v5403_v0 }
  0xd1   : > { %401 = vst [vmem:[#allocation2 + $0x1e0] sm:$0xff] %v5403_v0  ;;  %402 = vst [vmem:[#allocation2 + $0x1e8] sm:$0xff] %v5403_v0 }
  0xd2   : > { %403 = vst [vmem:[#allocation2 + $0x1f0] sm:$0xff] %v5403_v0  ;;  %404 = vst [vmem:[#allocation2 + $0x1f8] sm:$0xff] %v5403_v0 }
  0xd3   : > { %405 = vst [vmem:[#allocation2 + $0x200] sm:$0xff] %v5403_v0  ;;  %406 = vst [vmem:[#allocation2 + $0x208] sm:$0xff] %v5403_v0 }
  0xd4   : > { %407 = vst [vmem:[#allocation2 + $0x210] sm:$0xff] %v5403_v0  ;;  %408 = vst [vmem:[#allocation2 + $0x218] sm:$0xff] %v5403_v0 }
  0xd5   : > { %409 = vst [vmem:[#allocation2 + $0x220] sm:$0xff] %v5403_v0  ;;  %410 = vst [vmem:[#allocation2 + $0x228] sm:$0xff] %v5403_v0 }
  0xd6   : > { %411 = vst [vmem:[#allocation2 + $0x230] sm:$0xff] %v5403_v0  ;;  %412 = vst [vmem:[#allocation2 + $0x238] sm:$0xff] %v5403_v0 }
  0xd7   : > { %413 = vst [vmem:[#allocation2 + $0x240] sm:$0xff] %v5403_v0  ;;  %414 = vst [vmem:[#allocation2 + $0x248] sm:$0xff] %v5403_v0 }
  0xd8   : > { %415 = vst [vmem:[#allocation2 + $0x250] sm:$0xff] %v5403_v0  ;;  %416 = vst [vmem:[#allocation2 + $0x258] sm:$0xff] %v5403_v0 }
  0xd9   : > { %417 = vst [vmem:[#allocation2 + $0x260] sm:$0xff] %v5403_v0  ;;  %418 = vst [vmem:[#allocation2 + $0x268] sm:$0xff] %v5403_v0 }
  0xda   : > { %419 = vst [vmem:[#allocation2 + $0x270] sm:$0xff] %v5403_v0  ;;  %420 = vst [vmem:[#allocation2 + $0x278] sm:$0xff] %v5403_v0 }
  0xdb   : > { %421 = vst [vmem:[#allocation2 + $0x280] sm:$0xff] %v5403_v0  ;;  %422 = vst [vmem:[#allocation2 + $0x288] sm:$0xff] %v5403_v0 }
  0xdc   : > { %423 = vst [vmem:[#allocation2 + $0x290] sm:$0xff] %v5403_v0  ;;  %424 = vst [vmem:[#allocation2 + $0x298] sm:$0xff] %v5403_v0 }
  0xdd   : > { %425 = vst [vmem:[#allocation2 + $0x2a0] sm:$0xff] %v5403_v0  ;;  %426 = vst [vmem:[#allocation2 + $0x2a8] sm:$0xff] %v5403_v0 }
  0xde   : > { %427 = vst [vmem:[#allocation2 + $0x2b0] sm:$0xff] %v5403_v0  ;;  %428 = vst [vmem:[#allocation2 + $0x2b8] sm:$0xff] %v5403_v0 }
  0xdf   : > { %429 = vst [vmem:[#allocation2 + $0x2c0] sm:$0xff] %v5403_v0  ;;  %430 = vst [vmem:[#allocation2 + $0x2c8] sm:$0xff] %v5403_v0 }
  0xe0   : > { %431 = vst [vmem:[#allocation2 + $0x2d0] sm:$0xff] %v5403_v0  ;;  %432 = vst [vmem:[#allocation2 + $0x2d8] sm:$0xff] %v5403_v0 }
  0xe1   : > { %433 = vst [vmem:[#allocation2 + $0x2e0] sm:$0xff] %v5403_v0  ;;  %434 = vst [vmem:[#allocation2 + $0x2e8] sm:$0xff] %v5403_v0 }
  0xe2   : > { %435 = vst [vmem:[#allocation2 + $0x2f0] sm:$0xff] %v5403_v0  ;;  %436 = vst [vmem:[#allocation2 + $0x2f8] sm:$0xff] %v5403_v0 }
  0xe3   : > { %437 = vst [vmem:[#allocation2 + $0x300] sm:$0xf] %v5403_v0  ;;  %438 = vst [vmem:[#allocation2 + $0x308] sm:$0xf] %v5403_v0 }
  0xe4   : > { %439 = vst [vmem:[#allocation2 + $0x310] sm:$0xf] %v5403_v0  ;;  %440 = vst [vmem:[#allocation2 + $0x318] sm:$0xf] %v5403_v0 }
  0xe5 PF: > { %v542_v1 = vld [vmem:[%s5663_s10 + $0x8] sm:$0xff]  ;;  %v544_v3 = vld [vmem:[%s5663_s10 + $0x18] sm:$0xff]  ;;  %v541_v6 = vld [vmem:[%s5663_s10] sm:$0xff]  ;;  %p4066_p8 = scmp.ne.s32.totalorder %s5456_s22, 3 }
  0xe6   : > { %v546_v2 = vld [vmem:[%s5663_s10 + $0x28] sm:$0xff]  ;;  %v548_v5 = vld [vmem:[%s5663_s10 + $0x38] sm:$0xff]  ;;  %v545_v7 = vld [vmem:[%s5663_s10 + $0x20] sm:$0xff] }
  0xe7   : > { %v4075_v4 = vpack.c.bf16 %v546_v2, %v542_v1  ;;  %v4203_v8 = vpack.c.bf16 %v548_v5, %v544_v3  ;;  %v4077_v9 = vpack.c.bf16 %v545_v7, %v541_v6  ;;  %v543_v10 = vld [vmem:[%s5663_s10 + $0x10] sm:$0xff]  ;;  %v550_v12 = vld [vmem:[%s5663_s10 + $0x48] sm:$0xff]  ;;  %v552_v15 = vld [vmem:[%s5663_s10 + $0x58] sm:$0xff] }
  0xe8   : > { %v547_v11 = vld [vmem:[%s5663_s10 + $0x30] sm:$0xff]  ;;  %v554_v14 = vld [vmem:[%s5663_s10 + $0x68] sm:$0xff]  ;;  %v556_v16 = vld [vmem:[%s5663_s10 + $0x78] sm:$0xff] }
  0xe9   : > { %4076 = vmatprep.subr.bf16.mxu0 %v4075_v4  ;;  %v4205_v13 = vpack.c.bf16 %v547_v11, %v543_v10  ;;  %4204 = vmatprep.subr.bf16.mxu1 %v4203_v8  ;;  %v4079_v17 = vpack.c.bf16 %v554_v14, %v550_v12  ;;  %v4207_v18 = vpack.c.bf16 %v556_v16, %v552_v15  ;;  %v549_v19 = vld [vmem:[%s5663_s10 + $0x40] sm:$0xff]  ;;  %v551_v21 = vld [vmem:[%s5663_s10 + $0x50] sm:$0xff]  ;;  %v558_v24 = vld [vmem:[%s5663_s10 + $0x88] sm:$0xff] }
  0xea   : > { %4078 = vmatpush1.bf16.msra.mxu0 %v4077_v9  ;;  %v553_v20 = vld [vmem:[%s5663_s10 + $0x60] sm:$0xff]  ;;  %v555_v23 = vld [vmem:[%s5663_s10 + $0x70] sm:$0xff]  ;;  %v562_v25 = vld [vmem:[%s5663_s10 + $0xa8] sm:$0xff] }
  0xeb   : > { %4206 = vmatpush1.bf16.msra.mxu1 %v4205_v13  ;;  %v4081_v22 = vpack.c.bf16 %v553_v20, %v549_v19  ;;  %4080 = vmatprep.subr.bf16.mxu0 %v4079_v17  ;;  %v4209_v26 = vpack.c.bf16 %v555_v23, %v551_v21  ;;  %v4083_v27 = vpack.c.bf16 %v562_v25, %v558_v24  ;;  %v560_v28 = vld [vmem:[%s5663_s10 + $0x98] sm:$0xff]  ;;  %v557_v30 = vld [vmem:[%s5663_s10 + $0x80] sm:$0xff]  ;;  %v559_v33 = vld [vmem:[%s5663_s10 + $0x90] sm:$0xff] }
  0xec   : > { %4208 = vmatprep.subr.bf16.mxu1 %v4207_v18  ;;  %v564_v29 = vld [vmem:[%s5663_s10 + $0xb8] sm:$0xff]  ;;  %v561_v32 = vld [vmem:[%s5663_s10 + $0xa0] sm:$0xff]  ;;  %v563_v34 = vld [vmem:[%s5663_s10 + $0xb0] sm:$0xff] }
  0xed   : > { %v4211_v31 = vpack.c.bf16 %v564_v29, %v560_v28  ;;  %v4085_v35 = vpack.c.bf16 %v561_v32, %v557_v30  ;;  %v566_v36 = vld [vmem:[%s5663_s10 + $0xc8] sm:$0xff]  ;;  %v568_v38 = vld [vmem:[%s5663_s10 + $0xd8] sm:$0xff]  ;;  %v4213_v39 = vpack.c.bf16 %v563_v34, %v559_v33  ;;  %v565_v42 = vld [vmem:[%s5663_s10 + $0xc0] sm:$0xff] }
  0xee   : > { %4082 = vmatpush1.bf16.msra.mxu0 %v4081_v22  ;;  %v570_v37 = vld [vmem:[%s5663_s10 + $0xe8] sm:$0xff]  ;;  %v572_v41 = vld [vmem:[%s5663_s10 + $0xf8] sm:$0xff]  ;;  %v569_v43 = vld [vmem:[%s5663_s10 + $0xe0] sm:$0xff] }
  0xef   : > { %4210 = vmatpush1.bf16.msra.mxu1 %v4209_v26  ;;  %4084 = vmatprep.subr.bf16.mxu0 %v4083_v27  ;;  %v4087_v40 = vpack.c.bf16 %v570_v37, %v566_v36  ;;  %v4215_v44 = vpack.c.bf16 %v572_v41, %v568_v38  ;;  %v567_v45 = vld [vmem:[%s5663_s10 + $0xd0] sm:$0xff]  ;;  %v574_v47 = vld [vmem:[%s5663_s10 + $0x108] sm:$0xff]  ;;  %v576_v49 = vld [vmem:[%s5663_s10 + $0x118] sm:$0xff]  ;;  %v4089_v51 = vpack.c.bf16 %v569_v43, %v565_v42 }
  0xf0   : > { %4212 = vmatprep.subr.bf16.mxu1 %v4211_v31  ;;  %v571_v46 = vld [vmem:[%s5663_s10 + $0xf0] sm:$0xff]  ;;  %v578_v48 = vld [vmem:[%s5663_s10 + $0x128] sm:$0xff]  ;;  %v580_v50 = vld [vmem:[%s5663_s10 + $0x138] sm:$0xff] }
  0xf1   : > { %v4217_v52 = vpack.c.bf16 %v571_v46, %v567_v45  ;;  %v4091_v53 = vpack.c.bf16 %v578_v48, %v574_v47  ;;  %v573_v54 = vld [vmem:[%s5663_s10 + $0x100] sm:$0xff]  ;;  %v575_v56 = vld [vmem:[%s5663_s10 + $0x110] sm:$0xff]  ;;  %v4219_v57 = vpack.c.bf16 %v580_v50, %v576_v49  ;;  %v582_v59 = vld [vmem:[%s5663_s10 + $0x148] sm:$0xff] }
  0xf2   : > { %4086 = vmatpush1.bf16.msra.mxu0 %v4085_v35  ;;  %v577_v55 = vld [vmem:[%s5663_s10 + $0x120] sm:$0xff]  ;;  %v579_v58 = vld [vmem:[%s5663_s10 + $0x130] sm:$0xff]  ;;  %v586_v60 = vld [vmem:[%s5663_s10 + $0x168] sm:$0xff] }
  0xf3   : > { %4214 = vmatpush1.bf16.msra.mxu1 %v4213_v39  ;;  %4088 = vmatprep.subr.bf16.mxu0 %v4087_v40  ;;  %v584_v61 = vld [vmem:[%s5663_s10 + $0x158] sm:$0xff]  ;;  %v4093_v63 = vpack.c.bf16 %v577_v55, %v573_v54  ;;  %v4221_v0 = vpack.c.bf16 %v579_v58, %v575_v56  ;;  %v4095_v1 = vpack.c.bf16 %v586_v60, %v582_v59  ;;  %v581_v2 = vld [vmem:[%s5663_s10 + $0x140] sm:$0xff]  ;;  %v583_v4 = vld [vmem:[%s5663_s10 + $0x150] sm:$0xff] }
  0xf4   : > { %4216 = vmatprep.subr.bf16.mxu1 %v4215_v44  ;;  %v588_v62 = vld [vmem:[%s5663_s10 + $0x178] sm:$0xff]  ;;  %v585_v3 = vld [vmem:[%s5663_s10 + $0x160] sm:$0xff]  ;;  %v587_v6 = vld [vmem:[%s5663_s10 + $0x170] sm:$0xff] }
  0xf5   : > { %v4223_v5 = vpack.c.bf16 %v588_v62, %v584_v61  ;;  %v590_v7 = vld [vmem:[%s5663_s10 + $0x188] sm:$0xff]  ;;  %v592_v9 = vld [vmem:[%s5663_s10 + $0x198] sm:$0xff]  ;;  %v4097_v11 = vpack.c.bf16 %v585_v3, %v581_v2  ;;  %v4225_v12 = vpack.c.bf16 %v587_v6, %v583_v4  ;;  %v589_v14 = vld [vmem:[%s5663_s10 + $0x180] sm:$0xff] }
  0xf6   : > { %4090 = vmatpush1.bf16.msra.mxu0 %v4089_v51  ;;  %v594_v8 = vld [vmem:[%s5663_s10 + $0x1a8] sm:$0xff]  ;;  %v596_v10 = vld [vmem:[%s5663_s10 + $0x1b8] sm:$0xff]  ;;  %v593_v15 = vld [vmem:[%s5663_s10 + $0x1a0] sm:$0xff] }
  0xf7   : > { %4218 = vmatpush1.bf16.msra.mxu1 %v4217_v52  ;;  %4092 = vmatprep.subr.bf16.mxu0 %v4091_v53  ;;  %v4099_v13 = vpack.c.bf16 %v594_v8, %v590_v7  ;;  %v591_v16 = vld [vmem:[%s5663_s10 + $0x190] sm:$0xff]  ;;  %v4227_v17 = vpack.c.bf16 %v596_v10, %v592_v9  ;;  %v598_v19 = vld [vmem:[%s5663_s10 + $0x1c8] sm:$0xff]  ;;  %v600_v21 = vld [vmem:[%s5663_s10 + $0x1d8] sm:$0xff]  ;;  %v4101_v23 = vpack.c.bf16 %v593_v15, %v589_v14 }
  0xf8   : > { %4220 = vmatprep.subr.bf16.mxu1 %v4219_v57  ;;  %v595_v18 = vld [vmem:[%s5663_s10 + $0x1b0] sm:$0xff]  ;;  %v602_v20 = vld [vmem:[%s5663_s10 + $0x1e8] sm:$0xff]  ;;  %v604_v22 = vld [vmem:[%s5663_s10 + $0x1f8] sm:$0xff] }
  0xf9   : > { %v4229_v24 = vpack.c.bf16 %v595_v18, %v591_v16  ;;  %v4103_v25 = vpack.c.bf16 %v602_v20, %v598_v19  ;;  %v597_v26 = vld [vmem:[%s5663_s10 + $0x1c0] sm:$0xff]  ;;  %v599_v28 = vld [vmem:[%s5663_s10 + $0x1d0] sm:$0xff]  ;;  %v4231_v29 = vpack.c.bf16 %v604_v22, %v600_v21  ;;  %v606_v31 = vld [vmem:[%s5663_s10 + $0x208] sm:$0xff] }
  0xfa   : > { %4094 = vmatpush1.bf16.msra.mxu0 %v4093_v63  ;;  %v601_v27 = vld [vmem:[%s5663_s10 + $0x1e0] sm:$0xff]  ;;  %v603_v30 = vld [vmem:[%s5663_s10 + $0x1f0] sm:$0xff]  ;;  %v610_v32 = vld [vmem:[%s5663_s10 + $0x228] sm:$0xff] }
  0xfb   : > { %4222 = vmatpush1.bf16.msra.mxu1 %v4221_v0  ;;  %4096 = vmatprep.subr.bf16.mxu0 %v4095_v1  ;;  %v608_v33 = vld [vmem:[%s5663_s10 + $0x218] sm:$0xff]  ;;  %v4105_v35 = vpack.c.bf16 %v601_v27, %v597_v26  ;;  %v4233_v36 = vpack.c.bf16 %v603_v30, %v599_v28  ;;  %v4107_v37 = vpack.c.bf16 %v610_v32, %v606_v31  ;;  %v605_v38 = vld [vmem:[%s5663_s10 + $0x200] sm:$0xff]  ;;  %v607_v40 = vld [vmem:[%s5663_s10 + $0x210] sm:$0xff] }
  0xfc   : > { %4224 = vmatprep.subr.bf16.mxu1 %v4223_v5  ;;  %v612_v34 = vld [vmem:[%s5663_s10 + $0x238] sm:$0xff]  ;;  %v609_v39 = vld [vmem:[%s5663_s10 + $0x220] sm:$0xff]  ;;  %v611_v42 = vld [vmem:[%s5663_s10 + $0x230] sm:$0xff] }
  0xfd   : > { %v4235_v41 = vpack.c.bf16 %v612_v34, %v608_v33  ;;  %v614_v43 = vld [vmem:[%s5663_s10 + $0x248] sm:$0xff]  ;;  %v616_v45 = vld [vmem:[%s5663_s10 + $0x258] sm:$0xff]  ;;  %v4109_v47 = vpack.c.bf16 %v609_v39, %v605_v38  ;;  %v4237_v48 = vpack.c.bf16 %v611_v42, %v607_v40  ;;  %v613_v50 = vld [vmem:[%s5663_s10 + $0x240] sm:$0xff] }
  0xfe   : > { %4098 = vmatpush1.bf16.msra.mxu0 %v4097_v11  ;;  %v618_v44 = vld [vmem:[%s5663_s10 + $0x268] sm:$0xff]  ;;  %v620_v46 = vld [vmem:[%s5663_s10 + $0x278] sm:$0xff]  ;;  %v617_v51 = vld [vmem:[%s5663_s10 + $0x260] sm:$0xff] }
  0xff   : > { %4226 = vmatpush1.bf16.msra.mxu1 %v4225_v12  ;;  %4100 = vmatprep.subr.bf16.mxu0 %v4099_v13  ;;  %v4111_v49 = vpack.c.bf16 %v618_v44, %v614_v43  ;;  %v615_v52 = vld [vmem:[%s5663_s10 + $0x250] sm:$0xff]  ;;  %v4239_v53 = vpack.c.bf16 %v620_v46, %v616_v45  ;;  %v622_v55 = vld [vmem:[%s5663_s10 + $0x288] sm:$0xff]  ;;  %v624_v57 = vld [vmem:[%s5663_s10 + $0x298] sm:$0xff]  ;;  %v4113_v59 = vpack.c.bf16 %v617_v51, %v613_v50 }
 0x100   : > { %4228 = vmatprep.subr.bf16.mxu1 %v4227_v17  ;;  %v619_v54 = vld [vmem:[%s5663_s10 + $0x270] sm:$0xff]  ;;  %v626_v56 = vld [vmem:[%s5663_s10 + $0x2a8] sm:$0xff]  ;;  %v628_v58 = vld [vmem:[%s5663_s10 + $0x2b8] sm:$0xff] }
 0x101   : > { %v4241_v60 = vpack.c.bf16 %v619_v54, %v615_v52  ;;  %v4115_v61 = vpack.c.bf16 %v626_v56, %v622_v55  ;;  %v621_v62 = vld [vmem:[%s5663_s10 + $0x280] sm:$0xff]  ;;  %v623_v0 = vld [vmem:[%s5663_s10 + $0x290] sm:$0xff]  ;;  %v4243_v1 = vpack.c.bf16 %v628_v58, %v624_v57  ;;  %v630_v3 = vld [vmem:[%s5663_s10 + $0x2c8] sm:$0xff] }
 0x102   : > { %4102 = vmatpush1.bf16.msra.mxu0 %v4101_v23  ;;  %v625_v63 = vld [vmem:[%s5663_s10 + $0x2a0] sm:$0xff]  ;;  %v627_v2 = vld [vmem:[%s5663_s10 + $0x2b0] sm:$0xff]  ;;  %v634_v4 = vld [vmem:[%s5663_s10 + $0x2e8] sm:$0xff] }
 0x103   : > { %4230 = vmatpush1.bf16.msra.mxu1 %v4229_v24  ;;  %4104 = vmatprep.subr.bf16.mxu0 %v4103_v25  ;;  %v632_v5 = vld [vmem:[%s5663_s10 + $0x2d8] sm:$0xff]  ;;  %v4117_v7 = vpack.c.bf16 %v625_v63, %v621_v62  ;;  %v629_v8 = vld [vmem:[%s5663_s10 + $0x2c0] sm:$0xff]  ;;  %v4245_v9 = vpack.c.bf16 %v627_v2, %v623_v0  ;;  %v4119_v10 = vpack.c.bf16 %v634_v4, %v630_v3  ;;  %v631_v12 = vld [vmem:[%s5663_s10 + $0x2d0] sm:$0xff] }
 0x104   : > { %4232 = vmatprep.subr.bf16.mxu1 %v4231_v29  ;;  %v636_v6 = vld [vmem:[%s5663_s10 + $0x2f8] sm:$0xff]  ;;  %v633_v11 = vld [vmem:[%s5663_s10 + $0x2e0] sm:$0xff]  ;;  %v635_v13 = vld [vmem:[%s5663_s10 + $0x2f0] sm:$0xff] }
 0x105   : > { %v4247_v14 = vpack.c.bf16 %v636_v6, %v632_v5  ;;  %v638_v15 = vld [vmem:[%s5663_s10 + $0x308] sm:$0xff]  ;;  %v640_v18 = vld [vmem:[%s5663_s10 + $0x318] sm:$0xff]  ;;  %v4121_v20 = vpack.c.bf16 %v633_v11, %v629_v8  ;;  %v4249_v21 = vpack.c.bf16 %v635_v13, %v631_v12  ;;  %v637_v23 = vld [vmem:[%s5663_s10 + $0x300] sm:$0xff] }
 0x106   : > { %4106 = vmatpush1.bf16.msra.mxu0 %v4105_v35  ;;  %v642_v16 = vld [vmem:[%s5663_s10 + $0x328] sm:$0xff]  ;;  %v644_v19 = vld [vmem:[%s5663_s10 + $0x338] sm:$0xff]  ;;  %v641_v24 = vld [vmem:[%s5663_s10 + $0x320] sm:$0xff] }
 0x107   : > { %4234 = vmatpush1.bf16.msra.mxu1 %v4233_v36  ;;  %4108 = vmatprep.subr.bf16.mxu0 %v4107_v37  ;;  %v442_v17 = vld [vmem:[#allocation3 + $0x8] sm:$0xff]  ;;  %v4123_v22 = vpack.c.bf16 %v642_v16, %v638_v15  ;;  %v639_v25 = vld [vmem:[%s5663_s10 + $0x310] sm:$0xff]  ;;  %v4251_v26 = vpack.c.bf16 %v644_v19, %v640_v18  ;;  %v648_v30 = vld [vmem:[%s5663_s10 + $0x358] sm:$0xff]  ;;  %v4125_v32 = vpack.c.bf16 %v641_v24, %v637_v23 }
 0x108   : > { %4236 = vmatprep.subr.bf16.mxu1 %v4235_v41  ;;  %883 = vmatprep.mubr.f32.mxu0 %v442_v17  ;;  %v643_v27 = vld [vmem:[%s5663_s10 + $0x330] sm:$0xff]  ;;  %v646_v28 = vld [vmem:[%s5663_s10 + $0x348] sm:$0xff]  ;;  %v652_v31 = vld [vmem:[%s5663_s10 + $0x378] sm:$0xff] }
 0x109   : > { %1313 = vmatprep.mubr.f32.mxu1 %v442_v17  ;;  %v650_v29 = vld [vmem:[%s5663_s10 + $0x368] sm:$0xff]  ;;  %v4253_v33 = vpack.c.bf16 %v643_v27, %v639_v25  ;;  %v645_v35 = vld [vmem:[%s5663_s10 + $0x340] sm:$0xff]  ;;  %v647_v37 = vld [vmem:[%s5663_s10 + $0x350] sm:$0xff]  ;;  %v4255_v38 = vpack.c.bf16 %v652_v31, %v648_v30 }
 0x10a   : > { %4110 = vmatpush1.bf16.msra.mxu0 %v4109_v47  ;;  %v4127_v34 = vpack.c.bf16 %v650_v29, %v646_v28  ;;  %v649_v36 = vld [vmem:[%s5663_s10 + $0x360] sm:$0xff]  ;;  %v651_v39 = vld [vmem:[%s5663_s10 + $0x370] sm:$0xff]  ;;  %v654_v40 = vld [vmem:[%s5663_s10 + $0x388] sm:$0xff] }
 0x10b   : > { %4238 = vmatpush1.bf16.msra.mxu1 %v4237_v48  ;;  %4112 = vmatprep.subr.bf16.mxu0 %v4111_v49  ;;  %v658_v41 = vld [vmem:[%s5663_s10 + $0x3a8] sm:$0xff]  ;;  %v656_v42 = vld [vmem:[%s5663_s10 + $0x398] sm:$0xff]  ;;  %v4129_v44 = vpack.c.bf16 %v649_v36, %v645_v35  ;;  %v4257_v45 = vpack.c.bf16 %v651_v39, %v647_v37  ;;  %v653_v47 = vld [vmem:[%s5663_s10 + $0x380] sm:$0xff] }
 0x10c   : > { %4240 = vmatprep.subr.bf16.mxu1 %v4239_v53  ;;  %v660_v43 = vld [vmem:[%s5663_s10 + $0x3b8] sm:$0xff]  ;;  %v4131_v46 = vpack.c.bf16 %v658_v41, %v654_v40  ;;  %v657_v48 = vld [vmem:[%s5663_s10 + $0x3a0] sm:$0xff]  ;;  %v655_v49 = vld [vmem:[%s5663_s10 + $0x390] sm:$0xff] }
 0x10d   : > { %v4259_v50 = vpack.c.bf16 %v660_v43, %v656_v42  ;;  %v659_v51 = vld [vmem:[%s5663_s10 + $0x3b0] sm:$0xff]  ;;  %v662_v52 = vld [vmem:[%s5663_s10 + $0x3c8] sm:$0xff]  ;;  %v664_v54 = vld [vmem:[%s5663_s10 + $0x3d8] sm:$0xff]  ;;  %v4133_v56 = vpack.c.bf16 %v657_v48, %v653_v47 }
 0x10e   : > { %4114 = vmatpush1.bf16.msra.mxu0 %v4113_v59  ;;  %v666_v53 = vld [vmem:[%s5663_s10 + $0x3e8] sm:$0xff]  ;;  %v668_v55 = vld [vmem:[%s5663_s10 + $0x3f8] sm:$0xff]  ;;  %v4261_v57 = vpack.c.bf16 %v659_v51, %v655_v49  ;;  %v661_v59 = vld [vmem:[%s5663_s10 + $0x3c0] sm:$0xff] }
 0x10f   : > { %4242 = vmatpush1.bf16.msra.mxu1 %v4241_v60  ;;  %4116 = vmatprep.subr.bf16.mxu0 %v4115_v61  ;;  %v4135_v58 = vpack.c.bf16 %v666_v53, %v662_v52  ;;  %v665_v60 = vld [vmem:[%s5663_s10 + $0x3e0] sm:$0xff]  ;;  %v663_v61 = vld [vmem:[%s5663_s10 + $0x3d0] sm:$0xff]  ;;  %v4263_v62 = vpack.c.bf16 %v668_v55, %v664_v54  ;;  %v670_v0 = vld [vmem:[%s5663_s10 + $0x408] sm:$0xff] }
 0x110   : > { %4244 = vmatprep.subr.bf16.mxu1 %v4243_v1  ;;  %v667_v63 = vld [vmem:[%s5663_s10 + $0x3f0] sm:$0xff]  ;;  %v674_v1 = vld [vmem:[%s5663_s10 + $0x428] sm:$0xff]  ;;  %v672_v2 = vld [vmem:[%s5663_s10 + $0x418] sm:$0xff]  ;;  %v4137_v4 = vpack.c.bf16 %v665_v60, %v661_v59 }
 0x111   : > { %v676_v3 = vld [vmem:[%s5663_s10 + $0x438] sm:$0xff]  ;;  %v4265_v5 = vpack.c.bf16 %v667_v63, %v663_v61  ;;  %v4139_v6 = vpack.c.bf16 %v674_v1, %v670_v0  ;;  %v673_v8 = vld [vmem:[%s5663_s10 + $0x420] sm:$0xff]  ;;  %v682_v11 = vld [vmem:[%s5663_s10 + $0x468] sm:$0xff] }
 0x112   : > { %4118 = vmatpush1.bf16.msra.mxu0 %v4117_v7  ;;  %v669_v7 = vld [vmem:[%s5663_s10 + $0x400] sm:$0xff]  ;;  %v671_v12 = vld [vmem:[%s5663_s10 + $0x410] sm:$0xff]  ;;  %v680_v16 = vld [vmem:[%s5663_s10 + $0x458] sm:$0xff] }
 0x113   : > { %4246 = vmatpush1.bf16.msra.mxu1 %v4245_v9  ;;  %4120 = vmatprep.subr.bf16.mxu0 %v4119_v10  ;;  %v678_v9 = vld [vmem:[%s5663_s10 + $0x448] sm:$0xff]  ;;  %v4267_v10 = vpack.c.bf16 %v676_v3, %v672_v2  ;;  %v675_v13 = vld [vmem:[%s5663_s10 + $0x430] sm:$0xff]  ;;  %v4141_v15 = vpack.c.bf16 %v673_v8, %v669_v7  ;;  %v684_v17 = vld [vmem:[%s5663_s10 + $0x478] sm:$0xff] }
 0x114   : > { %4248 = vmatprep.subr.bf16.mxu1 %v4247_v14  ;;  %v441_v14 = vld [vmem:[#allocation3] sm:$0xff]  ;;  %v446_v18 = vld [vmem:[#allocation3 + $0x28] sm:$0xff]  ;;  %v4143_v19 = vpack.c.bf16 %v682_v11, %v678_v9  ;;  %v4269_v23 = vpack.c.bf16 %v675_v13, %v671_v12  ;;  %v4271_v25 = vpack.c.bf16 %v684_v17, %v680_v16  ;;  %v683_v27 = vld [vmem:[%s5663_s10 + $0x470] sm:$0xff] }
 0x115   : > { %v690_v24 = vld [vmem:[%s5663_s10 + $0x4a8] sm:$0xff]  ;;  %v445_v28 = vld [vmem:[#allocation3 + $0x20] sm:$0xff]  ;;  %v688_v29 = vld [vmem:[%s5663_s10 + $0x498] sm:$0xff] }
 0x116   : > { %4122 = vmatpush1.bf16.msra.mxu0 %v4121_v20  ;;  %v677_v20 = vld [vmem:[%s5663_s10 + $0x440] sm:$0xff]  ;;  %v692_v30 = vld [vmem:[%s5663_s10 + $0x4b8] sm:$0xff]  ;;  %v450_v31 = vld [vmem:[#allocation3 + $0x48] sm:$0xff] }
 0x117   : > { %4250 = vmatpush1.bf16.msra.mxu1 %v4249_v21  ;;  %4124 = vmatprep.subr.bf16.mxu0 %v4123_v22  ;;  %v681_v21 = vld [vmem:[%s5663_s10 + $0x460] sm:$0xff]  ;;  %v686_v22 = vld [vmem:[%s5663_s10 + $0x488] sm:$0xff]  ;;  %v4275_v39 = vpack.c.bf16 %v692_v30, %v688_v29  ;;  %v687_v40 = vld [vmem:[%s5663_s10 + $0x490] sm:$0xff] }
 0x118   : > { %4252 = vmatprep.subr.bf16.mxu1 %v4251_v26  ;;  %v679_v26 = vld [vmem:[%s5663_s10 + $0x450] sm:$0xff]  ;;  %v689_v35 = vld [vmem:[%s5663_s10 + $0x4a0] sm:$0xff]  ;;  %v694_v36 = vld [vmem:[%s5663_s10 + $0x4c8] sm:$0xff] }
 0x119   : > { %v4273_v37 = vpack.c.bf16 %v683_v27, %v679_v26  ;;  %v691_v41 = vld [vmem:[%s5663_s10 + $0x4b0] sm:$0xff]  ;;  %v449_v42 = vld [vmem:[#allocation3 + $0x40] sm:$0xff]  ;;  %v696_v43 = vld [vmem:[%s5663_s10 + $0x4d8] sm:$0xff] }
 0x11a   : > { %4126 = vmatpush1.bf16.msra.mxu0 %v4125_v32  ;;  %v4145_v32 = vpack.c.bf16 %v681_v21, %v677_v20  ;;  %v693_v48 = vld [vmem:[%s5663_s10 + $0x4c0] sm:$0xff]  ;;  %v4277_v51 = vpack.c.bf16 %v691_v41, %v687_v40  ;;  %v706_v52 = vld [vmem:[%s5663_s10 + $0x528] sm:$0xff]  ;;  %v695_v54 = vld [vmem:[%s5663_s10 + $0x4d0] sm:$0xff] }
 0x11b   : > { %4254 = vmatpush1.bf16.msra.mxu1 %v4253_v33  ;;  %4128 = vmatprep.subr.bf16.mxu0 %v4127_v34  ;;  %v4147_v33 = vpack.c.bf16 %v690_v24, %v686_v22  ;;  %v685_v34 = vld [vmem:[%s5663_s10 + $0x480] sm:$0xff]  ;;  %v699_v55 = vld [vmem:[%s5663_s10 + $0x4f0] sm:$0xff]  ;;  %v458_v59 = vld [vmem:[#allocation3 + $0x88] sm:$0xff] }
 0x11c   : > { %4256 = vmatprep.subr.bf16.mxu1 %v4255_v38  ;;  %v698_v38 = vld [vmem:[%s5663_s10 + $0x4e8] sm:$0xff]  ;;  %v697_v49 = vld [vmem:[%s5663_s10 + $0x4e0] sm:$0xff]  ;;  %v4281_v1 = vpack.c.bf16 %v699_v55, %v695_v54  ;;  %v712_v7 = vld [vmem:[%s5663_s10 + $0x558] sm:$0xff] }
 0x11d   : > { %v4151_v47 = vpack.c.bf16 %v698_v38, %v694_v36  ;;  %v4153_v60 = vpack.c.bf16 %v697_v49, %v693_v48  ;;  %v705_v63 = vld [vmem:[%s5663_s10 + $0x520] sm:$0xff]  ;;  %v710_v0 = vld [vmem:[%s5663_s10 + $0x548] sm:$0xff]  ;;  %v716_v8 = vld [vmem:[%s5663_s10 + $0x578] sm:$0xff] }
 0x11e   : > { %4130 = vmatpush1.bf16.msra.mxu0 %v4129_v44  ;;  %v700_v44 = vld [vmem:[%s5663_s10 + $0x4f8] sm:$0xff]  ;;  %v714_v2 = vld [vmem:[%s5663_s10 + $0x568] sm:$0xff]  ;;  %v709_v12 = vld [vmem:[%s5663_s10 + $0x540] sm:$0xff]  ;;  %v4287_v17 = vpack.c.bf16 %v716_v8, %v712_v7 }
 0x11f   : > { %4258 = vmatpush1.bf16.msra.mxu1 %v4257_v45  ;;  %4132 = vmatprep.subr.bf16.mxu0 %v4131_v46  ;;  %v454_v45 = vld [vmem:[#allocation3 + $0x68] sm:$0xff]  ;;  %v4149_v46 = vpack.c.bf16 %v689_v35, %v685_v34  ;;  %v4279_v53 = vpack.c.bf16 %v700_v44, %v696_v43  ;;  %v4159_v11 = vpack.c.bf16 %v714_v2, %v710_v0  ;;  %v713_v13 = vld [vmem:[%s5663_s10 + $0x560] sm:$0xff]  ;;  %v720_v21 = vld [vmem:[%s5663_s10 + $0x598] sm:$0xff] }
 0x120   : > { %4260 = vmatprep.subr.bf16.mxu1 %v4259_v50  ;;  %v702_v50 = vld [vmem:[%s5663_s10 + $0x508] sm:$0xff]  ;;  %v461_v20 = vld [vmem:[#allocation3 + $0xa0] sm:$0xff]  ;;  %v724_v22 = vld [vmem:[%s5663_s10 + $0x5b8] sm:$0xff]  ;;  %v4161_v24 = vpack.c.bf16 %v713_v13, %v709_v12 }
 0x121   : > { %v4155_v61 = vpack.c.bf16 %v706_v52, %v702_v50  ;;  %v462_v9 = vld [vmem:[#allocation3 + $0xa8] sm:$0xff]  ;;  %v717_v26 = vld [vmem:[%s5663_s10 + $0x580] sm:$0xff]  ;;  %v728_v35 = vld [vmem:[%s5663_s10 + $0x5d8] sm:$0xff] }
 0x122   : > { %4134 = vmatpush1.bf16.msra.mxu0 %v4133_v56  ;;  %v453_v56 = vld [vmem:[#allocation3 + $0x60] sm:$0xff]  ;;  %v722_v16 = vld [vmem:[%s5663_s10 + $0x5a8] sm:$0xff]  ;;  %v732_v36 = vld [vmem:[%s5663_s10 + $0x5f8] sm:$0xff] }
 0x123   : > { %4262 = vmatpush1.bf16.msra.mxu1 %v4261_v57  ;;  %4136 = vmatprep.subr.bf16.mxu0 %v4135_v58  ;;  %v704_v57 = vld [vmem:[%s5663_s10 + $0x518] sm:$0xff]  ;;  %v721_v27 = vld [vmem:[%s5663_s10 + $0x5a0] sm:$0xff]  ;;  %v730_v30 = vld [vmem:[%s5663_s10 + $0x5e8] sm:$0xff] }
 0x124   : > { %4264 = vmatprep.subr.bf16.mxu1 %v4263_v62  ;;  %v708_v58 = vld [vmem:[%s5663_s10 + $0x538] sm:$0xff]  ;;  %v701_v62 = vld [vmem:[%s5663_s10 + $0x500] sm:$0xff]  ;;  %v4165_v38 = vpack.c.bf16 %v721_v27, %v717_v26  ;;  %v738_v44 = vld [vmem:[%s5663_s10 + $0x628] sm:$0xff] }
 0x125   : > { %v4283_v3 = vpack.c.bf16 %v708_v58, %v704_v57  ;;  %v465_v34 = vld [vmem:[#allocation3 + $0xc0] sm:$0xff]  ;;  %v736_v49 = vld [vmem:[%s5663_s10 + $0x618] sm:$0xff]  ;;  %v746_v58 = vld [vmem:[%s5663_s10 + $0x668] sm:$0xff] }
 0x126   : > { %4138 = vmatpush1.bf16.msra.mxu0 %v4137_v4  ;;  %v703_v4 = vld [vmem:[%s5663_s10 + $0x510] sm:$0xff]  ;;  %v725_v40 = vld [vmem:[%s5663_s10 + $0x5c0] sm:$0xff]  ;;  %v740_v50 = vld [vmem:[%s5663_s10 + $0x638] sm:$0xff] }
 0x127   : > { %4266 = vmatpush1.bf16.msra.mxu1 %v4265_v5  ;;  %4140 = vmatprep.subr.bf16.mxu0 %v4139_v6  ;;  %v707_v5 = vld [vmem:[%s5663_s10 + $0x530] sm:$0xff]  ;;  %v457_v6 = vld [vmem:[#allocation3 + $0x80] sm:$0xff]  ;;  %v748_v0 = vld [vmem:[%s5663_s10 + $0x678] sm:$0xff] }
 0x128   : > { %4268 = vmatprep.subr.bf16.mxu1 %v4267_v10  ;;  %v4157_v10 = vpack.c.bf16 %v705_v63, %v701_v62  ;;  %v729_v41 = vld [vmem:[%s5663_s10 + $0x5e0] sm:$0xff]  ;;  %v744_v63 = vld [vmem:[%s5663_s10 + $0x658] sm:$0xff]  ;;  %v754_v8 = vld [vmem:[%s5663_s10 + $0x6a8] sm:$0xff] }
 0x129   : > { %884 = vmatmul.mubr.f32.vlgmr.msra.gmra.mrb[0].mxu0 %v441_v14  ;;  %v469_v48 = vld [vmem:[#allocation3 + $0xe0] sm:$0xff]  ;;  %v4169_v52 = vpack.c.bf16 %v729_v41, %v725_v40  ;;  %v752_v13 = vld [vmem:[%s5663_s10 + $0x698] sm:$0xff] }
 0x12a   : > { %1314 = vmatmul.mubr.f32.vlgmr.msra.gmra.mrb[0].mxu1 %v441_v14  ;;  %4142 = vmatpush1.bf16.msra.mxu0 %v4141_v15  ;;  %v718_v14 = vld [vmem:[%s5663_s10 + $0x588] sm:$0xff]  ;;  %v4285_v15 = vpack.c.bf16 %v707_v5, %v703_v4  ;;  %v733_v54 = vld [vmem:[%s5663_s10 + $0x600] sm:$0xff]  ;;  %v760_v27 = vld [vmem:[%s5663_s10 + $0x6d8] sm:$0xff] }
 0x12b   : > { %889 = vmatprep.mubr.f32.mxu0 %v446_v18  ;;  %1319 = vmatprep.mubr.f32.mxu1 %v446_v18  ;;  %v711_v18 = vld [vmem:[%s5663_s10 + $0x550] sm:$0xff]  ;;  %v737_v55 = vld [vmem:[%s5663_s10 + $0x620] sm:$0xff]  ;;  %v768_v41 = vld [vmem:[%s5663_s10 + $0x718] sm:$0xff] }
 0x12c   : > { %4144 = vmatprep.subr.bf16.mxu0 %v4143_v19  ;;  %4270 = vmatpush1.bf16.msra.mxu1 %v4269_v23  ;;  %v715_v19 = vld [vmem:[%s5663_s10 + $0x570] sm:$0xff]  ;;  %v466_v23 = vld [vmem:[#allocation3 + $0xc8] sm:$0xff]  ;;  %v473_v62 = vld [vmem:[#allocation3 + $0x100] sm:$0xff]  ;;  %v4173_v2 = vpack.c.bf16 %v737_v55, %v733_v54 }
 0x12d   : > { %890 = vmatmul.mubr.f32.gmra.mrb[2].mxu0 %v445_v28  ;;  %4272 = vmatprep.subr.bf16.mxu1 %v4271_v25  ;;  %v4163_v25 = vpack.c.bf16 %v722_v16, %v718_v14  ;;  %v4289_v29 = vpack.c.bf16 %v715_v19, %v711_v18  ;;  %v741_v4 = vld [vmem:[%s5663_s10 + $0x640] sm:$0xff]  ;;  %v756_v14 = vld [vmem:[%s5663_s10 + $0x6b8] sm:$0xff] }
 0x12e   : > { %1320 = vmatmul.mubr.f32.gmra.mrb[2].mxu1 %v445_v28  ;;  %895 = vmatprep.mubr.f32.mxu0 %v450_v31  ;;  %v726_v28 = vld [vmem:[%s5663_s10 + $0x5c8] sm:$0xff]  ;;  %v745_v5 = vld [vmem:[%s5663_s10 + $0x660] sm:$0xff]  ;;  %v776_v55 = vld [vmem:[%s5663_s10 + $0x758] sm:$0xff] }
 0x12f   : > { %1325 = vmatprep.mubr.f32.mxu1 %v450_v31  ;;  %4146 = vmatpush1.bf16.msra.mxu0 %v4145_v32  ;;  %v4291_v31 = vpack.c.bf16 %v724_v22, %v720_v21  ;;  %v719_v32 = vld [vmem:[%s5663_s10 + $0x590] sm:$0xff]  ;;  %v477_v12 = vld [vmem:[#allocation3 + $0x120] sm:$0xff]  ;;  %v4177_v16 = vpack.c.bf16 %v745_v5, %v741_v4  ;;  %v762_v22 = vld [vmem:[%s5663_s10 + $0x6e8] sm:$0xff] }
 0x130   : > { %4148 = vmatprep.subr.bf16.mxu0 %v4147_v33  ;;  %4274 = vmatpush1.bf16.msra.mxu1 %v4273_v37  ;;  %v723_v33 = vld [vmem:[%s5663_s10 + $0x5b0] sm:$0xff]  ;;  %v470_v37 = vld [vmem:[#allocation3 + $0xe8] sm:$0xff]  ;;  %v749_v18 = vld [vmem:[%s5663_s10 + $0x680] sm:$0xff] }
 0x131   : > { %896 = vmatmul.mubr.f32.gmra.mrb[4].mxu0 %v449_v42  ;;  %4276 = vmatprep.subr.bf16.mxu1 %v4275_v39  ;;  %v4167_v39 = vpack.c.bf16 %v730_v30, %v726_v28  ;;  %v4293_v43 = vpack.c.bf16 %v723_v33, %v719_v32  ;;  %v753_v19 = vld [vmem:[%s5663_s10 + $0x6a0] sm:$0xff]  ;;  %v764_v28 = vld [vmem:[%s5663_s10 + $0x6f8] sm:$0xff] }
 0x132   : > { %1326 = vmatmul.mubr.f32.gmra.mrb[4].mxu1 %v449_v42  ;;  %901 = vmatprep.mubr.f32.mxu0 %v454_v45  ;;  %v734_v42 = vld [vmem:[%s5663_s10 + $0x608] sm:$0xff]  ;;  %v481_v26 = vld [vmem:[#allocation3 + $0x140] sm:$0xff]  ;;  %v4181_v30 = vpack.c.bf16 %v753_v19, %v749_v18  ;;  %v784_v5 = vld [vmem:[%s5663_s10 + $0x798] sm:$0xff] }
 0x133   : > { %1331 = vmatprep.mubr.f32.mxu1 %v454_v45  ;;  %4150 = vmatpush1.bf16.msra.mxu0 %v4149_v46  ;;  %v4295_v45 = vpack.c.bf16 %v732_v36, %v728_v35  ;;  %v727_v46 = vld [vmem:[%s5663_s10 + $0x5d0] sm:$0xff]  ;;  %v757_v32 = vld [vmem:[%s5663_s10 + $0x6c0] sm:$0xff]  ;;  %v770_v36 = vld [vmem:[%s5663_s10 + $0x728] sm:$0xff] }
 0x134   : > { %4152 = vmatprep.subr.bf16.mxu0 %v4151_v47  ;;  %4278 = vmatpush1.bf16.msra.mxu1 %v4277_v51  ;;  %v731_v47 = vld [vmem:[%s5663_s10 + $0x5f0] sm:$0xff]  ;;  %v474_v51 = vld [vmem:[#allocation3 + $0x108] sm:$0xff]  ;;  %v761_v33 = vld [vmem:[%s5663_s10 + $0x6e0] sm:$0xff] }
 0x135   : > { %902 = vmatmul.mubr.f32.gmra.mrb[6].mxu0 %v453_v56  ;;  %4280 = vmatprep.subr.bf16.mxu1 %v4279_v53  ;;  %v4171_v53 = vpack.c.bf16 %v738_v44, %v734_v42  ;;  %v4297_v57 = vpack.c.bf16 %v731_v47, %v727_v46  ;;  %v485_v40 = vld [vmem:[#allocation3 + $0x160] sm:$0xff]  ;;  %v772_v42 = vld [vmem:[%s5663_s10 + $0x738] sm:$0xff]  ;;  %v4185_v44 = vpack.c.bf16 %v761_v33, %v757_v32 }
 0x136   : > { %1332 = vmatmul.mubr.f32.gmra.mrb[6].mxu1 %v453_v56  ;;  %907 = vmatprep.mubr.f32.mxu0 %v458_v59  ;;  %v742_v56 = vld [vmem:[%s5663_s10 + $0x648] sm:$0xff]  ;;  %v765_v46 = vld [vmem:[%s5663_s10 + $0x700] sm:$0xff]  ;;  %v792_v19 = vld [vmem:[%s5663_s10 + $0x7d8] sm:$0xff] }
 0x137   : > { %1337 = vmatprep.mubr.f32.mxu1 %v458_v59  ;;  %4154 = vmatpush1.bf16.msra.mxu0 %v4153_v60  ;;  %v4299_v59 = vpack.c.bf16 %v740_v50, %v736_v49  ;;  %v735_v60 = vld [vmem:[%s5663_s10 + $0x610] sm:$0xff]  ;;  %v769_v47 = vld [vmem:[%s5663_s10 + $0x720] sm:$0xff]  ;;  %v774_v49 = vld [vmem:[%s5663_s10 + $0x748] sm:$0xff] }
 0x138   : > { %4156 = vmatprep.subr.bf16.mxu0 %v4155_v61  ;;  %4282 = vmatpush1.bf16.msra.mxu1 %v4281_v1  ;;  %v739_v61 = vld [vmem:[%s5663_s10 + $0x630] sm:$0xff]  ;;  %v478_v1 = vld [vmem:[#allocation3 + $0x128] sm:$0xff]  ;;  %v489_v54 = vld [vmem:[#allocation3 + $0x180] sm:$0xff] }
 0x139   : > { %908 = vmatmul.mubr.f32.gmra.mrb[8].mxu0 %v457_v6  ;;  %4284 = vmatprep.subr.bf16.mxu1 %v4283_v3  ;;  %v4175_v3 = vpack.c.bf16 %v746_v58, %v742_v56  ;;  %v4301_v7 = vpack.c.bf16 %v739_v61, %v735_v60  ;;  %v778_v50 = vld [vmem:[%s5663_s10 + $0x768] sm:$0xff]  ;;  %v780_v56 = vld [vmem:[%s5663_s10 + $0x778] sm:$0xff]  ;;  %v4189_v58 = vpack.c.bf16 %v769_v47, %v765_v46  ;;  %v773_v60 = vld [vmem:[%s5663_s10 + $0x740] sm:$0xff] }
 0x13a   : > { %1338 = vmatmul.mubr.f32.gmra.mrb[8].mxu1 %v457_v6  ;;  %913 = vmatprep.mubr.f32.mxu0 %v462_v9  ;;  %v750_v6 = vld [vmem:[%s5663_s10 + $0x688] sm:$0xff]  ;;  %v777_v61 = vld [vmem:[%s5663_s10 + $0x760] sm:$0xff] }
 0x13b   : > { %1343 = vmatprep.mubr.f32.mxu1 %v462_v9  ;;  %4158 = vmatpush1.bf16.msra.mxu0 %v4157_v10  ;;  %v4303_v9 = vpack.c.bf16 %v748_v0, %v744_v63  ;;  %v743_v10 = vld [vmem:[%s5663_s10 + $0x650] sm:$0xff]  ;;  %v782_v63 = vld [vmem:[%s5663_s10 + $0x788] sm:$0xff]  ;;  %v493_v4 = vld [vmem:[#allocation3 + $0x1a0] sm:$0xff] }
 0x13c   : > { %4160 = vmatprep.subr.bf16.mxu0 %v4159_v11  ;;  %4286 = vmatpush1.bf16.msra.mxu1 %v4285_v15  ;;  %v747_v11 = vld [vmem:[%s5663_s10 + $0x670] sm:$0xff]  ;;  %v482_v15 = vld [vmem:[#allocation3 + $0x148] sm:$0xff]  ;;  %v497_v18 = vld [vmem:[#allocation3 + $0x1c0] sm:$0xff] }
 0x13d   : > { %914 = vmatmul.mubr.f32.gmra.mrb[10].mxu0 %v461_v20  ;;  %4288 = vmatprep.subr.bf16.mxu1 %v4287_v17  ;;  %v4179_v17 = vpack.c.bf16 %v754_v8, %v750_v6  ;;  %v4305_v21 = vpack.c.bf16 %v747_v11, %v743_v10  ;;  %v786_v0 = vld [vmem:[%s5663_s10 + $0x7a8] sm:$0xff]  ;;  %v788_v6 = vld [vmem:[%s5663_s10 + $0x7b8] sm:$0xff]  ;;  %v4193_v8 = vpack.c.bf16 %v777_v61, %v773_v60  ;;  %v781_v10 = vld [vmem:[%s5663_s10 + $0x780] sm:$0xff] }
 0x13e   : > { %1344 = vmatmul.mubr.f32.gmra.mrb[10].mxu1 %v461_v20  ;;  %919 = vmatprep.mubr.f32.mxu0 %v466_v23  ;;  %v758_v20 = vld [vmem:[%s5663_s10 + $0x6c8] sm:$0xff]  ;;  %v785_v11 = vld [vmem:[%s5663_s10 + $0x7a0] sm:$0xff]  ;;  %v2281_v60 = vld [vmem:[%s5672_s14 + $0x10] sm:$0xff] }
 0x13f   : > { %1349 = vmatprep.mubr.f32.mxu1 %v466_v23  ;;  %4162 = vmatpush1.bf16.msra.mxu0 %v4161_v24  ;;  %v4307_v23 = vpack.c.bf16 %v756_v14, %v752_v13  ;;  %v751_v24 = vld [vmem:[%s5663_s10 + $0x690] sm:$0xff]  ;;  %v4323_v14 = vpack.c.bf16 %v788_v6, %v784_v5  ;;  %v517_v46 = vld [vmem:[#allocation3 + $0x260] sm:$0xff]  ;;  %v522_v47 = vld [vmem:[#allocation3 + $0x288] sm:$0xff] }
 0x140   : > { %4164 = vmatprep.subr.bf16.mxu0 %v4163_v25  ;;  %4290 = vmatpush1.bf16.msra.mxu1 %v4289_v29  ;;  %v755_v25 = vld [vmem:[%s5663_s10 + $0x6b0] sm:$0xff]  ;;  %v486_v29 = vld [vmem:[#allocation3 + $0x168] sm:$0xff]  ;;  %v2285_v61 = vld [vmem:[%s5672_s14 + $0x30] sm:$0xff] }
 0x141   : > { %920 = vmatmul.mubr.f32.gmra.mrb[12].mxu0 %v465_v34  ;;  %4292 = vmatprep.subr.bf16.mxu1 %v4291_v31  ;;  %v4183_v31 = vpack.c.bf16 %v762_v22, %v758_v20  ;;  %v4309_v35 = vpack.c.bf16 %v755_v25, %v751_v24  ;;  %v783_v13 = vld [vmem:[%s5663_s10 + $0x790] sm:$0xff]  ;;  %v796_v20 = vld [vmem:[%s5663_s10 + $0x7f8] sm:$0xff]  ;;  %v4197_v22 = vpack.c.bf16 %v785_v11, %v781_v10  ;;  %v789_v25 = vld [vmem:[%s5663_s10 + $0x7c0] sm:$0xff] }
 0x142   : > { %1350 = vmatmul.mubr.f32.gmra.mrb[12].mxu1 %v465_v34  ;;  %925 = vmatprep.mubr.f32.mxu0 %v470_v37  ;;  %v766_v34 = vld [vmem:[%s5663_s10 + $0x708] sm:$0xff]  ;;  %v4461_v5 = vpack.c.bf16 %v2285_v61, %v2281_v60  ;;  %v2293_v11 = vld [vmem:[%s5672_s14 + $0x70] sm:$0xff] }
 0x143   : > { %1355 = vmatprep.mubr.f32.mxu1 %v470_v37  ;;  %4166 = vmatpush1.bf16.msra.mxu0 %v4165_v38  ;;  %v4311_v37 = vpack.c.bf16 %v764_v28, %v760_v27  ;;  %v759_v38 = vld [vmem:[%s5663_s10 + $0x6d0] sm:$0xff]  ;;  %v4327_v27 = vpack.c.bf16 %v796_v20, %v792_v19 }
 0x144   : > { %4168 = vmatprep.subr.bf16.mxu0 %v4167_v39  ;;  %4294 = vmatpush1.bf16.msra.mxu1 %v4293_v43  ;;  %v763_v39 = vld [vmem:[%s5663_s10 + $0x6f0] sm:$0xff]  ;;  %v490_v43 = vld [vmem:[#allocation3 + $0x188] sm:$0xff] }
 0x145   : > { %926 = vmatmul.mubr.f32.gmra.mrb[14].mxu0 %v469_v48  ;;  %4296 = vmatprep.subr.bf16.mxu1 %v4295_v45  ;;  %v4187_v45 = vpack.c.bf16 %v770_v36, %v766_v34  ;;  %v791_v28 = vld [vmem:[%s5663_s10 + $0x7d0] sm:$0xff]  ;;  %v505_v34 = vld [vmem:[#allocation3 + $0x200] sm:$0xff] }
 0x146   : > { %1356 = vmatmul.mubr.f32.gmra.mrb[14].mxu1 %v469_v48  ;;  %931 = vmatprep.mubr.f32.mxu0 %v474_v51  ;;  %v4313_v48 = vpack.c.bf16 %v763_v39, %v759_v38  ;;  %v509_v36 = vld [vmem:[#allocation3 + $0x220] sm:$0xff]  ;;  %v2280_v39 = vld [vmem:[%s5672_s14 + $0x8] sm:$0xff] }
 0x147   : > { %1361 = vmatprep.mubr.f32.mxu1 %v474_v51  ;;  %4170 = vmatpush1.bf16.msra.mxu0 %v4169_v52  ;;  %v4315_v51 = vpack.c.bf16 %v772_v42, %v768_v41  ;;  %v767_v52 = vld [vmem:[%s5663_s10 + $0x710] sm:$0xff]  ;;  %v513_v38 = vld [vmem:[#allocation3 + $0x240] sm:$0xff]  ;;  %v518_v42 = vld [vmem:[#allocation3 + $0x268] sm:$0xff] }
 0x148   : > { %4172 = vmatprep.subr.bf16.mxu0 %v4171_v53  ;;  %4298 = vmatpush1.bf16.msra.mxu1 %v4297_v57  ;;  %v771_v53 = vld [vmem:[%s5663_s10 + $0x730] sm:$0xff]  ;;  %v494_v57 = vld [vmem:[#allocation3 + $0x1a8] sm:$0xff]  ;;  %v2282_v41 = vld [vmem:[%s5672_s14 + $0x18] sm:$0xff] }
 0x149   : > { %932 = vmatmul.mubr.f32.gmra.mrb[16].mxu0 %v473_v62  ;;  %4300 = vmatprep.subr.bf16.mxu1 %v4299_v59  ;;  %v4191_v59 = vpack.c.bf16 %v778_v50, %v774_v49  ;;  %v526_v49 = vld [vmem:[#allocation3 + $0x2a8] sm:$0xff]  ;;  %v525_v50 = vld [vmem:[#allocation3 + $0x2a0] sm:$0xff] }
 0x14a   : > { %1362 = vmatmul.mubr.f32.gmra.mrb[16].mxu1 %v473_v62  ;;  %937 = vmatprep.mubr.f32.mxu0 %v478_v1  ;;  %v4317_v62 = vpack.c.bf16 %v771_v53, %v767_v52  ;;  %v529_v52 = vld [vmem:[#allocation3 + $0x2c0] sm:$0xff]  ;;  %v534_v53 = vld [vmem:[#allocation3 + $0x2e8] sm:$0xff] }
 0x14b   : > { %1367 = vmatprep.mubr.f32.mxu1 %v478_v1  ;;  %4174 = vmatpush1.bf16.msra.mxu0 %v4173_v2  ;;  %v4319_v1 = vpack.c.bf16 %v780_v56, %v776_v55  ;;  %v775_v2 = vld [vmem:[%s5663_s10 + $0x750] sm:$0xff]  ;;  %v538_v55 = vld [vmem:[#allocation3 + $0x308] sm:$0xf]  ;;  %v537_v56 = vld [vmem:[#allocation3 + $0x300] sm:$0xf] }
 0x14c   : > { %4176 = vmatprep.subr.bf16.mxu0 %v4175_v3  ;;  %4302 = vmatpush1.bf16.msra.mxu1 %v4301_v7  ;;  %v779_v3 = vld [vmem:[%s5663_s10 + $0x770] sm:$0xff]  ;;  %v498_v7 = vld [vmem:[#allocation3 + $0x1c8] sm:$0xff] }
 0x14d   : > { %938 = vmatmul.mubr.f32.gmra.mrb[18].mxu0 %v477_v12  ;;  %4304 = vmatprep.subr.bf16.mxu1 %v4303_v9  ;;  %v4195_v9 = vpack.c.bf16 %v786_v0, %v782_v63  ;;  %v2292_v63 = vld [vmem:[%s5672_s14 + $0x68] sm:$0xff] }
 0x14e   : > { %1368 = vmatmul.mubr.f32.gmra.mrb[18].mxu1 %v477_v12  ;;  %943 = vmatprep.mubr.f32.mxu0 %v482_v15  ;;  %v4321_v12 = vpack.c.bf16 %v779_v3, %v775_v2  ;;  %v443_v0 = vld [vmem:[#allocation3 + $0x10] sm:$0xff]  ;;  %v2294_v2 = vld [vmem:[%s5672_s14 + $0x78] sm:$0xff]  ;;  %v448_v3 = vld [vmem:[#allocation3 + $0x38] sm:$0xff] }
 0x14f   : > { %1373 = vmatprep.mubr.f32.mxu1 %v482_v15  ;;  %4178 = vmatpush1.bf16.msra.mxu0 %v4177_v16  ;;  %v787_v15 = vld [vmem:[%s5663_s10 + $0x7b0] sm:$0xff]  ;;  %v790_v16 = vld [vmem:[%s5663_s10 + $0x7c8] sm:$0xff] }
 0x150   : > { %4180 = vmatprep.subr.bf16.mxu0 %v4179_v17  ;;  %4306 = vmatpush1.bf16.msra.mxu1 %v4305_v21  ;;  %v794_v17 = vld [vmem:[%s5663_s10 + $0x7e8] sm:$0xff] }
 0x151   : > { %944 = vmatmul.mubr.f32.gmra.mrb[20].mxu0 %v481_v26  ;;  %4308 = vmatprep.subr.bf16.mxu1 %v4307_v23  ;;  %v502_v21 = vld [vmem:[#allocation3 + $0x1e8] sm:$0xff]  ;;  %v4325_v23 = vpack.c.bf16 %v787_v15, %v783_v13  ;;  %v4199_v24 = vpack.c.bf16 %v794_v17, %v790_v16  ;;  %v2300_v13 = vld [vmem:[%s5672_s14 + $0xa8] sm:$0xff]  ;;  %v2298_v15 = vld [vmem:[%s5672_s14 + $0x98] sm:$0xff] }
 0x152   : > { %1374 = vmatmul.mubr.f32.gmra.mrb[20].mxu1 %v481_v26  ;;  %949 = vmatprep.mubr.f32.mxu0 %v486_v29  ;;  %v793_v26 = vld [vmem:[%s5663_s10 + $0x7e0] sm:$0xff]  ;;  %v452_v17 = vld [vmem:[#allocation3 + $0x58] sm:$0xff] }
 0x153   : > { %1379 = vmatprep.mubr.f32.mxu1 %v486_v29  ;;  %4182 = vmatpush1.bf16.msra.mxu0 %v4181_v30  ;;  %v795_v29 = vld [vmem:[%s5663_s10 + $0x7f0] sm:$0xff]  ;;  %v501_v30 = vld [vmem:[#allocation3 + $0x1e0] sm:$0xff]  ;;  %v4201_v32 = vpack.c.bf16 %v793_v26, %v789_v25  ;;  %v2301_v25 = vld [vmem:[%s5672_s14 + $0xb0] sm:$0xff] }
 0x154   : > { %4184 = vmatprep.subr.bf16.mxu0 %v4183_v31  ;;  %4310 = vmatpush1.bf16.msra.mxu1 %v4309_v35  ;;  %v506_v31 = vld [vmem:[#allocation3 + $0x208] sm:$0xff]  ;;  %v4329_v33 = vpack.c.bf16 %v795_v29, %v791_v28  ;;  %v2302_v16 = vld [vmem:[%s5672_s14 + $0xb8] sm:$0xff]  ;;  %v2304_v26 = vld [vmem:[%s5672_s14 + $0xc8] sm:$0xff] }
 0x155   : > { %950 = vmatmul.mubr.f32.gmra.mrb[22].mxu0 %v485_v40  ;;  %4312 = vmatprep.subr.bf16.mxu1 %v4311_v37  ;;  %v510_v35 = vld [vmem:[#allocation3 + $0x228] sm:$0xff]  ;;  %v451_v28 = vld [vmem:[#allocation3 + $0x50] sm:$0xff]  ;;  %v2306_v29 = vld [vmem:[%s5672_s14 + $0xd8] sm:$0xff] }
 0x156   : > { %1380 = vmatmul.mubr.f32.gmra.mrb[22].mxu1 %v485_v40  ;;  %955 = vmatprep.mubr.f32.mxu0 %v490_v43  ;;  %v514_v37 = vld [vmem:[#allocation3 + $0x248] sm:$0xff]  ;;  %v2284_v40 = vld [vmem:[%s5672_s14 + $0x28] sm:$0xff] }
 0x157   : > { %1385 = vmatprep.mubr.f32.mxu1 %v490_v43  ;;  %4186 = vmatpush1.bf16.msra.mxu0 %v4185_v44  ;;  %v4331_v43 = vpack.c.bf16 %v2284_v40, %v2280_v39  ;;  %v2286_v44 = vld [vmem:[%s5672_s14 + $0x38] sm:$0xff]  ;;  %v2309_v39 = vld [vmem:[%s5672_s14 + $0xf0] sm:$0xff]  ;;  %v2312_v40 = vld [vmem:[%s5672_s14 + $0x108] sm:$0xff] }
 0x158   : > { %4188 = vmatprep.subr.bf16.mxu0 %v4187_v45  ;;  %4314 = vmatpush1.bf16.msra.mxu1 %v4313_v48  ;;  %v4459_v45 = vpack.c.bf16 %v2286_v44, %v2282_v41  ;;  %v521_v48 = vld [vmem:[#allocation3 + $0x280] sm:$0xff]  ;;  %v2316_v41 = vld [vmem:[%s5672_s14 + $0x128] sm:$0xff] }
 0x159   : > { %956 = vmatmul.mubr.f32.gmra.mrb[24].mxu0 %v489_v54  ;;  %4316 = vmatprep.subr.bf16.mxu1 %v4315_v51  ;;  %v530_v51 = vld [vmem:[#allocation3 + $0x2c8] sm:$0xff]  ;;  %v2318_v44 = vld [vmem:[%s5672_s14 + $0x138] sm:$0xff] }
 0x15a   : > { %1386 = vmatmul.mubr.f32.gmra.mrb[24].mxu1 %v489_v54  ;;  %961 = vmatprep.mubr.f32.mxu0 %v494_v57  ;;  %v533_v54 = vld [vmem:[#allocation3 + $0x2e0] sm:$0xff] }
 0x15b   : > { %1391 = vmatprep.mubr.f32.mxu1 %v494_v57  ;;  %4190 = vmatpush1.bf16.msra.mxu0 %v4189_v58  ;;  %v444_v57 = vld [vmem:[#allocation3 + $0x18] sm:$0xff]  ;;  %v2279_v58 = vld [vmem:[%s5672_s14] sm:$0xff] }
 0x15c   : > { %4192 = vmatprep.subr.bf16.mxu0 %v4191_v59  ;;  %4318 = vmatpush1.bf16.msra.mxu1 %v4317_v62  ;;  %v2283_v59 = vld [vmem:[%s5672_s14 + $0x20] sm:$0xff]  ;;  %v2288_v62 = vld [vmem:[%s5672_s14 + $0x48] sm:$0xff] }
 0x15d   : > { %962 = vmatmul.mubr.f32.gmra.mrb[26].mxu0 %v493_v4  ;;  %4320 = vmatprep.subr.bf16.mxu1 %v4319_v1  ;;  %v2290_v1 = vld [vmem:[%s5672_s14 + $0x58] sm:$0xff]  ;;  %v4335_v6 = vpack.c.bf16 %v2292_v63, %v2288_v62  ;;  %v2319_v63 = vld [vmem:[%s5672_s14 + $0x140] sm:$0xff] }
 0x15e   : > { %1392 = vmatmul.mubr.f32.gmra.mrb[26].mxu1 %v493_v4  ;;  %967 = vmatprep.mubr.f32.mxu0 %v498_v7  ;;  %v4333_v4 = vpack.c.bf16 %v2283_v59, %v2279_v58  ;;  %v4463_v10 = vpack.c.bf16 %v2294_v2, %v2290_v1  ;;  %v2326_v58 = vld [vmem:[%s5672_s14 + $0x178] sm:$0xff]  ;;  %v464_v59 = vld [vmem:[#allocation3 + $0xb8] sm:$0xff] }
 0x15f   : > { %1397 = vmatprep.mubr.f32.mxu1 %v498_v7  ;;  %4194 = vmatpush1.bf16.msra.mxu0 %v4193_v8  ;;  %v2287_v7 = vld [vmem:[%s5672_s14 + $0x40] sm:$0xff]  ;;  %v2321_v1 = vld [vmem:[%s5672_s14 + $0x150] sm:$0xff] }
 0x160   : > { %4196 = vmatprep.subr.bf16.mxu0 %v4195_v9  ;;  %4322 = vmatpush1.bf16.msra.mxu1 %v4321_v12  ;;  %v2291_v8 = vld [vmem:[%s5672_s14 + $0x60] sm:$0xff]  ;;  %v2289_v9 = vld [vmem:[%s5672_s14 + $0x50] sm:$0xff]  ;;  %v2296_v12 = vld [vmem:[%s5672_s14 + $0x88] sm:$0xff] }
 0x161   : > { %968 = vmatmul.mubr.f32.gmra.mrb[28].mxu0 %v497_v18  ;;  %4324 = vmatprep.subr.bf16.mxu1 %v4323_v14  ;;  %v447_v14 = vld [vmem:[#allocation3 + $0x30] sm:$0xff]  ;;  %v4465_v19 = vpack.c.bf16 %v2293_v11, %v2289_v9  ;;  %v4339_v20 = vpack.c.bf16 %v2300_v13, %v2296_v12  ;;  %v468_v9 = vld [vmem:[#allocation3 + $0xd8] sm:$0xff]  ;;  %v2327_v13 = vld [vmem:[%s5672_s14 + $0x180] sm:$0xff] }
 0x162   : > { %1398 = vmatmul.mubr.f32.gmra.mrb[28].mxu1 %v497_v18  ;;  %973 = vmatprep.mubr.f32.mxu0 %v502_v21  ;;  %v4337_v18 = vpack.c.bf16 %v2291_v8, %v2287_v7  ;;  %v2330_v7 = vld [vmem:[%s5672_s14 + $0x198] sm:$0xff] }
 0x163   : > { %1403 = vmatprep.mubr.f32.mxu1 %v502_v21  ;;  %4198 = vmatpush1.bf16.msra.mxu0 %v4197_v22  ;;  %v2295_v21 = vld [vmem:[%s5672_s14 + $0x80] sm:$0xff]  ;;  %v2334_v8 = vld [vmem:[%s5672_s14 + $0x1b8] sm:$0xff] }
 0x164   : > { %4326 = vmatpush1.bf16.msra.mxu1 %v4325_v23  ;;  %4200 = vmatprep.subr.bf16.mxu0 %v4199_v24  ;;  %v2299_v22 = vld [vmem:[%s5672_s14 + $0xa0] sm:$0xff]  ;;  %v2297_v23 = vld [vmem:[%s5672_s14 + $0x90] sm:$0xff]  ;;  %v4467_v24 = vpack.c.bf16 %v2302_v16, %v2298_v15  ;;  %v4483_v16 = vpack.c.bf16 %v2334_v8, %v2330_v7 }
 0x165   : > { %974 = vmatmul.mubr.f32.gmra.mrb[30].mxu0 %v501_v30  ;;  %4328 = vmatprep.subr.bf16.mxu1 %v4327_v27  ;;  %v2308_v27 = vld [vmem:[%s5672_s14 + $0xe8] sm:$0xff]  ;;  %v2329_v15 = vld [vmem:[%s5672_s14 + $0x190] sm:$0xff] }
 0x166   : > { %1404 = vmatmul.mubr.f32.gmra.mrb[30].mxu1 %v501_v30  ;;  %979 = vmatprep.mubr.f32.mxu0 %v506_v31  ;;  %v2310_v30 = vld [vmem:[%s5672_s14 + $0xf8] sm:$0xff]  ;;  %v2361_v7 = vld [vmem:[%s5672_s14 + $0x290] sm:$0xff] }
 0x167   : > { %1409 = vmatprep.mubr.f32.mxu1 %v506_v31  ;;  %4202 = vmatpush1.bf16.msra.mxu0 %v4201_v32  ;;  %v456_v31 = vld [vmem:[#allocation3 + $0x78] sm:$0xff]  ;;  %v4341_v32 = vpack.c.bf16 %v2299_v22, %v2295_v21  ;;  %v2338_v21 = vld [vmem:[%s5672_s14 + $0x1d8] sm:$0xff] }
 0x168   : > { %4330 = vmatpush1.bf16.msra.mxu1 %v4329_v33  ;;  %4332 = vmatprep.subr.bf16.mxu0 %v4331_v43  ;;  %v4469_v33 = vpack.c.bf16 %v2301_v25, %v2297_v23  ;;  %v2314_v43 = vld [vmem:[%s5672_s14 + $0x118] sm:$0xff]  ;;  %v472_v23 = vld [vmem:[#allocation3 + $0xf8] sm:$0xff] }
 0x169   : > { %980 = vmatmul.mubr.f32.gmra.mrb[32].mxu0 %v505_v34  ;;  %4460 = vmatprep.subr.bf16.mxu1 %v4459_v45  ;;  %v460_v45 = vld [vmem:[#allocation3 + $0x98] sm:$0xff]  ;;  %v2342_v22 = vld [vmem:[%s5672_s14 + $0x1f8] sm:$0xff] }
 0x16a   : > { %1410 = vmatmul.mubr.f32.gmra.mrb[32].mxu1 %v505_v34  ;;  %985 = vmatprep.mubr.f32.mxu0 %v510_v35  ;;  %v4343_v34 = vpack.c.bf16 %v2308_v27, %v2304_v26  ;;  %v2335_v27 = vld [vmem:[%s5672_s14 + $0x1c0] sm:$0xff] }
 0x16b   : > { %1415 = vmatprep.mubr.f32.mxu1 %v510_v35  ;;  %v2303_v35 = vld [vmem:[%s5672_s14 + $0xc0] sm:$0xff] }
 0x16d   : > { %986 = vmatmul.mubr.f32.gmra.mrb[34].mxu0 %v509_v36 }
 0x16e   : > { %1416 = vmatmul.mubr.f32.gmra.mrb[34].mxu1 %v509_v36  ;;  %991 = vmatprep.mubr.f32.mxu0 %v514_v37  ;;  %v2307_v36 = vld [vmem:[%s5672_s14 + $0xe0] sm:$0xff] }
 0x16f   : > { %1421 = vmatprep.mubr.f32.mxu1 %v514_v37  ;;  %v2305_v37 = vld [vmem:[%s5672_s14 + $0xd0] sm:$0xff] }
 0x171   : > { %992 = vmatmul.mubr.f32.gmra.mrb[36].mxu0 %v513_v38 }
 0x172   : > { %1422 = vmatmul.mubr.f32.gmra.mrb[36].mxu1 %v513_v38  ;;  %997 = vmatprep.mubr.f32.mxu0 %v518_v42  ;;  %v4471_v38 = vpack.c.bf16 %v2310_v30, %v2306_v29  ;;  %v2337_v29 = vld [vmem:[%s5672_s14 + $0x1d0] sm:$0xff]  ;;  %v4487_v30 = vpack.c.bf16 %v2342_v22, %v2338_v21 }
 0x173   : > { %1427 = vmatprep.mubr.f32.mxu1 %v518_v42  ;;  %v455_v42 = vld [vmem:[#allocation3 + $0x70] sm:$0xff]  ;;  %v2369_v21 = vld [vmem:[%s5672_s14 + $0x2d0] sm:$0xff] }
 0x175   : > { %998 = vmatmul.mubr.f32.gmra.mrb[38].mxu0 %v517_v46 }
 0x176   : > { %1428 = vmatmul.mubr.f32.gmra.mrb[38].mxu1 %v517_v46  ;;  %1003 = vmatprep.mubr.f32.mxu0 %v522_v47  ;;  %v4345_v46 = vpack.c.bf16 %v2307_v36, %v2303_v35  ;;  %v2346_v35 = vld [vmem:[%s5672_s14 + $0x218] sm:$0xff] }
 0x177   : > { %1433 = vmatprep.mubr.f32.mxu1 %v522_v47  ;;  %v4473_v47 = vpack.c.bf16 %v2309_v39, %v2305_v37  ;;  %v2350_v36 = vld [vmem:[%s5672_s14 + $0x238] sm:$0xff]  ;;  %v476_v37 = vld [vmem:[#allocation3 + $0x118] sm:$0xff] }
 0x179   : > { %1004 = vmatmul.mubr.f32.gmra.mrb[40].mxu0 %v521_v48 }
 0x17a   : > { %1434 = vmatmul.mubr.f32.gmra.mrb[40].mxu1 %v521_v48  ;;  %1009 = vmatprep.mubr.f32.mxu0 %v526_v49  ;;  %v4347_v48 = vpack.c.bf16 %v2316_v41, %v2312_v40  ;;  %v2343_v41 = vld [vmem:[%s5672_s14 + $0x200] sm:$0xff] }
 0x17b   : > { %1439 = vmatprep.mubr.f32.mxu1 %v526_v49  ;;  %v2311_v49 = vld [vmem:[%s5672_s14 + $0x100] sm:$0xff] }
 0x17d   : > { %1010 = vmatmul.mubr.f32.gmra.mrb[42].mxu0 %v525_v50 }
 0x17e   : > { %1440 = vmatmul.mubr.f32.gmra.mrb[42].mxu1 %v525_v50  ;;  %1015 = vmatprep.mubr.f32.mxu0 %v530_v51  ;;  %v2315_v50 = vld [vmem:[%s5672_s14 + $0x120] sm:$0xff] }
 0x17f   : > { %1445 = vmatprep.mubr.f32.mxu1 %v530_v51  ;;  %v2313_v51 = vld [vmem:[%s5672_s14 + $0x110] sm:$0xff]  ;;  %v4349_v60 = vpack.c.bf16 %v2315_v50, %v2311_v49  ;;  %v2354_v49 = vld [vmem:[%s5672_s14 + $0x258] sm:$0xff] }
 0x180   : > { %v2358_v50 = vld [vmem:[%s5672_s14 + $0x278] sm:$0xff] }
 0x181   : > { %1016 = vmatmul.mubr.f32.gmra.mrb[44].mxu0 %v529_v52 }
 0x182   : > { %1446 = vmatmul.mubr.f32.gmra.mrb[44].mxu1 %v529_v52  ;;  %1021 = vmatprep.mubr.f32.mxu0 %v534_v53  ;;  %v4475_v52 = vpack.c.bf16 %v2318_v44, %v2314_v43  ;;  %v2345_v43 = vld [vmem:[%s5672_s14 + $0x210] sm:$0xff]  ;;  %v4491_v44 = vpack.c.bf16 %v2350_v36, %v2346_v35 }
 0x183   : > { %1451 = vmatprep.mubr.f32.mxu1 %v534_v53  ;;  %v2317_v53 = vld [vmem:[%s5672_s14 + $0x130] sm:$0xff] }
 0x184   : > { %v4477_v61 = vpack.c.bf16 %v2317_v53, %v2313_v51  ;;  %v480_v51 = vld [vmem:[#allocation3 + $0x138] sm:$0xff] }
 0x185   : > { %1022 = vmatmul.mubr.f32.gmra.mrb[46].mxu0 %v533_v54  ;;  %v2377_v36 = vld [vmem:[%s5672_s14 + $0x310] sm:$0xff] }
 0x186   : > { %1452 = vmatmul.mubr.f32.gmra.mrb[46].mxu1 %v533_v54  ;;  %1027 = vmatprep.mubr.f32.mxu0 %v538_v55  ;;  %v2320_v54 = vld [vmem:[%s5672_s14 + $0x148] sm:$0xff] }
 0x187   : > { %1457 = vmatprep.mubr.f32.mxu1 %v538_v55  ;;  %v2324_v55 = vld [vmem:[%s5672_s14 + $0x168] sm:$0xff] }
 0x188   : > { %v4351_v62 = vpack.c.bf16 %v2324_v55, %v2320_v54  ;;  %v2351_v55 = vld [vmem:[%s5672_s14 + $0x240] sm:$0xff] }
 0x189   : > { %1028 = vmatmul.mubr.f32.gmra.mrb[48].mxu0 %v537_v56 }
 0x18a   : > { %1458 = vmatmul.mubr.f32.gmra.mrb[48].mxu1 %v537_v56  ;;  %1098 = vmatprep.mubr.f32.mxu0 %v444_v57  ;;  %v459_v56 = vld [vmem:[#allocation3 + $0x90] sm:$0xff] }
 0x18b   : > { %1528 = vmatprep.mubr.f32.mxu1 %v444_v57  ;;  %v2322_v57 = vld [vmem:[%s5672_s14 + $0x158] sm:$0xff] }
 0x18c   : > { %v4479_v2 = vpack.c.bf16 %v2326_v58, %v2322_v57  ;;  %v2353_v57 = vld [vmem:[%s5672_s14 + $0x250] sm:$0xff]  ;;  %v4495_v58 = vpack.c.bf16 %v2358_v50, %v2354_v49  ;;  %v511_v50 = vld [vmem:[#allocation3 + $0x230] sm:$0xff] }
 0x18d   : > { %1099 = vmatmul.mubr.f32.vlgmr.msra.gmra.mrb[0].mxu0 %v443_v0  ;;  %v512_v49 = vld [vmem:[#allocation3 + $0x238] sm:$0xff] }
 0x18e   : > { %1529 = vmatmul.mubr.f32.vlgmr.msra.gmra.mrb[0].mxu1 %v443_v0  ;;  %1104 = vmatprep.mubr.f32.mxu0 %v448_v3  ;;  %v2323_v0 = vld [vmem:[%s5672_s14 + $0x160] sm:$0xff] }
 0x18f   : > { %1534 = vmatprep.mubr.f32.mxu1 %v448_v3  ;;  %4334 = vmatpush1.bf16.msra.mxu0 %v4333_v4  ;;  %v2325_v3 = vld [vmem:[%s5672_s14 + $0x170] sm:$0xff]  ;;  %v2328_v4 = vld [vmem:[%s5672_s14 + $0x188] sm:$0xff] }
 0x190   : > { %4462 = vmatpush1.bf16.msra.mxu1 %v4461_v5  ;;  %4336 = vmatprep.subr.bf16.mxu0 %v4335_v6  ;;  %v2332_v5 = vld [vmem:[%s5672_s14 + $0x1a8] sm:$0xff]  ;;  %v4481_v11 = vpack.c.bf16 %v2325_v3, %v2321_v1  ;;  %v484_v1 = vld [vmem:[#allocation3 + $0x158] sm:$0xff] }
 0x191   : > { %1105 = vmatmul.mubr.f32.gmra.mrb[2].mxu0 %v447_v14  ;;  %4464 = vmatprep.subr.bf16.mxu1 %v4463_v10  ;;  %v463_v6 = vld [vmem:[#allocation3 + $0xb0] sm:$0xff]  ;;  %v4353_v10 = vpack.c.bf16 %v2323_v0, %v2319_v63  ;;  %v4355_v12 = vpack.c.bf16 %v2332_v5, %v2328_v4  ;;  %v2362_v63 = vld [vmem:[%s5672_s14 + $0x298] sm:$0xff]  ;;  %v2359_v5 = vld [vmem:[%s5672_s14 + $0x280] sm:$0xff] }
 0x192   : > { %1535 = vmatmul.mubr.f32.gmra.mrb[2].mxu1 %v447_v14  ;;  %1110 = vmatprep.mubr.f32.mxu0 %v452_v17  ;;  %v2331_v14 = vld [vmem:[%s5672_s14 + $0x1a0] sm:$0xff]  ;;  %v2366_v0 = vld [vmem:[%s5672_s14 + $0x2b8] sm:$0xff] }
 0x193   : > { %1540 = vmatprep.mubr.f32.mxu1 %v452_v17  ;;  %4338 = vmatpush1.bf16.msra.mxu0 %v4337_v18  ;;  %v2333_v17 = vld [vmem:[%s5672_s14 + $0x1b0] sm:$0xff]  ;;  %v2336_v18 = vld [vmem:[%s5672_s14 + $0x1c8] sm:$0xff]  ;;  %v4499_v8 = vpack.c.bf16 %v2366_v0, %v2362_v63 }
 0x194   : > { %4466 = vmatpush1.bf16.msra.mxu1 %v4465_v19  ;;  %4340 = vmatprep.subr.bf16.mxu0 %v4339_v20  ;;  %v2340_v19 = vld [vmem:[%s5672_s14 + $0x1e8] sm:$0xff]  ;;  %v4485_v25 = vpack.c.bf16 %v2333_v17, %v2329_v15  ;;  %v488_v15 = vld [vmem:[#allocation3 + $0x178] sm:$0xff] }
 0x195   : > { %1111 = vmatmul.mubr.f32.gmra.mrb[4].mxu0 %v451_v28  ;;  %4468 = vmatprep.subr.bf16.mxu1 %v4467_v24  ;;  %v467_v20 = vld [vmem:[#allocation3 + $0xd0] sm:$0xff]  ;;  %v4357_v24 = vpack.c.bf16 %v2331_v14, %v2327_v13  ;;  %v4359_v26 = vpack.c.bf16 %v2340_v19, %v2336_v18  ;;  %v2370_v13 = vld [vmem:[%s5672_s14 + $0x2d8] sm:$0xff]  ;;  %v2367_v19 = vld [vmem:[%s5672_s14 + $0x2c0] sm:$0xff] }
 0x196   : > { %1541 = vmatmul.mubr.f32.gmra.mrb[4].mxu1 %v451_v28  ;;  %1116 = vmatprep.mubr.f32.mxu0 %v456_v31  ;;  %v2339_v28 = vld [vmem:[%s5672_s14 + $0x1e0] sm:$0xff]  ;;  %v2374_v14 = vld [vmem:[%s5672_s14 + $0x2f8] sm:$0xff]  ;;  %v540_v63 = vld [vmem:[#allocation3 + $0x318] sm:$0xf] }
 0x197   : > { %1546 = vmatprep.mubr.f32.mxu1 %v456_v31  ;;  %4342 = vmatpush1.bf16.msra.mxu0 %v4341_v32  ;;  %v2341_v31 = vld [vmem:[%s5672_s14 + $0x1f0] sm:$0xff]  ;;  %v2344_v32 = vld [vmem:[%s5672_s14 + $0x208] sm:$0xff]  ;;  %v4503_v22 = vpack.c.bf16 %v2374_v14, %v2370_v13 }
 0x198   : > { %4470 = vmatpush1.bf16.msra.mxu1 %v4469_v33  ;;  %4344 = vmatprep.subr.bf16.mxu0 %v4343_v34  ;;  %v2348_v33 = vld [vmem:[%s5672_s14 + $0x228] sm:$0xff]  ;;  %v4489_v39 = vpack.c.bf16 %v2341_v31, %v2337_v29  ;;  %v492_v29 = vld [vmem:[#allocation3 + $0x198] sm:$0xff] }
 0x199   : > { %1117 = vmatmul.mubr.f32.gmra.mrb[6].mxu0 %v455_v42  ;;  %4472 = vmatprep.subr.bf16.mxu1 %v4471_v38  ;;  %v471_v34 = vld [vmem:[#allocation3 + $0xf0] sm:$0xff]  ;;  %v4361_v38 = vpack.c.bf16 %v2339_v28, %v2335_v27  ;;  %v4363_v40 = vpack.c.bf16 %v2348_v33, %v2344_v32  ;;  %v2378_v27 = vld [vmem:[%s5672_s14 + $0x318] sm:$0xff]  ;;  %v2375_v33 = vld [vmem:[%s5672_s14 + $0x300] sm:$0xff] }
 0x19a   : > { %1547 = vmatmul.mubr.f32.gmra.mrb[6].mxu1 %v455_v42  ;;  %1122 = vmatprep.mubr.f32.mxu0 %v460_v45  ;;  %v2347_v42 = vld [vmem:[%s5672_s14 + $0x220] sm:$0xff]  ;;  %v2382_v28 = vld [vmem:[%s5672_s14 + $0x338] sm:$0xff]  ;;  %v2384_v0 = vld [vmem:[%s5672_s14 + $0x348] sm:$0xff] }
 0x19b   : > { %1552 = vmatprep.mubr.f32.mxu1 %v460_v45  ;;  %4346 = vmatpush1.bf16.msra.mxu0 %v4345_v46  ;;  %v2349_v45 = vld [vmem:[%s5672_s14 + $0x230] sm:$0xff]  ;;  %v2352_v46 = vld [vmem:[%s5672_s14 + $0x248] sm:$0xff]  ;;  %v4507_v35 = vpack.c.bf16 %v2382_v28, %v2378_v27  ;;  %v2402_v27 = vld [vmem:[%s5672_s14 + $0x3d8] sm:$0xff] }
 0x19c   : > { %4474 = vmatpush1.bf16.msra.mxu1 %v4473_v47  ;;  %4348 = vmatprep.subr.bf16.mxu0 %v4347_v48  ;;  %v2356_v47 = vld [vmem:[%s5672_s14 + $0x268] sm:$0xff]  ;;  %v4493_v53 = vpack.c.bf16 %v2349_v45, %v2345_v43  ;;  %v500_v43 = vld [vmem:[#allocation3 + $0x1d8] sm:$0xff] }
 0x19d   : > { %1123 = vmatmul.mubr.f32.gmra.mrb[8].mxu0 %v459_v56  ;;  %4476 = vmatprep.subr.bf16.mxu1 %v4475_v52  ;;  %v475_v48 = vld [vmem:[#allocation3 + $0x110] sm:$0xff]  ;;  %v4365_v52 = vpack.c.bf16 %v2347_v42, %v2343_v41  ;;  %v4367_v54 = vpack.c.bf16 %v2356_v47, %v2352_v46  ;;  %v504_v45 = vld [vmem:[#allocation3 + $0x1f8] sm:$0xff] }
 0x19e   : > { %1553 = vmatmul.mubr.f32.gmra.mrb[8].mxu1 %v459_v56  ;;  %1128 = vmatprep.mubr.f32.mxu0 %v464_v59  ;;  %v2355_v56 = vld [vmem:[%s5672_s14 + $0x260] sm:$0xff]  ;;  %v495_v42 = vld [vmem:[#allocation3 + $0x1b0] sm:$0xff]  ;;  %v508_v47 = vld [vmem:[#allocation3 + $0x218] sm:$0xff] }
 0x19f   : > { %1558 = vmatprep.mubr.f32.mxu1 %v464_v59  ;;  %4350 = vmatpush1.bf16.msra.mxu0 %v4349_v60  ;;  %v2357_v59 = vld [vmem:[%s5672_s14 + $0x270] sm:$0xff]  ;;  %v2360_v60 = vld [vmem:[%s5672_s14 + $0x288] sm:$0xff] }
 0x1a0   : > { %4478 = vmatpush1.bf16.msra.mxu1 %v4477_v61  ;;  %4352 = vmatprep.subr.bf16.mxu0 %v4351_v62  ;;  %v2364_v61 = vld [vmem:[%s5672_s14 + $0x2a8] sm:$0xff]  ;;  %v4497_v3 = vpack.c.bf16 %v2357_v59, %v2353_v57  ;;  %v528_v57 = vld [vmem:[#allocation3 + $0x2b8] sm:$0xff] }
 0x1a1   : > { %1129 = vmatmul.mubr.f32.gmra.mrb[10].mxu0 %v463_v6  ;;  %4480 = vmatprep.subr.bf16.mxu1 %v4479_v2  ;;  %v479_v62 = vld [vmem:[#allocation3 + $0x130] sm:$0xff]  ;;  %v4369_v2 = vpack.c.bf16 %v2355_v56, %v2351_v55  ;;  %v4371_v4 = vpack.c.bf16 %v2364_v61, %v2360_v60  ;;  %v524_v55 = vld [vmem:[#allocation3 + $0x298] sm:$0xff] }
 0x1a2   : > { %1559 = vmatmul.mubr.f32.gmra.mrb[10].mxu1 %v463_v6  ;;  %1134 = vmatprep.mubr.f32.mxu0 %v468_v9  ;;  %v2363_v6 = vld [vmem:[%s5672_s14 + $0x2a0] sm:$0xff]  ;;  %v503_v46 = vld [vmem:[#allocation3 + $0x1f0] sm:$0xff]  ;;  %v532_v59 = vld [vmem:[#allocation3 + $0x2d8] sm:$0xff] }
 0x1a3   : > { %1564 = vmatprep.mubr.f32.mxu1 %v468_v9  ;;  %4354 = vmatpush1.bf16.msra.mxu0 %v4353_v10  ;;  %v2365_v9 = vld [vmem:[%s5672_s14 + $0x2b0] sm:$0xff]  ;;  %v2368_v10 = vld [vmem:[%s5672_s14 + $0x2c8] sm:$0xff] }
 0x1a4   : > { %4482 = vmatpush1.bf16.msra.mxu1 %v4481_v11  ;;  %4356 = vmatprep.subr.bf16.mxu0 %v4355_v12  ;;  %v2372_v11 = vld [vmem:[%s5672_s14 + $0x2e8] sm:$0xff]  ;;  %v4501_v17 = vpack.c.bf16 %v2365_v9, %v2361_v7  ;;  %v536_v61 = vld [vmem:[#allocation3 + $0x2f8] sm:$0xff]  ;;  %v2383_v7 = vld [vmem:[%s5672_s14 + $0x340] sm:$0xff] }
 0x1a5   : > { %1135 = vmatmul.mubr.f32.gmra.mrb[12].mxu0 %v467_v20  ;;  %4484 = vmatprep.subr.bf16.mxu1 %v4483_v16  ;;  %v483_v12 = vld [vmem:[#allocation3 + $0x150] sm:$0xff]  ;;  %v4373_v16 = vpack.c.bf16 %v2363_v6, %v2359_v5  ;;  %v4375_v18 = vpack.c.bf16 %v2372_v11, %v2368_v10  ;;  %v2390_v5 = vld [vmem:[%s5672_s14 + $0x378] sm:$0xff]  ;;  %v2385_v9 = vld [vmem:[%s5672_s14 + $0x350] sm:$0xff] }
 0x1a6   : > { %1565 = vmatmul.mubr.f32.gmra.mrb[12].mxu1 %v467_v20  ;;  %1140 = vmatprep.mubr.f32.mxu0 %v472_v23  ;;  %v2371_v20 = vld [vmem:[%s5672_s14 + $0x2e0] sm:$0xff]  ;;  %v523_v56 = vld [vmem:[#allocation3 + $0x290] sm:$0xff]  ;;  %v2389_v11 = vld [vmem:[%s5672_s14 + $0x370] sm:$0xff] }
 0x1a7   : > { %1570 = vmatprep.mubr.f32.mxu1 %v472_v23  ;;  %4358 = vmatpush1.bf16.msra.mxu0 %v4357_v24  ;;  %v2373_v23 = vld [vmem:[%s5672_s14 + $0x2f0] sm:$0xff]  ;;  %v2376_v24 = vld [vmem:[%s5672_s14 + $0x308] sm:$0xff] }
 0x1a8   : > { %4486 = vmatpush1.bf16.msra.mxu1 %v4485_v25  ;;  %4360 = vmatprep.subr.bf16.mxu0 %v4359_v26  ;;  %v2380_v25 = vld [vmem:[%s5672_s14 + $0x328] sm:$0xff]  ;;  %v4505_v31 = vpack.c.bf16 %v2373_v23, %v2369_v21  ;;  %v2397_v23 = vld [vmem:[%s5672_s14 + $0x3b0] sm:$0xff] }
 0x1a9   : > { %1141 = vmatmul.mubr.f32.gmra.mrb[14].mxu0 %v471_v34  ;;  %4488 = vmatprep.subr.bf16.mxu1 %v4487_v30  ;;  %v487_v26 = vld [vmem:[#allocation3 + $0x170] sm:$0xff]  ;;  %v4377_v30 = vpack.c.bf16 %v2371_v20, %v2367_v19  ;;  %v4379_v32 = vpack.c.bf16 %v2380_v25, %v2376_v24  ;;  %v2395_v19 = vld [vmem:[%s5672_s14 + $0x3a0] sm:$0xff] }
 0x1aa   : > { %1571 = vmatmul.mubr.f32.gmra.mrb[14].mxu1 %v471_v34  ;;  %1146 = vmatprep.mubr.f32.mxu0 %v476_v37  ;;  %v2379_v34 = vld [vmem:[%s5672_s14 + $0x320] sm:$0xff]  ;;  %v531_v60 = vld [vmem:[#allocation3 + $0x2d0] sm:$0xff] }
 0x1ab   : > { %1576 = vmatprep.mubr.f32.mxu1 %v476_v37  ;;  %4362 = vmatpush1.bf16.msra.mxu0 %v4361_v38  ;;  %v2381_v37 = vld [vmem:[%s5672_s14 + $0x330] sm:$0xff]  ;;  %v491_v38 = vld [vmem:[#allocation3 + $0x190] sm:$0xff] }
 0x1ac   : > { %4490 = vmatpush1.bf16.msra.mxu1 %v4489_v39  ;;  %4364 = vmatprep.subr.bf16.mxu0 %v4363_v40  ;;  %v496_v39 = vld [vmem:[#allocation3 + $0x1b8] sm:$0xff]  ;;  %v4381_v40 = vpack.c.bf16 %v2379_v34, %v2375_v33  ;;  %v4509_v41 = vpack.c.bf16 %v2381_v37, %v2377_v36  ;;  %v2392_v13 = vld [vmem:[%s5672_s14 + $0x388] sm:$0xff] }
 0x1ad   : > { %1147 = vmatmul.mubr.f32.gmra.mrb[16].mxu0 %v475_v48  ;;  %4492 = vmatprep.subr.bf16.mxu1 %v4491_v44  ;;  %v499_v44 = vld [vmem:[#allocation3 + $0x1d0] sm:$0xff]  ;;  %v2401_v33 = vld [vmem:[%s5672_s14 + $0x3d0] sm:$0xff] }
 0x1ae   : > { %1577 = vmatmul.mubr.f32.gmra.mrb[16].mxu1 %v475_v48  ;;  %1152 = vmatprep.mubr.f32.mxu0 %v480_v51  ;;  %v507_v48 = vld [vmem:[#allocation3 + $0x210] sm:$0xff] }
 0x1af   : > { %1582 = vmatprep.mubr.f32.mxu1 %v480_v51  ;;  %4366 = vmatpush1.bf16.msra.mxu0 %v4365_v52  ;;  %v516_v51 = vld [vmem:[#allocation3 + $0x258] sm:$0xff]  ;;  %v515_v52 = vld [vmem:[#allocation3 + $0x250] sm:$0xff] }
 0x1b0   : > { %4494 = vmatpush1.bf16.msra.mxu1 %v4493_v53  ;;  %4368 = vmatprep.subr.bf16.mxu0 %v4367_v54  ;;  %v520_v53 = vld [vmem:[#allocation3 + $0x278] sm:$0xff]  ;;  %v519_v54 = vld [vmem:[#allocation3 + $0x270] sm:$0xff] }
 0x1b1   : > { %1153 = vmatmul.mubr.f32.gmra.mrb[18].mxu0 %v479_v62  ;;  %4496 = vmatprep.subr.bf16.mxu1 %v4495_v58  ;;  %v527_v58 = vld [vmem:[#allocation3 + $0x2b0] sm:$0xff] }
 0x1b2   : > { %1583 = vmatmul.mubr.f32.gmra.mrb[18].mxu1 %v479_v62  ;;  %1158 = vmatprep.mubr.f32.mxu0 %v484_v1  ;;  %v535_v62 = vld [vmem:[#allocation3 + $0x2f0] sm:$0xff] }
 0x1b3   : > { %1588 = vmatprep.mubr.f32.mxu1 %v484_v1  ;;  %4370 = vmatpush1.bf16.msra.mxu0 %v4369_v2  ;;  %v2388_v1 = vld [vmem:[%s5672_s14 + $0x368] sm:$0xff]  ;;  %v2386_v2 = vld [vmem:[%s5672_s14 + $0x358] sm:$0xff] }
 0x1b4   : > { %4498 = vmatpush1.bf16.msra.mxu1 %v4497_v3  ;;  %4372 = vmatprep.subr.bf16.mxu0 %v4371_v4  ;;  %v539_v3 = vld [vmem:[#allocation3 + $0x310] sm:$0xf]  ;;  %v4383_v4 = vpack.c.bf16 %v2388_v1, %v2384_v0  ;;  %v4511_v6 = vpack.c.bf16 %v2390_v5, %v2386_v2 }
 0x1b5   : > { %1159 = vmatmul.mubr.f32.gmra.mrb[20].mxu0 %v483_v12  ;;  %4500 = vmatprep.subr.bf16.mxu1 %v4499_v8  ;;  %v2387_v8 = vld [vmem:[%s5672_s14 + $0x360] sm:$0xff]  ;;  %v2396_v14 = vld [vmem:[%s5672_s14 + $0x3a8] sm:$0xff] }
 0x1b6   : > { %1589 = vmatmul.mubr.f32.gmra.mrb[20].mxu1 %v483_v12  ;;  %1164 = vmatprep.mubr.f32.mxu0 %v488_v15  ;;  %v4385_v10 = vpack.c.bf16 %v2387_v8, %v2383_v7  ;;  %v4513_v12 = vpack.c.bf16 %v2389_v11, %v2385_v9  ;;  %v2400_v25 = vld [vmem:[%s5672_s14 + $0x3c8] sm:$0xff] }
 0x1b7   : > { %1594 = vmatprep.mubr.f32.mxu1 %v488_v15  ;;  %4374 = vmatpush1.bf16.msra.mxu0 %v4373_v16  ;;  %v2394_v15 = vld [vmem:[%s5672_s14 + $0x398] sm:$0xff]  ;;  %v4387_v16 = vpack.c.bf16 %v2396_v14, %v2392_v13  ;;  %v2408_v37 = vld [vmem:[%s5672_s14 + $0x408] sm:$0xff] }
 0x1b8   : > { %4502 = vmatpush1.bf16.msra.mxu1 %v4501_v17  ;;  %4376 = vmatprep.subr.bf16.mxu0 %v4375_v18  ;;  %v2398_v17 = vld [vmem:[%s5672_s14 + $0x3b8] sm:$0xff]  ;;  %v2391_v18 = vld [vmem:[%s5672_s14 + $0x380] sm:$0xff] }
 0x1b9   : > { %1165 = vmatmul.mubr.f32.gmra.mrb[22].mxu0 %v487_v26  ;;  %4504 = vmatprep.subr.bf16.mxu1 %v4503_v22  ;;  %v4515_v20 = vpack.c.bf16 %v2398_v17, %v2394_v15  ;;  %v4389_v21 = vpack.c.bf16 %v2395_v19, %v2391_v18  ;;  %v2393_v22 = vld [vmem:[%s5672_s14 + $0x390] sm:$0xff] }
 0x1ba   : > { %1595 = vmatmul.mubr.f32.gmra.mrb[22].mxu1 %v487_v26  ;;  %1170 = vmatprep.mubr.f32.mxu0 %v492_v29  ;;  %v4517_v24 = vpack.c.bf16 %v2397_v23, %v2393_v22  ;;  %v2404_v26 = vld [vmem:[%s5672_s14 + $0x3e8] sm:$0xff] }
 0x1bb   : > { %1600 = vmatprep.mubr.f32.mxu1 %v492_v29  ;;  %4378 = vmatpush1.bf16.msra.mxu0 %v4377_v30  ;;  %v4391_v28 = vpack.c.bf16 %v2404_v26, %v2400_v25  ;;  %v2406_v29 = vld [vmem:[%s5672_s14 + $0x3f8] sm:$0xff]  ;;  %v2407_v26 = vld [vmem:[%s5672_s14 + $0x400] sm:$0xff] }
 0x1bc   : > { %4506 = vmatpush1.bf16.msra.mxu1 %v4505_v31  ;;  %4380 = vmatprep.subr.bf16.mxu0 %v4379_v32  ;;  %v4519_v30 = vpack.c.bf16 %v2406_v29, %v2402_v27  ;;  %v2399_v31 = vld [vmem:[%s5672_s14 + $0x3c0] sm:$0xff] }
 0x1bd   : > { %1171 = vmatmul.mubr.f32.gmra.mrb[24].mxu0 %v491_v38  ;;  %4508 = vmatprep.subr.bf16.mxu1 %v4507_v35  ;;  %v2403_v32 = vld [vmem:[%s5672_s14 + $0x3e0] sm:$0xff]  ;;  %v2405_v35 = vld [vmem:[%s5672_s14 + $0x3f0] sm:$0xff] }
 0x1be   : > { %1601 = vmatmul.mubr.f32.gmra.mrb[24].mxu1 %v491_v38  ;;  %1176 = vmatprep.mubr.f32.mxu0 %v496_v39  ;;  %v4393_v34 = vpack.c.bf16 %v2403_v32, %v2399_v31  ;;  %v4521_v36 = vpack.c.bf16 %v2405_v35, %v2401_v33  ;;  %v2412_v38 = vld [vmem:[%s5672_s14 + $0x428] sm:$0xff]  ;;  %v2411_v27 = vld [vmem:[%s5672_s14 + $0x420] sm:$0xff]  ;;  %v2413_v33 = vld [vmem:[%s5672_s14 + $0x430] sm:$0xff] }
 0x1bf   : > { %1606 = vmatprep.mubr.f32.mxu1 %v496_v39  ;;  %4382 = vmatpush1.bf16.msra.mxu0 %v4381_v40  ;;  %v2410_v39 = vld [vmem:[%s5672_s14 + $0x418] sm:$0xff]  ;;  %v4395_v40 = vpack.c.bf16 %v2412_v38, %v2408_v37 }
 0x1c0   : > { %4510 = vmatpush1.bf16.msra.mxu1 %v4509_v41  ;;  %4384 = vmatprep.subr.bf16.mxu0 %v4383_v4  ;;  %v2414_v41 = vld [vmem:[%s5672_s14 + $0x438] sm:$0xff] }
 0x1c1   : > { %1177 = vmatmul.mubr.f32.gmra.mrb[26].mxu0 %v495_v42  ;;  %4512 = vmatprep.subr.bf16.mxu1 %v4511_v6 }
 0x1c2   : > { %1607 = vmatmul.mubr.f32.gmra.mrb[26].mxu1 %v495_v42  ;;  %1182 = vmatprep.mubr.f32.mxu0 %v500_v43  ;;  %v4523_v42 = vpack.c.bf16 %v2414_v41, %v2410_v39  ;;  %v2420_v41 = vld [vmem:[%s5672_s14 + $0x468] sm:$0xff] }
 0x1c3   : > { %1612 = vmatprep.mubr.f32.mxu1 %v500_v43  ;;  %4386 = vmatpush1.bf16.msra.mxu0 %v4385_v10  ;;  %v799_v43 = vlaneseq }
 0x1c4   : > { %4514 = vmatpush1.bf16.msra.mxu1 %v4513_v12  ;;  %4388 = vmatprep.subr.bf16.mxu0 %v4387_v16 }
 0x1c5   : > { %1183 = vmatmul.mubr.f32.gmra.mrb[28].mxu0 %v499_v44  ;;  %4516 = vmatprep.subr.bf16.mxu1 %v4515_v20 }
 0x1c6   : > { %1613 = vmatmul.mubr.f32.gmra.mrb[28].mxu1 %v499_v44  ;;  %1188 = vmatprep.mubr.f32.mxu0 %v504_v45  ;;  %v6172_v44 = vshrl.u32 %v799_v43, 7  ;;  %v2418_v43 = vld [vmem:[%s5672_s14 + $0x458] sm:$0xff] }
 0x1c7   : > { %1618 = vmatprep.mubr.f32.mxu1 %v504_v45  ;;  %4390 = vmatpush1.bf16.msra.mxu0 %v4389_v21 }
 0x1c8   : > { %4518 = vmatpush1.bf16.msra.mxu1 %v4517_v24  ;;  %4392 = vmatprep.subr.bf16.mxu0 %v4391_v28  ;;  %7378 = vst [vmem:[#allocation20_spill] sm:$0xff] %v6172_v44  ;;  %v7346_v45 = vsub.s32 1, %v6172_v44  ;;  %v2409_v28 = vld [vmem:[%s5672_s14 + $0x410] sm:$0xff] }
 0x1c9   : > { %1189 = vmatmul.mubr.f32.gmra.mrb[30].mxu0 %v503_v46  ;;  %4520 = vmatprep.subr.bf16.mxu1 %v4519_v30 }
 0x1ca   : > { %1619 = vmatmul.mubr.f32.gmra.mrb[30].mxu1 %v503_v46  ;;  %1194 = vmatprep.mubr.f32.mxu0 %v508_v47  ;;  %v797_v46 = vld [vmem:[%s289_s24] sm:$0xf] }
 0x1cb   : > { %1624 = vmatprep.mubr.f32.mxu1 %v508_v47  ;;  %4394 = vmatpush1.bf16.msra.mxu0 %v4393_v34  ;;  %v7347_v47 = vsub.s32 0, %v6172_v44 }
 0x1cc   : > { %4522 = vmatpush1.bf16.msra.mxu1 %v4521_v36  ;;  %4396 = vmatprep.subr.bf16.mxu0 %v4395_v40  ;;  %v2416_v40 = vld [vmem:[%s5672_s14 + $0x448] sm:$0xff] }
 0x1cd   : > { %1195 = vmatmul.mubr.f32.gmra.mrb[32].mxu0 %v507_v48  ;;  %4524 = vmatprep.subr.bf16.mxu1 %v4523_v42 }
 0x1ce   : > { %1625 = vmatmul.mubr.f32.gmra.mrb[32].mxu1 %v507_v48  ;;  %1200 = vmatprep.mubr.f32.mxu0 %v512_v49 }
 0x1cf   : > { %1630 = vmatprep.mubr.f32.mxu1 %v512_v49  ;;  %v6180_v49 = vrot.slane %v797_v46, %v7346_v45  ;;  %v6325_v45 = vld [vmem:[%s5672_s14 + $0x4c0] sm:$0xff] }
 0x1d1   : > { %1201 = vmatmul.mubr.f32.gmra.mrb[34].mxu0 %v511_v50 }
 0x1d2   : > { %1631 = vmatmul.mubr.f32.gmra.mrb[34].mxu1 %v511_v50  ;;  %1206 = vmatprep.mubr.f32.mxu0 %v516_v51  ;;  %v6184_v50 = vrot.slane %v797_v46, %v7347_v47  ;;  %v2422_v46 = vld [vmem:[%s5672_s14 + $0x478] sm:$0xff] }
 0x1d3   : > { %1636 = vmatprep.mubr.f32.mxu1 %v516_v51 }
 0x1d5   : > { %1207 = vmatmul.mubr.f32.gmra.mrb[36].mxu0 %v515_v52 }
 0x1d6   : > { %1637 = vmatmul.mubr.f32.gmra.mrb[36].mxu1 %v515_v52  ;;  %1212 = vmatprep.mubr.f32.mxu0 %v520_v53 }
 0x1d7   : > { %1642 = vmatprep.mubr.f32.mxu1 %v520_v53 }
 0x1d9   : > { %1213 = vmatmul.mubr.f32.gmra.mrb[38].mxu0 %v519_v54 }
 0x1da   : > { %1643 = vmatmul.mubr.f32.gmra.mrb[38].mxu1 %v519_v54  ;;  %1218 = vmatprep.mubr.f32.mxu0 %v524_v55 }
 0x1db   : > { %1648 = vmatprep.mubr.f32.mxu1 %v524_v55 }
 0x1dd   : > { %1219 = vmatmul.mubr.f32.gmra.mrb[40].mxu0 %v523_v56 }
 0x1de   : > { %1649 = vmatmul.mubr.f32.gmra.mrb[40].mxu1 %v523_v56  ;;  %1224 = vmatprep.mubr.f32.mxu0 %v528_v57 }
 0x1df   : > { %1654 = vmatprep.mubr.f32.mxu1 %v528_v57 }
 0x1e1   : > { %1225 = vmatmul.mubr.f32.gmra.mrb[42].mxu0 %v527_v58 }
 0x1e2   : > { %1655 = vmatmul.mubr.f32.gmra.mrb[42].mxu1 %v527_v58  ;;  %1230 = vmatprep.mubr.f32.mxu0 %v532_v59 }
 0x1e3   : > { %1660 = vmatprep.mubr.f32.mxu1 %v532_v59 }
 0x1e5   : > { %1231 = vmatmul.mubr.f32.gmra.mrb[44].mxu0 %v531_v60 }
 0x1e6   : > { %1661 = vmatmul.mubr.f32.gmra.mrb[44].mxu1 %v531_v60  ;;  %1236 = vmatprep.mubr.f32.mxu0 %v536_v61 }
 0x1e7   : > { %1666 = vmatprep.mubr.f32.mxu1 %v536_v61 }
 0x1e9   : > { %1237 = vmatmul.mubr.f32.gmra.mrb[46].mxu0 %v535_v62 }
 0x1ea   : > { %1667 = vmatmul.mubr.f32.gmra.mrb[46].mxu1 %v535_v62  ;;  %1242 = vmatprep.mubr.f32.mxu0 %v540_v63 }
 0x1eb   : > { %1672 = vmatprep.mubr.f32.mxu1 %v540_v63 }
 0x1ed   : > { %1243 = vmatmul.mubr.f32.gmra.mrb[48].mxu0 %v539_v3 }
 0x1ee   : > { %1673 = vmatmul.mubr.f32.gmra.mrb[48].mxu1 %v539_v3 }
 0x260   : > { %v1100_v48 = vpop.f32.mrb[0].mxu0 }
 0x261   : > { %v6186_v51 = vpop.f32.mrb[0].mxu1  ;;  %v1102_v52 = vpop.f32.mrb[1].mxu0  ;;  %v4587_v55 = vadd.f32 %v1100_v48, %v6184_v50 }
 0x262   : > { %v6188_v53 = vpop.f32.mrb[1].mxu1  ;;  %v4588_v54 = vadd.f32 %v1102_v52, %v6180_v49  ;;  %v4397_v52 = vpack.c.bf16 %v2411_v27, %v2407_v26 }
 0x263   : > { %v1779_v62 = vmul.f32 0.70710677, %v4587_v55  ;;  %v1679_v48 = vmul.f32 0.5, %v4587_v55 }
 0x264   : > { %v1106_v56 = vpop.f32.mrb[2].mxu0  ;;  %v1780_v60 = vmul.f32 0.70710677, %v4588_v54  ;;  %v1680_v42 = vmul.f32 0.5, %v4588_v54  ;;  %v4399_v54 = vpack.c.bf16 %v2420_v41, %v2416_v40 }
 0x265   : > { %v6192_v57 = vpop.f32.mrb[2].mxu1  ;;  %v1108_v58 = vpop.f32.mrb[3].mxu0  ;;  %v6204_v3 = vadd.f32 %v1106_v56, %v6184_v50  ;;  %v4525_v56 = vpack.c.bf16 %v2413_v33, %v2409_v28  ;;  %v6286_v33 = vld [vmem:[%s5672_s14 + $0x498] sm:$0xff] }
 0x266   : > { %v6194_v59 = vpop.f32.mrb[3].mxu1  ;;  %v6199_v1 = vadd.f32 %v1108_v58, %v6180_v49  ;;  %4970 = verf.f32 %v1780_v60 }
 0x267   : > { %4972 = verf.f32 %v1779_v62  ;;  %v1783_v9 = vmul.f32 0.70710677, %v6204_v3 }
 0x268   : > { %v1112_v61 = vpop.f32.mrb[4].mxu0  ;;  %v1784_v8 = vmul.f32 0.70710677, %v6199_v1 }
 0x269   : > { %v6196_v63 = vpop.f32.mrb[4].mxu1  ;;  %v1114_v0 = vpop.f32.mrb[5].mxu0  ;;  %v6216_v12 = vadd.f32 %v1112_v61, %v6184_v50 }
 0x26a   : > { %v6201_v2 = vpop.f32.mrb[5].mxu1  ;;  %v6213_v10 = vadd.f32 %v1114_v0, %v6180_v49  ;;  %4974 = verf.f32 %v1784_v8  ;;  %v2419_v8 = vld [vmem:[%s5672_s14 + $0x460] sm:$0xff] }
 0x26b   : > { %4976 = verf.f32 %v1783_v9  ;;  %v1787_v18 = vmul.f32 0.70710677, %v6216_v12 }
 0x26c   : > { %v1118_v4 = vpop.f32.mrb[6].mxu0  ;;  %v1788_v16 = vmul.f32 0.70710677, %v6213_v10 }
 0x26d   : > { %v6206_v5 = vpop.f32.mrb[6].mxu1  ;;  %v1120_v6 = vpop.f32.mrb[7].mxu0  ;;  %v6232_v23 = vadd.f32 %v1118_v4, %v6184_v50 }
 0x26e   : > { %v6208_v7 = vpop.f32.mrb[7].mxu1  ;;  %v6227_v19 = vadd.f32 %v1120_v6, %v6180_v49  ;;  %4978 = verf.f32 %v1788_v16  ;;  %v2415_v6 = vld [vmem:[%s5672_s14 + $0x440] sm:$0xff]  ;;  %v4527_v16 = vpack.c.bf16 %v2422_v46, %v2418_v43 }
 0x26f   : > { %4980 = verf.f32 %v1787_v18  ;;  %v1791_v37 = vmul.f32 0.70710677, %v6232_v23  ;;  %v2417_v18 = vld [vmem:[%s5672_s14 + $0x450] sm:$0xff]  ;;  %v4401_v28 = vpack.c.bf16 %v2419_v8, %v2415_v6  ;;  %v2423_v43 = vld [vmem:[%s5672_s14 + $0x480] sm:$0xff]  ;;  %v1683_v6 = vmul.f32 0.5, %v6204_v3 }
 0x270   : > { %v1124_v11 = vpop.f32.mrb[8].mxu0  ;;  %v4971_v22 = vpop.eup %4970  ;;  %v1792_v31 = vmul.f32 0.70710677, %v6227_v19  ;;  %v2427_v46 = vld [vmem:[%s5672_s14 + $0x4a0] sm:$0xff] }
 0x271   : > { %v6218_v13 = vpop.f32.mrb[8].mxu1  ;;  %v1126_v14 = vpop.f32.mrb[9].mxu0  ;;  %v1980_v30 = vadd.f32 1.0, %v4971_v22  ;;  %v6252_v38 = vadd.f32 %v1124_v11, %v6184_v50  ;;  %v2421_v22 = vld [vmem:[%s5672_s14 + $0x470] sm:$0xff]  ;;  %v4405_v3 = vpack.c.bf16 %v2427_v46, %v2423_v43 }
 0x272   : > { %v6220_v15 = vpop.f32.mrb[9].mxu1  ;;  %v4973_v25 = vpop.eup %4972  ;;  %v6243_v32 = vadd.f32 %v1126_v14, %v6180_v49  ;;  %4982 = verf.f32 %v1792_v31  ;;  %v6283_v31 = vld [vmem:[%s5672_s14 + $0x4a8] sm:$0xff]  ;;  %v4529_v40 = vpack.c.bf16 %v2421_v22, %v2417_v18  ;;  %v2433_v43 = vld [vmem:[%s5672_s14 + $0x4d0] sm:$0xff] }
 0x273   : > { %v1979_v36 = vadd.f32 1.0, %v4973_v25  ;;  %v2080_v62 = vmul.f32 %v1980_v30, %v1680_v42  ;;  %4984 = verf.f32 %v1791_v37  ;;  %v1795_v11 = vmul.f32 0.70710677, %v6252_v38  ;;  %v6275_v25 = vld [vmem:[%s5672_s14 + $0x488] sm:$0xff] }
 0x274   : > { %v6223_v17 = vpop.f32.mrb[10].mxu0  ;;  %v4975_v60 = vpop.eup %4974  ;;  %v1796_v61 = vmul.f32 0.70710677, %v6243_v32  ;;  %v4403_v8 = vpack.c.bf16 %v6283_v31, %v6275_v25  ;;  %v6328_v25 = vld [vmem:[%s5672_s14 + $0x4e0] sm:$0xff] }
 0x275   : > { %v6229_v20 = vpop.f32.mrb[10].mxu1  ;;  %v1132_v21 = vpop.f32.mrb[11].mxu0  ;;  %v2079_v9 = vmul.f32 %v1979_v36, %v1679_v48  ;;  %2599 = vmatprep.mubr.f32.mxu0 %v2080_v62  ;;  %3029 = vmatprep.mubr.f32.mxu1 %v2080_v62  ;;  %v1984_v26 = vadd.f32 1.0, %v4975_v60  ;;  %v6289_v36 = vld [vmem:[%s5672_s14 + $0x4b8] sm:$0xff]  ;;  %v1684_v60 = vmul.f32 0.5, %v6199_v1 }
 0x276   : > { %v6234_v24 = vpop.f32.mrb[11].mxu1  ;;  %v4977_v55 = vpop.eup %4976  ;;  %v6278_v27 = vadd.f32 %v1132_v21, %v6180_v49  ;;  %4986 = verf.f32 %v1796_v61  ;;  %v6293_v21 = vadd.f32 %v6223_v17, %v6184_v50  ;;  %v6307_v61 = vld [vmem:[%s5672_s14 + $0x4c8] sm:$0xff]  ;;  %v4531_v1 = vpack.c.bf16 %v6289_v36, %v6286_v33 }
 0x277   : > { %2600 = vmatmul.mubr.f32.vlgmr.msra.gmra.mrb[50].mxu0 %v2079_v9  ;;  %3030 = vmatmul.mubr.f32.vlgmr.msra.gmra.mrb[50].mxu1 %v2079_v9  ;;  %v1983_v37 = vadd.f32 1.0, %v4977_v55  ;;  %4988 = verf.f32 %v1795_v11  ;;  %v2436_v55 = vld [vmem:[%s5672_s14 + $0x4e8] sm:$0xff]  ;;  %v2438_v9 = vld [vmem:[%s5672_s14 + $0x4f8] sm:$0xff]  ;;  %v2084_v18 = vmul.f32 %v1984_v26, %v1684_v60 }
 0x278   : > { %v6239_v29 = vpop.f32.mrb[12].mxu0  ;;  %4398 = vmatpush1.bf16.msra.mxu0 %v4397_v52  ;;  %4526 = vmatpush1.bf16.msra.mxu1 %v4525_v56  ;;  %v4979_v48 = vpop.eup %4978  ;;  %v2425_v52 = vld [vmem:[%s5672_s14 + $0x490] sm:$0xff]  ;;  %v1800_v11 = vmul.f32 0.70710677, %v6278_v27  ;;  %v1799_v33 = vmul.f32 0.70710677, %v6293_v21 }
 0x279   : > { %v6246_v34 = vpop.f32.mrb[12].mxu1  ;;  %v6248_v35 = vpop.f32.mrb[13].mxu0  ;;  %4400 = vmatprep.subr.bf16.mxu0 %v4399_v54  ;;  %4528 = vmatprep.subr.bf16.mxu1 %v4527_v16  ;;  %v2429_v56 = vld [vmem:[%s5672_s14 + $0x4b0] sm:$0xff]  ;;  %v2434_v54 = vld [vmem:[%s5672_s14 + $0x4d8] sm:$0xff]  ;;  %v1988_v31 = vadd.f32 1.0, %v4979_v48  ;;  %v2083_v36 = vmul.f32 %v1983_v37, %v1683_v6  ;;  %v6338_v48 = vadd.f32 %v6239_v29, %v6184_v50 }
 0x27a   : > { %v6254_v39 = vpop.f32.mrb[13].mxu1  ;;  %v4981_v62 = vpop.eup %4980  ;;  %v6320_v16 = vadd.f32 %v6248_v35, %v6180_v49  ;;  %v4533_v35 = vpack.c.bf16 %v2429_v56, %v2425_v52  ;;  %2605 = vmatprep.mubr.f32.mxu0 %v2084_v18  ;;  %3035 = vmatprep.mubr.f32.mxu1 %v2084_v18  ;;  %v4535_v37 = vpack.c.bf16 %v2438_v9, %v2434_v54  ;;  %v6345_v52 = vld [vmem:[%s5672_s14 + $0x508] sm:$0xff]  ;;  %v2442_v29 = vld [vmem:[%s5672_s14 + $0x518] sm:$0xff]  ;;  %v1687_v18 = vmul.f32 0.5, %v6216_v12  ;;  %v6356_v54 = vld [vmem:[%s5672_s14 + $0x500] sm:$0xff] }
 0x27b   : > { %v1987_v46 = vadd.f32 1.0, %v4981_v62  ;;  %v2444_v56 = vld [vmem:[%s5672_s14 + $0x528] sm:$0xff]  ;;  %v1688_v62 = vmul.f32 0.5, %v6213_v10  ;;  %2606 = vmatmul.mubr.f32.gmra.mrb[52].mxu0 %v2083_v36  ;;  %3036 = vmatmul.mubr.f32.gmra.mrb[52].mxu1 %v2083_v36  ;;  %4990 = verf.f32 %v1800_v11  ;;  %v6359_v10 = vld [vmem:[%s5672_s14 + $0x520] sm:$0xff] }
 0x27c   : > { %v6260_v58 = vpop.f32.mrb[14].mxu0  ;;  %4402 = vmatpush1.bf16.msra.mxu0 %v4401_v28  ;;  %4530 = vmatpush1.bf16.msra.mxu1 %v4529_v40  ;;  %v4407_v28 = vpack.c.bf16 %v2436_v55, %v6307_v61  ;;  %v2437_v40 = vld [vmem:[%s5672_s14 + $0x4f0] sm:$0xff]  ;;  %v4983_v6 = vpop.eup %4982  ;;  %v1804_v61 = vmul.f32 0.70710677, %v6320_v16  ;;  %v4409_v55 = vpack.c.bf16 %v6328_v25, %v6325_v45  ;;  %4992 = verf.f32 %v1799_v33  ;;  %v6373_v45 = vld [vmem:[%s5672_s14 + $0x548] sm:$0xff] }
 0x27d   : > { %v6263_v0 = vpop.f32.mrb[14].mxu1  ;;  %v6265_v4 = vpop.f32.mrb[15].mxu0  ;;  %4404 = vmatprep.subr.bf16.mxu0 %v4403_v8  ;;  %4532 = vmatprep.subr.bf16.mxu1 %v4531_v1  ;;  %v2088_v9 = vmul.f32 %v1988_v31, %v1688_v62  ;;  %v4537_v36 = vpack.c.bf16 %v2437_v40, %v2433_v43  ;;  %v4411_v8 = vpack.c.bf16 %v2444_v56, %v6345_v52  ;;  %v6367_v1 = vld [vmem:[%s5672_s14 + $0x510] sm:$0xff]  ;;  %v1992_v25 = vadd.f32 1.0, %v4983_v6  ;;  %v6381_v40 = vld [vmem:[%s5672_s14 + $0x568] sm:$0xff]  ;;  %v2450_v6 = vld [vmem:[%s5672_s14 + $0x558] sm:$0xff] }
 0x27e   : > { %7379 = vst [vmem:[#allocation21_spill] sm:$0xff] %v6263_v0  ;;  %v6270_v14 = vpop.f32.mrb[15].mxu1  ;;  %v2087_v31 = vmul.f32 %v1987_v46, %v1687_v18  ;;  %v6385_v62 = vadd.f32 %v6265_v4, %v6180_v49  ;;  %v2454_v46 = vld [vmem:[%s5672_s14 + $0x578] sm:$0xff]  ;;  %4994 = verf.f32 %v1804_v61  ;;  %v1691_v4 = vmul.f32 0.5, %v6232_v23  ;;  %v6552_v0 = vld [vmem:[%s5672_s14 + $0x688] sm:$0xff] }
 0x27f   : > { %2611 = vmatprep.mubr.f32.mxu0 %v2088_v9  ;;  %3041 = vmatprep.mubr.f32.mxu1 %v2088_v9  ;;  %v2453_v9 = vld [vmem:[%s5672_s14 + $0x570] sm:$0xff] }
 0x280   : > { %v6280_v30 = vpop.f32.mrb[16].mxu0  ;;  %4406 = vmatpush1.bf16.msra.mxu0 %v4405_v3  ;;  %4534 = vmatpush1.bf16.msra.mxu1 %v4533_v35  ;;  %v1803_v3 = vmul.f32 0.70710677, %v6338_v48 }
 0x281   : > { %v6295_v41 = vpop.f32.mrb[16].mxu1  ;;  %v6297_v42 = vpop.f32.mrb[17].mxu0  ;;  %4408 = vmatprep.subr.bf16.mxu0 %v4407_v28  ;;  %4536 = vmatprep.subr.bf16.mxu1 %v4535_v37  ;;  %v4413_v28 = vpack.c.bf16 %v6359_v10, %v6356_v54  ;;  %v6404_v37 = vld [vmem:[%s5672_s14 + $0x540] sm:$0xff]  ;;  %v4543_v54 = vpack.c.bf16 %v2454_v46, %v2450_v6  ;;  %v2462_v6 = vld [vmem:[%s5672_s14 + $0x5b8] sm:$0xff] }
 0x282   : > { %7380 = vst [vmem:[#allocation22_spill] sm:$0xff] %v6295_v41  ;;  %v6302_v17 = vpop.f32.mrb[17].mxu1  ;;  %v4985_v41 = vpop.eup %4984  ;;  %2612 = vmatmul.mubr.f32.gmra.mrb[54].mxu0 %v2087_v31  ;;  %3042 = vmatmul.mubr.f32.gmra.mrb[54].mxu1 %v2087_v31  ;;  %4996 = verf.f32 %v1803_v3  ;;  %v6411_v10 = vld [vmem:[%s5672_s14 + $0x560] sm:$0xff]  ;;  %v2460_v3 = vld [vmem:[%s5672_s14 + $0x5a8] sm:$0xff]  ;;  %v1696_v31 = vmul.f32 0.5, %v6243_v32 }
 0x283   : > { %7381 = vst [vmem:[#allocation23_spill] sm:$0xff] %v6302_v17  ;;  %v4987_v52 = vpop.eup %4986  ;;  %v1991_v56 = vadd.f32 1.0, %v4985_v41  ;;  %v4417_v32 = vpack.c.bf16 %v6411_v10, %v6404_v37  ;;  %v2459_v37 = vld [vmem:[%s5672_s14 + $0x5a0] sm:$0xff]  ;;  %v2478_v17 = vld [vmem:[%s5672_s14 + $0x638] sm:$0xff] }
 0x284   : > { %v6322_v22 = vpop.f32.mrb[18].mxu0  ;;  %v4989_v18 = vpop.eup %4988  ;;  %4410 = vmatpush1.bf16.msra.mxu0 %v4409_v55  ;;  %4538 = vmatpush1.bf16.msra.mxu1 %v4537_v36 }
 0x285   : > { %v6331_v47 = vpop.f32.mrb[18].mxu1  ;;  %v6333_v26 = vpop.f32.mrb[19].mxu0  ;;  %4412 = vmatprep.subr.bf16.mxu0 %v4411_v8  ;;  %v1995_v36 = vadd.f32 1.0, %v4989_v18  ;;  %v6425_v8 = vld [vmem:[%s5672_s14 + $0x588] sm:$0xff] }
 0x286   : > { %7382 = vst [vmem:[#allocation24_spill] sm:$0xff] %v6331_v47  ;;  %v6340_v60 = vpop.f32.mrb[19].mxu1  ;;  %v2446_v47 = vld [vmem:[%s5672_s14 + $0x538] sm:$0xff] }
 0x287   : > { %7383 = vst [vmem:[#allocation25_spill] sm:$0xff] %v6340_v60  ;;  %v6370_v60 = vld [vmem:[%s5672_s14 + $0x530] sm:$0xff]  ;;  %v4539_v43 = vpack.c.bf16 %v2446_v47, %v2442_v29  ;;  %v6392_v47 = vadd.f32 %v6260_v58, %v6184_v50  ;;  %v4415_v58 = vpack.c.bf16 %v6381_v40, %v6373_v45  ;;  %v1996_v29 = vadd.f32 1.0, %v4987_v52  ;;  %v2458_v52 = vld [vmem:[%s5672_s14 + $0x598] sm:$0xff] }
 0x288   : > { %v6361_v12 = vpop.f32.mrb[20].mxu0  ;;  %v2091_v45 = vmul.f32 %v1991_v56, %v1691_v4  ;;  %v4991_v4 = vpop.eup %4990  ;;  %4414 = vmatpush1.bf16.msra.mxu0 %v4413_v28  ;;  %v2457_v28 = vld [vmem:[%s5672_s14 + $0x590] sm:$0xff] }
 0x289   : > { %v6363_v11 = vpop.f32.mrb[20].mxu1  ;;  %v6376_v33 = vpop.f32.mrb[21].mxu0  ;;  %4540 = vmatprep.subr.bf16.mxu1 %v4539_v43  ;;  %v1807_v43 = vmul.f32 0.70710677, %v6392_v47  ;;  %4416 = vmatprep.subr.bf16.mxu0 %v4415_v58 }
 0x28a   : > { %7384 = vst [vmem:[#allocation26_spill] sm:$0xff] %v6363_v11  ;;  %v6378_v35 = vpop.f32.mrb[21].mxu1  ;;  %v1692_v11 = vmul.f32 0.5, %v6227_v19  ;;  %v4541_v19 = vpack.c.bf16 %v6370_v60, %v6367_v1  ;;  %v6414_v60 = vld [vmem:[%s5672_s14 + $0x550] sm:$0xff]  ;;  %v1808_v1 = vmul.f32 0.70710677, %v6385_v62  ;;  %v4993_v10 = vpop.eup %4992 }
 0x28b   : > { %7385 = vst [vmem:[#allocation27_spill] sm:$0xff] %v6378_v35  ;;  %v4545_v18 = vpack.c.bf16 %v2453_v9, %v6414_v60 }
 0x28c   : > { %v6394_v41 = vpop.f32.mrb[22].mxu0  ;;  %v2092_v23 = vmul.f32 %v1992_v25, %v1692_v11  ;;  %v6420_v11 = vadd.f32 %v6297_v42, %v6180_v49  ;;  %v1695_v42 = vmul.f32 0.5, %v6252_v38  ;;  %4542 = vmatpush1.bf16.msra.mxu1 %v4541_v19  ;;  %4998 = verf.f32 %v1808_v1  ;;  %v2461_v19 = vld [vmem:[%s5672_s14 + $0x5b0] sm:$0xff]  ;;  %v6463_v1 = vld [vmem:[%s5672_s14 + $0x5d8] sm:$0xff]  ;;  %4418 = vmatpush1.bf16.msra.mxu0 %v4417_v32 }
 0x28d   : > { %v6406_v61 = vpop.f32.mrb[22].mxu1  ;;  %v6408_v55 = vpop.f32.mrb[23].mxu0  ;;  %4544 = vmatprep.subr.bf16.mxu1 %v4543_v54  ;;  %5000 = verf.f32 %v1807_v43  ;;  %v2470_v43 = vld [vmem:[%s5672_s14 + $0x5f8] sm:$0xff] }
 0x28e   : > { %7386 = vst [vmem:[#allocation28_spill] sm:$0xff] %v6406_v61  ;;  %v6422_v25 = vpop.f32.mrb[23].mxu1  ;;  %2617 = vmatprep.mubr.f32.mxu0 %v2092_v23  ;;  %3047 = vmatprep.mubr.f32.mxu1 %v2092_v23  ;;  %v6444_v23 = vadd.f32 %v6280_v30, %v6184_v50  ;;  %v2096_v61 = vmul.f32 %v1996_v29, %v1696_v31  ;;  %v1812_v60 = vmul.f32 0.70710677, %v6420_v11 }
 0x28f   : > { %7387 = vst [vmem:[#allocation29_spill] sm:$0xff] %v6422_v25  ;;  %2618 = vmatmul.mubr.f32.gmra.mrb[56].mxu0 %v2091_v45  ;;  %3048 = vmatmul.mubr.f32.gmra.mrb[56].mxu1 %v2091_v45  ;;  %v4419_v45 = vpack.c.bf16 %v2460_v3, %v6425_v8  ;;  %v2095_v9 = vmul.f32 %v1995_v36, %v1695_v42  ;;  %v6457_v8 = vld [vmem:[%s5672_s14 + $0x5c8] sm:$0xff]  ;;  %v2000_v36 = vadd.f32 1.0, %v4991_v4  ;;  %v1999_v42 = vadd.f32 1.0, %v4993_v10 }
 0x290   : > { %v6430_v40 = vpop.f32.mrb[24].mxu0  ;;  %v4547_v30 = vpack.c.bf16 %v2462_v6, %v2458_v52  ;;  %2623 = vmatprep.mubr.f32.mxu0 %v2096_v61  ;;  %3053 = vmatprep.mubr.f32.mxu1 %v2096_v61  ;;  %v6460_v3 = vld [vmem:[%s5672_s14 + $0x5e8] sm:$0xff]  ;;  %v6471_v61 = vld [vmem:[%s5672_s14 + $0x5c0] sm:$0xff]  ;;  %v4995_v6 = vpop.eup %4994  ;;  %v6479_v4 = vadd.f32 %v6333_v26, %v6180_v49  ;;  %v1700_v25 = vmul.f32 0.5, %v6278_v27  ;;  %5002 = verf.f32 %v1812_v60 }
 0x291   : > { %v6435_v56 = vpop.f32.mrb[24].mxu1  ;;  %v6437_v46 = vpop.f32.mrb[25].mxu0  ;;  %v6474_v52 = vld [vmem:[%s5672_s14 + $0x5e0] sm:$0xff]  ;;  %4546 = vmatpush1.bf16.msra.mxu1 %v4545_v18  ;;  %v6488_v10 = vadd.f32 %v6322_v22, %v6184_v50  ;;  %4420 = vmatprep.subr.bf16.mxu0 %v4419_v45  ;;  %v4423_v32 = vpack.c.bf16 %v6460_v3, %v6457_v8  ;;  %v4551_v18 = vpack.c.bf16 %v2470_v43, %v6463_v1  ;;  %v2004_v27 = vadd.f32 1.0, %v4995_v6 }
 0x292   : > { %7388 = vst [vmem:[#allocation30_spill] sm:$0xff] %v6435_v56  ;;  %v6446_v38 = vpop.f32.mrb[25].mxu1  ;;  %v2455_v56 = vld [vmem:[%s5672_s14 + $0x580] sm:$0xff]  ;;  %4548 = vmatprep.subr.bf16.mxu1 %v4547_v30  ;;  %v4997_v26 = vpop.eup %4996  ;;  %v4425_v22 = vpack.c.bf16 %v6474_v52, %v6471_v61  ;;  %v2476_v30 = vld [vmem:[%s5672_s14 + $0x628] sm:$0xff]  ;;  %v1816_v8 = vmul.f32 0.70710677, %v6479_v4  ;;  %v6507_v3 = vadd.f32 %v6376_v33, %v6180_v49 }
 0x293   : > { %7389 = vst [vmem:[#allocation31_spill] sm:$0xff] %v6446_v38  ;;  %2624 = vmatmul.mubr.f32.gmra.mrb[58].mxu0 %v2095_v9  ;;  %3054 = vmatmul.mubr.f32.gmra.mrb[58].mxu1 %v2095_v9  ;;  %v4421_v31 = vpack.c.bf16 %v2459_v37, %v2455_v56  ;;  %v1811_v38 = vmul.f32 0.70710677, %v6444_v23  ;;  %v2465_v56 = vld [vmem:[%s5672_s14 + $0x5d0] sm:$0xff]  ;;  %v1704_v43 = vmul.f32 0.5, %v6320_v16  ;;  %v2471_v61 = vld [vmem:[%s5672_s14 + $0x600] sm:$0xff] }
 0x294   : > { %v6454_v29 = vpop.f32.mrb[26].mxu0  ;;  %v2469_v37 = vld [vmem:[%s5672_s14 + $0x5f0] sm:$0xff]  ;;  %v2475_v52 = vld [vmem:[%s5672_s14 + $0x620] sm:$0xff]  ;;  %v2003_v33 = vadd.f32 1.0, %v4997_v26 }
 0x295   : > { %v6465_v58 = vpop.f32.mrb[26].mxu1  ;;  %v6467_v54 = vpop.f32.mrb[27].mxu0  ;;  %v4553_v45 = vpack.c.bf16 %v2469_v37, %v2465_v56  ;;  %5004 = verf.f32 %v1811_v38  ;;  %4422 = vmatpush1.bf16.msra.mxu0 %v4421_v31  ;;  %v1815_v38 = vmul.f32 0.70710677, %v6488_v10  ;;  %v2480_v56 = vld [vmem:[%s5672_s14 + $0x648] sm:$0xff]  ;;  %v6524_v37 = vadd.f32 %v6361_v12, %v6184_v50 }
 0x296   : > { %7390 = vst [vmem:[#allocation32_spill] sm:$0xff] %v6465_v58  ;;  %v6481_v9 = vpop.f32.mrb[27].mxu1  ;;  %v4549_v58 = vpack.c.bf16 %v2461_v19, %v2457_v28  ;;  %v2472_v28 = vld [vmem:[%s5672_s14 + $0x608] sm:$0xff]  ;;  %v2100_v19 = vmul.f32 %v2000_v36, %v1700_v25  ;;  %v4999_v16 = vpop.eup %4998  ;;  %4424 = vmatprep.subr.bf16.mxu0 %v4423_v32  ;;  %5006 = verf.f32 %v1816_v8  ;;  %v1820_v12 = vmul.f32 0.70710677, %v6507_v3  ;;  %v6547_v8 = vld [vmem:[%s5672_s14 + $0x670] sm:$0xff] }
 0x297   : > { %7391 = vst [vmem:[#allocation33_spill] sm:$0xff] %v6481_v9  ;;  %v1699_v9 = vmul.f32 0.5, %v6293_v21  ;;  %v2474_v21 = vld [vmem:[%s5672_s14 + $0x618] sm:$0xff]  ;;  %5008 = verf.f32 %v1815_v38  ;;  %v4429_v32 = vpack.c.bf16 %v2475_v52, %v2471_v61 }
 0x298   : > { %v6495_v60 = vpop.f32.mrb[28].mxu0  ;;  %4550 = vmatpush1.bf16.msra.mxu1 %v4549_v58  ;;  %2629 = vmatprep.mubr.f32.mxu0 %v2100_v19  ;;  %v4555_v31 = vpack.c.bf16 %v2478_v17, %v2474_v21  ;;  %v2477_v58 = vld [vmem:[%s5672_s14 + $0x630] sm:$0xff]  ;;  %v2486_v17 = vld [vmem:[%s5672_s14 + $0x678] sm:$0xff]  ;;  %v1703_v21 = vmul.f32 0.5, %v6338_v48  ;;  %5010 = verf.f32 %v1820_v12 }
 0x299   : > { %v6497_v35 = vpop.f32.mrb[28].mxu1  ;;  %v2099_v25 = vmul.f32 %v1999_v42, %v1699_v9  ;;  %v6509_v1 = vpop.f32.mrb[29].mxu0  ;;  %3059 = vmatprep.mubr.f32.mxu1 %v2100_v19  ;;  %v4427_v42 = vpack.c.bf16 %v2476_v30, %v2472_v28  ;;  %v2473_v9 = vld [vmem:[%s5672_s14 + $0x610] sm:$0xff]  ;;  %v2104_v19 = vmul.f32 %v2004_v27, %v1704_v43  ;;  %4552 = vmatprep.subr.bf16.mxu1 %v4551_v18  ;;  %v2482_v28 = vld [vmem:[%s5672_s14 + $0x658] sm:$0xff]  ;;  %v6538_v27 = vld [vmem:[%s5672_s14 + $0x640] sm:$0xff] }
 0x29a   : > { %7392 = vst [vmem:[#allocation34_spill] sm:$0xff] %v6497_v35  ;;  %v6511_v36 = vpop.f32.mrb[29].mxu1  ;;  %v5001_v30 = vpop.eup %5000  ;;  %4426 = vmatpush1.bf16.msra.mxu0 %v4425_v22  ;;  %v4557_v18 = vpack.c.bf16 %v2477_v58, %v2473_v9  ;;  %v6541_v43 = vld [vmem:[%s5672_s14 + $0x660] sm:$0xff]  ;;  %v6544_v48 = vld [vmem:[%s5672_s14 + $0x650] sm:$0xff]  ;;  %v2103_v22 = vmul.f32 %v2003_v33, %v1703_v21  ;;  %v6558_v61 = vld [vmem:[%s5672_s14 + $0x698] sm:$0xff] }
 0x29b   : > { %7393 = vst [vmem:[#allocation35_spill] sm:$0xff] %v6511_v36  ;;  %2630 = vmatmul.mubr.f32.gmra.mrb[60].mxu0 %v2099_v25  ;;  %3060 = vmatmul.mubr.f32.gmra.mrb[60].mxu1 %v2099_v25  ;;  %v2484_v25 = vld [vmem:[%s5672_s14 + $0x668] sm:$0xff]  ;;  %v5003_v52 = vpop.eup %5002  ;;  %v2007_v9 = vadd.f32 1.0, %v5001_v30  ;;  %v1819_v58 = vmul.f32 0.70710677, %v6524_v37 }
 0x29c   : > { %v6517_v6 = vpop.f32.mrb[30].mxu0  ;;  %4554 = vmatpush1.bf16.msra.mxu1 %v4553_v45  ;;  %2635 = vmatprep.mubr.f32.mxu0 %v2104_v19  ;;  %v4431_v38 = vpack.c.bf16 %v2484_v25, %v2480_v56  ;;  %v1708_v56 = vmul.f32 0.5, %v6385_v62  ;;  %v6573_v25 = vadd.f32 %v6394_v41, %v6184_v50  ;;  %v4561_v62 = vpack.c.bf16 %v6547_v8, %v6544_v48 }
 0x29d   : > { %v6526_v26 = vpop.f32.mrb[30].mxu1  ;;  %v6528_v35 = vpop.f32.mrb[31].mxu0  ;;  %3065 = vmatprep.mubr.f32.mxu1 %v2104_v19  ;;  %4428 = vmatprep.subr.bf16.mxu0 %v4427_v42  ;;  %v6555_v19 = vld [vmem:[%s5672_s14 + $0x6a8] sm:$0xff]  ;;  %v2012_v41 = vadd.f32 1.0, %v5003_v52  ;;  %5012 = verf.f32 %v1819_v58  ;;  %v6592_v48 = vadd.f32 %v6437_v46, %v6180_v49 }
 0x29e   : > { %7394 = vst [vmem:[#allocation36_spill] sm:$0xff] %v6526_v26  ;;  %v6535_v36 = vpop.f32.mrb[31].mxu1  ;;  %v2008_v26 = vadd.f32 1.0, %v4999_v16  ;;  %4556 = vmatprep.subr.bf16.mxu1 %v4555_v31  ;;  %v6563_v16 = vadd.f32 %v6408_v55, %v6180_v49  ;;  %v2494_v31 = vld [vmem:[%s5672_s14 + $0x6b8] sm:$0xff]  ;;  %v1707_v55 = vmul.f32 0.5, %v6392_v47  ;;  %4430 = vmatpush1.bf16.msra.mxu0 %v4429_v32  ;;  %v4435_v47 = vpack.c.bf16 %v6555_v19, %v6552_v0  ;;  %v2489_v0 = vld [vmem:[%s5672_s14 + $0x690] sm:$0xff] }
 0x29f   : > { %7395 = vst [vmem:[#allocation37_spill] sm:$0xff] %v6535_v36  ;;  %v4559_v36 = vpack.c.bf16 %v2486_v17, %v2482_v28  ;;  %2636 = vmatmul.mubr.f32.gmra.mrb[62].mxu0 %v2103_v22  ;;  %3066 = vmatmul.mubr.f32.gmra.mrb[62].mxu1 %v2103_v22  ;;  %v4433_v17 = vpack.c.bf16 %v6541_v43, %v6538_v27  ;;  %v5005_v30 = vpop.eup %5004  ;;  %v2491_v27 = vld [vmem:[%s5672_s14 + $0x6a0] sm:$0xff]  ;;  %v2493_v22 = vld [vmem:[%s5672_s14 + $0x6b0] sm:$0xff]  ;;  %v1823_v19 = vmul.f32 0.70710677, %v6573_v25  ;;  %v2496_v46 = vld [vmem:[%s5672_s14 + $0x6c8] sm:$0xff] }
 0x2a0   : > { %v6549_v45 = vpop.f32.mrb[32].mxu0  ;;  %4558 = vmatpush1.bf16.msra.mxu1 %v4557_v18  ;;  %v2108_v21 = vmul.f32 %v2008_v26, %v1708_v56  ;;  %4432 = vmatprep.subr.bf16.mxu0 %v4431_v38  ;;  %v4563_v32 = vpack.c.bf16 %v2494_v31, %v6558_v61  ;;  %v2487_v18 = vld [vmem:[%s5672_s14 + $0x680] sm:$0xff]  ;;  %v1824_v43 = vmul.f32 0.70710677, %v6563_v16  ;;  %v2107_v26 = vmul.f32 %v2007_v9, %v1707_v55  ;;  %v2500_v58 = vld [vmem:[%s5672_s14 + $0x6e8] sm:$0xff]  ;;  %v2498_v31 = vld [vmem:[%s5672_s14 + $0x6d8] sm:$0xff]  ;;  %v5007_v55 = vpop.eup %5006 }
 0x2a1   : > { %v6565_v33 = vpop.f32.mrb[32].mxu1  ;;  %v6567_v42 = vpop.f32.mrb[33].mxu0  ;;  %4560 = vmatprep.subr.bf16.mxu1 %v4559_v36  ;;  %v1712_v38 = vmul.f32 0.5, %v6420_v11  ;;  %v2011_v52 = vadd.f32 1.0, %v5005_v30  ;;  %v4437_v9 = vpack.c.bf16 %v2491_v27, %v2487_v18  ;;  %v2502_v56 = vld [vmem:[%s5672_s14 + $0x6f8] sm:$0xff]  ;;  %v1711_v30 = vmul.f32 0.5, %v6444_v23 }
 0x2a2   : > { %7396 = vst [vmem:[#allocation38_spill] sm:$0xff] %v6565_v33  ;;  %v6575_v28 = vpop.f32.mrb[33].mxu1  ;;  %2641 = vmatprep.mubr.f32.mxu0 %v2108_v21  ;;  %3071 = vmatprep.mubr.f32.mxu1 %v2108_v21  ;;  %v4565_v21 = vpack.c.bf16 %v2493_v22, %v2489_v0  ;;  %5014 = verf.f32 %v1824_v43  ;;  %v1828_v18 = vmul.f32 0.70710677, %v6592_v48 }
 0x2a3   : > { %2642 = vmatmul.mubr.f32.gmra.mrb[64].mxu0 %v2107_v26  ;;  %3072 = vmatmul.mubr.f32.gmra.mrb[64].mxu1 %v2107_v26  ;;  %v2112_v11 = vmul.f32 %v2012_v41, %v1712_v38  ;;  %5016 = verf.f32 %v1823_v19  ;;  %v4567_v41 = vpack.c.bf16 %v2502_v56, %v2498_v31  ;;  %v6625_v38 = vadd.f32 %v6467_v54, %v6180_v49 }
 0x2a4   : > { %v6582_v12 = vpop.f32.mrb[34].mxu0  ;;  %4434 = vmatpush1.bf16.msra.mxu0 %v4433_v17  ;;  %4562 = vmatpush1.bf16.msra.mxu1 %v4561_v62  ;;  %v2016_v17 = vadd.f32 1.0, %v5007_v55  ;;  %v2111_v62 = vmul.f32 %v2011_v52, %v1711_v30  ;;  %5018 = verf.f32 %v1828_v18  ;;  %v1715_v54 = vmul.f32 0.5, %v6488_v10 }
 0x2a5   : > { %v6594_v8 = vpop.f32.mrb[34].mxu1  ;;  %v6596_v36 = vpop.f32.mrb[35].mxu0  ;;  %4436 = vmatprep.subr.bf16.mxu0 %v4435_v47  ;;  %4564 = vmatprep.subr.bf16.mxu1 %v4563_v32  ;;  %v1716_v47 = vmul.f32 0.5, %v6479_v4  ;;  %v6632_v32 = vadd.f32 %v6454_v29, %v6184_v50  ;;  %v1832_v4 = vmul.f32 0.70710677, %v6625_v38  ;;  %v6644_v29 = vadd.f32 %v6509_v1, %v6180_v49 }
 0x2a6   : > { %7397 = vst [vmem:[#allocation39_spill] sm:$0xff] %v6594_v8  ;;  %v6602_v61 = vpop.f32.mrb[35].mxu1  ;;  %v6610_v8 = vadd.f32 %v6430_v40, %v6184_v50  ;;  %2647 = vmatprep.mubr.f32.mxu0 %v2112_v11  ;;  %3077 = vmatprep.mubr.f32.mxu1 %v2112_v11  ;;  %v4439_v40 = vpack.c.bf16 %v2500_v58, %v2496_v46  ;;  %v1720_v55 = vmul.f32 0.5, %v6507_v3 }
 0x2a7   : > { %7398 = vst [vmem:[#allocation40_spill] sm:$0xff] %v6602_v61  ;;  %v5009_v61 = vpop.eup %5008  ;;  %2648 = vmatmul.mubr.f32.gmra.mrb[66].mxu0 %v2111_v62  ;;  %3078 = vmatmul.mubr.f32.gmra.mrb[66].mxu1 %v2111_v62  ;;  %v1831_v10 = vmul.f32 0.70710677, %v6632_v32  ;;  %v1836_v62 = vmul.f32 0.70710677, %v6644_v29 }
 0x2a8   : > { %v6612_v33 = vpop.f32.mrb[36].mxu0  ;;  %v5011_v22 = vpop.eup %5010  ;;  %v2015_v23 = vadd.f32 1.0, %v5009_v61  ;;  %v1827_v43 = vmul.f32 0.70710677, %v6610_v8  ;;  %4438 = vmatpush1.bf16.msra.mxu0 %v4437_v9  ;;  %4566 = vmatpush1.bf16.msra.mxu1 %v4565_v21  ;;  %v2116_v9 = vmul.f32 %v2016_v17, %v1716_v47  ;;  %v1719_v17 = vmul.f32 0.5, %v6524_v37 }
 0x2a9   : > { %v6616_v27 = vpop.f32.mrb[36].mxu1  ;;  %v6618_v26 = vpop.f32.mrb[37].mxu0  ;;  %4440 = vmatprep.subr.bf16.mxu0 %v4439_v40  ;;  %4568 = vmatprep.subr.bf16.mxu1 %v4567_v41  ;;  %v2020_v52 = vadd.f32 1.0, %v5011_v22  ;;  %v6658_v40 = vadd.f32 %v6495_v60, %v6184_v50  ;;  %v6671_v37 = vadd.f32 %v6528_v35, %v6180_v49 }
 0x2aa   : > { %7399 = vst [vmem:[#allocation41_spill] sm:$0xff] %v6616_v27  ;;  %v6620_v0 = vpop.f32.mrb[37].mxu1  ;;  %v5013_v46 = vpop.eup %5012  ;;  %5020 = verf.f32 %v1827_v43  ;;  %v2115_v31 = vmul.f32 %v2015_v23, %v1715_v54  ;;  %2653 = vmatprep.mubr.f32.mxu0 %v2116_v9  ;;  %3083 = vmatprep.mubr.f32.mxu1 %v2116_v9 }
 0x2ab   : > { %v2019_v30 = vadd.f32 1.0, %v5013_v46  ;;  %v2120_v41 = vmul.f32 %v2020_v52, %v1720_v55  ;;  %5022 = verf.f32 %v1832_v4  ;;  %v1835_v52 = vmul.f32 0.70710677, %v6658_v40 }
 0x2ac   : > { %v6627_v27 = vpop.f32.mrb[38].mxu0  ;;  %2654 = vmatmul.mubr.f32.gmra.mrb[68].mxu0 %v2115_v31  ;;  %3084 = vmatmul.mubr.f32.gmra.mrb[68].mxu1 %v2115_v31  ;;  %v5015_v1 = vpop.eup %5014  ;;  %5024 = verf.f32 %v1831_v10  ;;  %v1724_v4 = vmul.f32 0.5, %v6563_v16  ;;  %v6678_v31 = vadd.f32 %v6517_v6, %v6184_v50  ;;  %v1723_v10 = vmul.f32 0.5, %v6573_v25 }
 0x2ad   : > { %v6634_v19 = vpop.f32.mrb[38].mxu1  ;;  %v6636_v61 = vpop.f32.mrb[39].mxu0  ;;  %2659 = vmatprep.mubr.f32.mxu0 %v2120_v41  ;;  %3089 = vmatprep.mubr.f32.mxu1 %v2120_v41  ;;  %v2024_v23 = vadd.f32 1.0, %v5015_v1  ;;  %v2119_v43 = vmul.f32 %v2019_v30, %v1719_v17  ;;  %5026 = verf.f32 %v1836_v62  ;;  %v1840_v16 = vmul.f32 0.70710677, %v6671_v37 }
 0x2ae   : > { %v6639_v58 = vpop.f32.mrb[39].mxu1  ;;  %v5017_v3 = vpop.eup %5016  ;;  %5028 = verf.f32 %v1835_v52  ;;  %v6690_v6 = vadd.f32 %v6567_v42, %v6180_v49  ;;  %v1839_v25 = vmul.f32 0.70710677, %v6678_v31 }
 0x2af   : > { %v5019_v60 = vpop.eup %5018  ;;  %v2023_v46 = vadd.f32 1.0, %v5017_v3  ;;  %v2124_v41 = vmul.f32 %v2024_v23, %v1724_v4  ;;  %5030 = verf.f32 %v1840_v16 }
 0x2b0   : > { %v6646_v56 = vpop.f32.mrb[40].mxu0  ;;  %2660 = vmatmul.mubr.f32.gmra.mrb[70].mxu0 %v2119_v43  ;;  %3090 = vmatmul.mubr.f32.gmra.mrb[70].mxu1 %v2119_v43  ;;  %v2028_v1 = vadd.f32 1.0, %v5019_v60  ;;  %v1728_v43 = vmul.f32 0.5, %v6592_v48  ;;  %5032 = verf.f32 %v1839_v25  ;;  %v1732_v25 = vmul.f32 0.5, %v6625_v38 }
 0x2b1   : > { %v6650_v11 = vpop.f32.mrb[40].mxu1  ;;  %v6652_v21 = vpop.f32.mrb[41].mxu0  ;;  %v2123_v17 = vmul.f32 %v2023_v46, %v1723_v10  ;;  %2665 = vmatprep.mubr.f32.mxu0 %v2124_v41  ;;  %3095 = vmatprep.mubr.f32.mxu1 %v2124_v41  ;;  %v6704_v46 = vadd.f32 %v6549_v45, %v6184_v50  ;;  %v1727_v41 = vmul.f32 0.5, %v6610_v8 }
 0x2b2   : > { %7400 = vst [vmem:[#allocation42_spill] sm:$0xff] %v6650_v11  ;;  %v6654_v18 = vpop.f32.mrb[41].mxu1  ;;  %v2128_v10 = vmul.f32 %v2028_v1, %v1728_v43  ;;  %v6717_v43 = vadd.f32 %v6596_v36, %v6180_v49  ;;  %v2513_v11 = vld [vmem:[%s5672_s14 + $0x750] sm:$0xff] }
 0x2b3   : > { %v1843_v1 = vmul.f32 0.70710677, %v6704_v46 }
 0x2b4   : > { %v6662_v22 = vpop.f32.mrb[42].mxu0  ;;  %v5021_v30 = vpop.eup %5020  ;;  %2666 = vmatmul.mubr.f32.gmra.mrb[72].mxu0 %v2123_v17  ;;  %3096 = vmatmul.mubr.f32.gmra.mrb[72].mxu1 %v2123_v17  ;;  %v1848_v36 = vmul.f32 0.70710677, %v6717_v43 }
 0x2b5   : > { %v6664_v47 = vpop.f32.mrb[42].mxu1  ;;  %v6666_v54 = vpop.f32.mrb[43].mxu0  ;;  %v2027_v60 = vadd.f32 1.0, %v5021_v30  ;;  %v1844_v30 = vmul.f32 0.70710677, %v6690_v6  ;;  %2671 = vmatprep.mubr.f32.mxu0 %v2128_v10  ;;  %3101 = vmatprep.mubr.f32.mxu1 %v2128_v10 }
 0x2b6   : > { %7401 = vst [vmem:[#allocation43_spill] sm:$0xff] %v6664_v47  ;;  %v6673_v9 = vpop.f32.mrb[43].mxu1  ;;  %v5023_v42 = vpop.eup %5022 }
 0x2b7   : > { %7402 = vst [vmem:[#allocation44_spill] sm:$0xff] %v6673_v9  ;;  %v2032_v17 = vadd.f32 1.0, %v5023_v42  ;;  %5034 = verf.f32 %v1844_v30 }
 0x2b8   : > { %v6680_v55 = vpop.f32.mrb[44].mxu0  ;;  %5036 = verf.f32 %v1843_v1 }
 0x2b9   : > { %v6683_v35 = vpop.f32.mrb[44].mxu1  ;;  %v6685_v3 = vpop.f32.mrb[45].mxu0  ;;  %5038 = verf.f32 %v1848_v36 }
 0x2ba   : > { %7403 = vst [vmem:[#allocation45_spill] sm:$0xff] %v6683_v35  ;;  %v6692_v62 = vpop.f32.mrb[45].mxu1  ;;  %v5025_v35 = vpop.eup %5024 }
 0x2bb   : > { %7404 = vst [vmem:[#allocation46_spill] sm:$0xff] %v6692_v62  ;;  %v5027_v45 = vpop.eup %5026  ;;  %v2031_v9 = vadd.f32 1.0, %v5025_v35  ;;  %v1731_v35 = vmul.f32 0.5, %v6632_v32 }
 0x2bc   : > { %v6696_v23 = vpop.f32.mrb[46].mxu0  ;;  %v5029_v42 = vpop.eup %5028  ;;  %v2036_v10 = vadd.f32 1.0, %v5027_v45 }
 0x2bd   : > { %v6698_v52 = vpop.f32.mrb[46].mxu1  ;;  %v6700_v4 = vpop.f32.mrb[47].mxu0  ;;  %v2035_v30 = vadd.f32 1.0, %v5029_v42  ;;  %v6751_v42 = vadd.f32 %v6627_v27, %v6184_v50 }
 0x2be   : > { %7405 = vst [vmem:[#allocation47_spill] sm:$0xff] %v6698_v52  ;;  %v6706_v48 = vpop.f32.mrb[47].mxu1  ;;  %v2127_v52 = vmul.f32 %v2027_v60, %v1727_v41  ;;  %v6726_v60 = vadd.f32 %v6582_v12, %v6184_v50  ;;  %v2132_v41 = vmul.f32 %v2032_v17, %v1732_v25  ;;  %v6734_v12 = vadd.f32 %v6618_v26, %v6180_v49  ;;  %v5031_v32 = vpop.eup %5030 }
 0x2bf   : > { %7406 = vst [vmem:[#allocation48_spill] sm:$0xff] %v6706_v48  ;;  %v2040_v45 = vadd.f32 1.0, %v5031_v32  ;;  %v6744_v26 = vadd.f32 %v6636_v61, %v6180_v49  ;;  %v6765_v32 = vadd.f32 %v6666_v54, %v6180_v49  ;;  %v2515_v48 = vld [vmem:[%s5672_s14 + $0x760] sm:$0xff] }
 0x2c0   : > { %v6710_v62 = vpop.f32.mrb[48].mxu0  ;;  %2672 = vmatmul.mubr.f32.gmra.mrb[74].mxu0 %v2127_v52  ;;  %3102 = vmatmul.mubr.f32.gmra.mrb[74].mxu1 %v2127_v52  ;;  %v1847_v38 = vmul.f32 0.70710677, %v6726_v60  ;;  %v6738_v52 = vadd.f32 %v6612_v33, %v6184_v50  ;;  %v1852_v1 = vmul.f32 0.70710677, %v6734_v12 }
 0x2c1   : > { %v6712_v47 = vpop.f32.mrb[48].mxu1  ;;  %v6719_v8 = vpop.f32.mrb[49].mxu0  ;;  %2677 = vmatprep.mubr.f32.mxu0 %v2132_v41  ;;  %3107 = vmatprep.mubr.f32.mxu1 %v2132_v41  ;;  %v1856_v61 = vmul.f32 0.70710677, %v6744_v26 }
 0x2c2   : > { %7407 = vst [vmem:[#allocation49_spill] sm:$0xff] %v6712_v47  ;;  %v6721_v16 = vpop.f32.mrb[49].mxu1  ;;  %v2131_v47 = vmul.f32 %v2031_v9, %v1731_v35  ;;  %v5033_v9 = vpop.eup %5032  ;;  %5040 = verf.f32 %v1847_v38  ;;  %v1851_v33 = vmul.f32 0.70710677, %v6738_v52  ;;  %v6756_v38 = vadd.f32 %v6652_v21, %v6180_v49 }
 0x2c3   : > { %7408 = vst [vmem:[#allocation50_spill] sm:$0xff] %v6721_v16  ;;  %v1736_v16 = vmul.f32 0.5, %v6644_v29  ;;  %v1735_v29 = vmul.f32 0.5, %v6658_v40  ;;  %v5035_v25 = vpop.eup %5034  ;;  %v2039_v35 = vadd.f32 1.0, %v5033_v9  ;;  %v1739_v40 = vmul.f32 0.5, %v6678_v31 }
 0x2c4   : > { %2678 = vmatmul.mubr.f32.gmra.mrb[76].mxu0 %v2131_v47  ;;  %3108 = vmatmul.mubr.f32.gmra.mrb[76].mxu1 %v2131_v47  ;;  %v2044_v41 = vadd.f32 1.0, %v5035_v25  ;;  %5042 = verf.f32 %v1852_v1  ;;  %v6761_v31 = vadd.f32 %v6646_v56, %v6184_v50  ;;  %v1855_v21 = vmul.f32 0.70710677, %v6751_v42 }
 0x2c5   : > { %v2136_v17 = vmul.f32 %v2036_v10, %v1736_v16  ;;  %v2135_v47 = vmul.f32 %v2035_v30, %v1735_v29  ;;  %v1740_v16 = vmul.f32 0.5, %v6671_v37  ;;  %v5037_v10 = vpop.eup %5036  ;;  %5044 = verf.f32 %v1851_v33 }
 0x2c6   : > { %v2139_v37 = vmul.f32 %v2039_v35, %v1739_v40  ;;  %v1744_v30 = vmul.f32 0.5, %v6690_v6  ;;  %v2043_v27 = vadd.f32 1.0, %v5037_v10  ;;  %5046 = verf.f32 %v1856_v61 }
 0x2c7   : > { %2683 = vmatprep.mubr.f32.mxu0 %v2136_v17  ;;  %3113 = vmatprep.mubr.f32.mxu1 %v2136_v17  ;;  %v2140_v36 = vmul.f32 %v2040_v45, %v1740_v16  ;;  %v5039_v17 = vpop.eup %5038  ;;  %v1743_v6 = vmul.f32 0.5, %v6704_v46  ;;  %v1860_v56 = vmul.f32 0.70710677, %v6756_v38  ;;  %v1859_v45 = vmul.f32 0.70710677, %v6761_v31 }
 0x2c8   : > { %2684 = vmatmul.mubr.f32.gmra.mrb[78].mxu0 %v2135_v47  ;;  %3114 = vmatmul.mubr.f32.gmra.mrb[78].mxu1 %v2135_v47  ;;  %v2144_v9 = vmul.f32 %v2044_v41, %v1744_v30  ;;  %v2048_v1 = vadd.f32 1.0, %v5039_v17  ;;  %v1864_v47 = vmul.f32 0.70710677, %v6765_v32  ;;  %5048 = verf.f32 %v1855_v21  ;;  %v2497_v17 = vld [vmem:[%s5672_s14 + $0x6d0] sm:$0xff] }
 0x2c9   : > { %2689 = vmatprep.mubr.f32.mxu0 %v2140_v36  ;;  %3119 = vmatprep.mubr.f32.mxu1 %v2140_v36  ;;  %v2143_v25 = vmul.f32 %v2043_v27, %v1743_v6  ;;  %v6774_v35 = vadd.f32 %v6662_v22, %v6184_v50  ;;  %v6778_v46 = vadd.f32 %v6685_v3, %v6180_v49  ;;  %v7349_v33 = vsub.s32 2, %v6172_v44  ;;  %v2495_v36 = vld [vmem:[%s5672_s14 + $0x6c0] sm:$0xff]  ;;  %v2501_v21 = vld [vmem:[%s5672_s14 + $0x6f0] sm:$0xff] }
 0x2ca   : > { %v1748_v16 = vmul.f32 0.5, %v6717_v43  ;;  %5050 = verf.f32 %v1860_v56  ;;  %v7348_v10 = vsub.s32 3, %v6172_v44  ;;  %v1747_v22 = vmul.f32 0.5, %v6726_v60 }
 0x2cb   : > { %5052 = verf.f32 %v1859_v45  ;;  %v1868_v3 = vmul.f32 0.70710677, %v6778_v46  ;;  %v1863_v43 = vmul.f32 0.70710677, %v6774_v35  ;;  %v6790_v30 = vadd.f32 %v6680_v55, %v6184_v50 }
 0x2cc   : > { %2690 = vmatmul.mubr.f32.gmra.mrb[80].mxu0 %v2139_v37  ;;  %3120 = vmatmul.mubr.f32.gmra.mrb[80].mxu1 %v2139_v37  ;;  %v5041_v29 = vpop.eup %5040  ;;  %5054 = verf.f32 %v1864_v47  ;;  %v2148_v61 = vmul.f32 %v2048_v1, %v1748_v16  ;;  %v2499_v37 = vld [vmem:[%s5672_s14 + $0x6e0] sm:$0xff]  ;;  %v1752_v1 = vmul.f32 0.5, %v6734_v12  ;;  %v4569_v47 = vpack.c.bf16 %v2501_v21, %v2497_v17 }
 0x2cd   : > { %2695 = vmatprep.mubr.f32.mxu0 %v2144_v9  ;;  %3125 = vmatprep.mubr.f32.mxu1 %v2144_v9  ;;  %v2047_v54 = vadd.f32 1.0, %v5041_v29  ;;  %v5170_v9 = vld [vmem:[%s289_s24] sm:$0xf]  ;;  %v4441_v55 = vpack.c.bf16 %v2499_v37, %v2495_v36  ;;  %5056 = verf.f32 %v1868_v3  ;;  %v1867_v16 = vmul.f32 0.70710677, %v6790_v30 }
 0x2ce   : > { %v5043_v40 = vpop.eup %5042  ;;  %v6798_v60 = vrot.slane %v5170_v9, %v7349_v33  ;;  %v6802_v56 = vrot.slane %v5170_v9, %v7348_v10  ;;  %5058 = verf.f32 %v1863_v43  ;;  %4570 = vmatpush1.bf16.msra.mxu1 %v4569_v47  ;;  %v1756_v36 = vmul.f32 0.5, %v6744_v26  ;;  %v2504_v26 = vld [vmem:[%s5672_s14 + $0x708] sm:$0xff]  ;;  %v2507_v47 = vld [vmem:[%s5672_s14 + $0x720] sm:$0xff]  ;;  %v2518_v10 = vld [vmem:[%s5672_s14 + $0x778] sm:$0xff] }
 0x2cf   : > { %v5045_v41 = vpop.eup %5044  ;;  %v2147_v27 = vmul.f32 %v2047_v54, %v1747_v22  ;;  %v2052_v29 = vadd.f32 1.0, %v5043_v40  ;;  %v1751_v54 = vmul.f32 0.5, %v6738_v52  ;;  %v6813_v40 = vadd.f32 %v6696_v23, %v6184_v50  ;;  %4442 = vmatpush1.bf16.msra.mxu0 %v4441_v55  ;;  %v2508_v43 = vld [vmem:[%s5672_s14 + $0x728] sm:$0xff]  ;;  %v2503_v55 = vld [vmem:[%s5672_s14 + $0x700] sm:$0xff] }
 0x2d0   : > { %2696 = vmatmul.mubr.f32.gmra.mrb[82].mxu0 %v2143_v25  ;;  %3126 = vmatmul.mubr.f32.gmra.mrb[82].mxu1 %v2143_v25  ;;  %v5047_v6 = vpop.eup %5046  ;;  %v2051_v45 = vadd.f32 1.0, %v5045_v41  ;;  %v6807_v25 = vadd.f32 %v6700_v4, %v6180_v49  ;;  %v6817_v22 = vadd.f32 %v6186_v51, %v6798_v60  ;;  %v6822_v3 = vadd.f32 %v6188_v53, %v6802_v56 }
 0x2d1   : > { %2701 = vmatprep.mubr.f32.mxu0 %v2148_v61  ;;  %3131 = vmatprep.mubr.f32.mxu1 %v2148_v61  ;;  %v2056_v12 = vadd.f32 1.0, %v5047_v6  ;;  %v2152_v4 = vmul.f32 %v2052_v29, %v1752_v1  ;;  %v1871_v37 = vmul.f32 0.70710677, %v6813_v40  ;;  %v6828_v53 = vadd.f32 %v6710_v62, %v6184_v50  ;;  %v2506_v6 = vld [vmem:[%s5672_s14 + $0x718] sm:$0xff] }
 0x2d2   : > { %v1872_v41 = vmul.f32 0.70710677, %v6807_v25  ;;  %v5049_v52 = vpop.eup %5048  ;;  %v2151_v61 = vmul.f32 %v2051_v45, %v1751_v54  ;;  %v6833_v17 = vmul.f32 0.70710677, %v6817_v22  ;;  %v6837_v9 = vadd.f32 %v6719_v8, %v6180_v49  ;;  %v2510_v45 = vld [vmem:[%s5672_s14 + $0x738] sm:$0xff]  ;;  %v2505_v54 = vld [vmem:[%s5672_s14 + $0x710] sm:$0xff] }
 0x2d3   : > { %v2055_v21 = vadd.f32 1.0, %v5049_v52  ;;  %v2156_v29 = vmul.f32 %v2056_v12, %v1756_v36  ;;  %v1782_v50 = vmul.f32 0.70710677, %v6822_v3  ;;  %v6845_v62 = vadd.f32 %v6194_v59, %v6802_v56  ;;  %v2514_v36 = vld [vmem:[%s5672_s14 + $0x758] sm:$0xff] }
 0x2d4   : > { %2702 = vmatmul.mubr.f32.gmra.mrb[84].mxu0 %v2147_v27  ;;  %3132 = vmatmul.mubr.f32.gmra.mrb[84].mxu1 %v2147_v27  ;;  %v5051_v23 = vpop.eup %5050  ;;  %5060 = verf.f32 %v1872_v41  ;;  %v1755_v49 = vmul.f32 0.5, %v6751_v42  ;;  %v1760_v12 = vmul.f32 0.5, %v6756_v38  ;;  %v1876_v41 = vmul.f32 0.70710677, %v6837_v9 }
 0x2d5   : > { %2707 = vmatprep.mubr.f32.mxu0 %v2152_v4  ;;  %3137 = vmatprep.mubr.f32.mxu1 %v2152_v4  ;;  %v5053_v51 = vpop.eup %5052  ;;  %5062 = verf.f32 %v1867_v16  ;;  %v2060_v1 = vadd.f32 1.0, %v5051_v23  ;;  %v2509_v16 = vld [vmem:[%s5672_s14 + $0x730] sm:$0xff]  ;;  %v2512_v4 = vld [vmem:[%s5672_s14 + $0x748] sm:$0xff]  ;;  %v1875_v59 = vmul.f32 0.70710677, %v6828_v53  ;;  %v4445_v33 = vpack.c.bf16 %v2507_v47, %v2503_v55 }
 0x2d6   : > { %v5055_v27 = vpop.eup %5054  ;;  %v2059_v8 = vadd.f32 1.0, %v5053_v51  ;;  %5064 = verf.f32 %v1871_v37  ;;  %v2516_v23 = vld [vmem:[%s5672_s14 + $0x768] sm:$0xff]  ;;  %v4571_v51 = vpack.c.bf16 %v2510_v45, %v2506_v6  ;;  %v2155_v38 = vmul.f32 %v2055_v21, %v1755_v49 }
 0x2d7   : > { %v2064_v52 = vadd.f32 1.0, %v5055_v27  ;;  %v5057_v42 = vpop.eup %5056  ;;  %5066 = verf.f32 %v1876_v41  ;;  %v6860_v37 = vadd.f32 %v6192_v57, %v6798_v60  ;;  %v2160_v27 = vmul.f32 %v2060_v1, %v1760_v12  ;;  %v2517_v57 = vld [vmem:[%s5672_s14 + $0x770] sm:$0xff]  ;;  %v2520_v55 = vld [vmem:[%s5672_s14 + $0x788] sm:$0xff] }
 0x2d8   : > { %2708 = vmatmul.mubr.f32.gmra.mrb[86].mxu0 %v2151_v61  ;;  %3138 = vmatmul.mubr.f32.gmra.mrb[86].mxu1 %v2151_v61  ;;  %v4443_v61 = vpack.c.bf16 %v2508_v43, %v2504_v26  ;;  %v5059_v44 = vpop.eup %5058  ;;  %v1764_v26 = vmul.f32 0.5, %v6765_v32  ;;  %v4573_v43 = vpack.c.bf16 %v2509_v16, %v2505_v54  ;;  %5068 = verf.f32 %v1782_v50  ;;  %v2524_v47 = vld [vmem:[%s5672_s14 + $0x7a8] sm:$0xff]  ;;  %v2522_v50 = vld [vmem:[%s5672_s14 + $0x798] sm:$0xff] }
 0x2d9   : > { %2713 = vmatprep.mubr.f32.mxu0 %v2156_v29  ;;  %3143 = vmatprep.mubr.f32.mxu1 %v2156_v29  ;;  %v2511_v29 = vld [vmem:[%s5672_s14 + $0x740] sm:$0xff]  ;;  %v1759_v21 = vmul.f32 0.5, %v6761_v31  ;;  %v4447_v6 = vpack.c.bf16 %v2516_v23, %v2512_v4  ;;  %v4575_v45 = vpack.c.bf16 %v2518_v10, %v2514_v36  ;;  %v6872_v32 = vadd.f32 %v6201_v2, %v6802_v56  ;;  %v2526_v16 = vld [vmem:[%s5672_s14 + $0x7b8] sm:$0xff]  ;;  %v2521_v36 = vld [vmem:[%s5672_s14 + $0x790] sm:$0xff] }
 0x2da   : > { %4444 = vmatprep.subr.bf16.mxu0 %v4443_v61  ;;  %4572 = vmatprep.subr.bf16.mxu1 %v4571_v51  ;;  %v2068_v1 = vadd.f32 1.0, %v5057_v42  ;;  %5070 = verf.f32 %v1875_v59  ;;  %v2164_v54 = vmul.f32 %v2064_v52, %v1764_v26  ;;  %v1786_v10 = vmul.f32 0.70710677, %v6845_v62  ;;  %v2519_v61 = vld [vmem:[%s5672_s14 + $0x780] sm:$0xff]  ;;  %v2528_v42 = vld [vmem:[%s5672_s14 + $0x7c8] sm:$0xff] }
 0x2db   : > { %4446 = vmatpush1.bf16.msra.mxu0 %v4445_v33  ;;  %v2063_v49 = vadd.f32 1.0, %v5059_v44  ;;  %4574 = vmatpush1.bf16.msra.mxu1 %v4573_v43  ;;  %v2159_v12 = vmul.f32 %v2059_v8, %v1759_v21  ;;  %v4449_v41 = vpack.c.bf16 %v2515_v48, %v2511_v29  ;;  %v1785_v4 = vmul.f32 0.70710677, %v6860_v37  ;;  %v2523_v23 = vld [vmem:[%s5672_s14 + $0x7a0] sm:$0xff]  ;;  %v2525_v8 = vld [vmem:[%s5672_s14 + $0x7b0] sm:$0xff] }
 0x2dc   : > { %2714 = vmatmul.mubr.f32.gmra.mrb[88].mxu0 %v2155_v38  ;;  %3144 = vmatmul.mubr.f32.gmra.mrb[88].mxu1 %v2155_v38  ;;  %v1768_v33 = vmul.f32 0.5, %v6778_v46  ;;  %v4577_v52 = vpack.c.bf16 %v2517_v57, %v2513_v11  ;;  %v4451_v59 = vpack.c.bf16 %v2524_v47, %v2520_v55  ;;  %5072 = verf.f32 %v6833_v17  ;;  %v2532_v11 = vld [vmem:[%s5672_s14 + $0x7e8] sm:$0xff]  ;;  %v2527_v57 = vld [vmem:[%s5672_s14 + $0x7c0] sm:$0xff] }
 0x2dd   : > { %2719 = vmatprep.mubr.f32.mxu0 %v2160_v27  ;;  %3149 = vmatprep.mubr.f32.mxu1 %v2160_v27  ;;  %v6885_v44 = vadd.f32 %v6196_v63, %v6798_v60  ;;  %v1763_v48 = vmul.f32 0.5, %v6774_v35  ;;  %v4579_v46 = vpack.c.bf16 %v2526_v16, %v2522_v50  ;;  %v1790_v51 = vmul.f32 0.70710677, %v6872_v32  ;;  %v2530_v63 = vld [vmem:[%s5672_s14 + $0x7d8] sm:$0xff]  ;;  %v2531_v55 = vld [vmem:[%s5672_s14 + $0x7e0] sm:$0xff] }
 0x2de   : > { %v5061_v31 = vpop.eup %5060  ;;  %4448 = vmatprep.subr.bf16.mxu0 %v4447_v6  ;;  %4576 = vmatprep.subr.bf16.mxu1 %v4575_v45  ;;  %v6894_v38 = vadd.f32 %v6208_v7, %v6802_v56  ;;  %v2168_v26 = vmul.f32 %v2068_v1, %v1768_v33  ;;  %v2534_v35 = vld [vmem:[%s5672_s14 + $0x7f8] sm:$0xff]  ;;  %5074 = verf.f32 %v1786_v10  ;;  %v4453_v29 = vpack.c.bf16 %v2523_v23, %v2519_v61 }
 0x2df   : > { %v5063_v2 = vpop.eup %5062  ;;  %v2072_v17 = vadd.f32 1.0, %v5061_v31  ;;  %4450 = vmatpush1.bf16.msra.mxu0 %v4449_v41  ;;  %v2163_v27 = vmul.f32 %v2063_v49, %v1763_v48  ;;  %5076 = verf.f32 %v1785_v4  ;;  %v1772_v7 = vmul.f32 0.5, %v6807_v25  ;;  %4578 = vmatpush1.bf16.msra.mxu1 %v4577_v52  ;;  %v2529_v31 = vld [vmem:[%s5672_s14 + $0x7d0] sm:$0xff] }
 0x2e0   : > { %2720 = vmatmul.mubr.f32.gmra.mrb[90].mxu0 %v2159_v12  ;;  %3150 = vmatmul.mubr.f32.gmra.mrb[90].mxu1 %v2159_v12  ;;  %v2067_v43 = vadd.f32 1.0, %v5063_v2  ;;  %v5065_v21 = vpop.eup %5064  ;;  %v4581_v6 = vpack.c.bf16 %v2525_v8, %v2521_v36  ;;  %v4455_v45 = vpack.c.bf16 %v2532_v11, %v2528_v42  ;;  %v1789_v1 = vmul.f32 0.70710677, %v6885_v44  ;;  %v2533_v25 = vld [vmem:[%s5672_s14 + $0x7f0] sm:$0xff] }
 0x2e1   : > { %2725 = vmatprep.mubr.f32.mxu0 %v2164_v54  ;;  %3155 = vmatprep.mubr.f32.mxu1 %v2164_v54  ;;  %v5067_v47 = vpop.eup %5066  ;;  %v6904_v54 = vadd.f32 %v6206_v5, %v6798_v60  ;;  %v1767_v50 = vmul.f32 0.5, %v6790_v30  ;;  %v4583_v16 = vpack.c.bf16 %v2534_v35, %v2530_v63  ;;  %5078 = verf.f32 %v1790_v51 }
 0x2e2   : > { %4452 = vmatprep.subr.bf16.mxu0 %v4451_v59  ;;  %4580 = vmatprep.subr.bf16.mxu1 %v4579_v46  ;;  %v1794_v10 = vmul.f32 0.70710677, %v6894_v38  ;;  %v2076_v49 = vadd.f32 1.0, %v5067_v47  ;;  %v2172_v12 = vmul.f32 %v2072_v17, %v1772_v7  ;;  %v5069_v41 = vpop.eup %5068  ;;  %v6912_v2 = vadd.f32 %v6220_v15, %v6802_v56 }
 0x2e3   : > { %v2071_v5 = vadd.f32 1.0, %v5065_v21  ;;  %v2167_v30 = vmul.f32 %v2067_v43, %v1767_v50  ;;  %4454 = vmatpush1.bf16.msra.mxu0 %v4453_v29  ;;  %v4457_v4 = vpack.c.bf16 %v2531_v55, %v2527_v57  ;;  %v1776_v52 = vmul.f32 0.5, %v6837_v9  ;;  %4582 = vmatpush1.bf16.msra.mxu1 %v4581_v6 }
 0x2e4   : > { %2726 = vmatmul.mubr.f32.gmra.mrb[92].mxu0 %v2163_v27  ;;  %3156 = vmatmul.mubr.f32.gmra.mrb[92].mxu1 %v2163_v27  ;;  %v5071_v33 = vpop.eup %5070  ;;  %v4585_v59 = vpack.c.bf16 %v2533_v25, %v2529_v31  ;;  %5080 = verf.f32 %v1789_v1  ;;  %v1793_v61 = vmul.f32 0.70710677, %v6904_v54  ;;  %v6918_v23 = vadd.f32 %v6218_v13, %v6798_v60 }
 0x2e5   : > { %2731 = vmatprep.mubr.f32.mxu0 %v2168_v26  ;;  %3161 = vmatprep.mubr.f32.mxu1 %v2168_v26  ;;  %v1771_v15 = vmul.f32 0.5, %v6813_v40  ;;  %5082 = verf.f32 %v1794_v10  ;;  %v2176_v36 = vmul.f32 %v2076_v49, %v1776_v52  ;;  %v1798_v9 = vmul.f32 0.70710677, %v6912_v2  ;;  %v7411_v52 = vld [vmem:[#allocation22_spill] sm:$0xff] }
 0x2e6   : > { %4456 = vmatprep.subr.bf16.mxu0 %v4455_v45  ;;  %4584 = vmatprep.subr.bf16.mxu1 %v4583_v16  ;;  %v5073_v48 = vpop.eup %5072  ;;  %v6924_v46 = vadd.f32 %v6234_v24, %v6802_v56  ;;  %v2075_v8 = vadd.f32 1.0, %v5071_v33  ;;  %v1982_v13 = vadd.f32 1.0, %v5069_v41  ;;  %5084 = verf.f32 %v1793_v61  ;;  %v7409_v16 = vld [vmem:[#allocation21_spill] sm:$0xff] }
 0x2e7   : > { %v2171_v42 = vmul.f32 %v2071_v5, %v1771_v15  ;;  %4458 = vmatpush1.bf16.msra.mxu0 %v4457_v4  ;;  %4586 = vmatpush1.bf16.msra.mxu1 %v4585_v59  ;;  %v1797_v11 = vmul.f32 0.70710677, %v6918_v23  ;;  %v6929_v51 = vadd.f32 %v6229_v20, %v6798_v60  ;;  %v1775_v17 = vmul.f32 0.5, %v6828_v53 }
 0x2e8   : > { %2732 = vmatmul.mubr.f32.gmra.mrb[94].mxu0 %v2167_v30  ;;  %3162 = vmatmul.mubr.f32.gmra.mrb[94].mxu1 %v2167_v30  ;;  %v5075_v40 = vpop.eup %5074  ;;  %v1981_v24 = vadd.f32 1.0, %v5073_v48  ;;  %v1682_v63 = vmul.f32 0.5, %v6822_v3  ;;  %5086 = verf.f32 %v1798_v9  ;;  %v1802_v35 = vmul.f32 0.70710677, %v6924_v46  ;;  %v7412_v9 = vld [vmem:[#allocation25_spill] sm:$0xff] }
 0x2e9   : > { %2737 = vmatprep.mubr.f32.mxu0 %v2172_v12  ;;  %3167 = vmatprep.mubr.f32.mxu1 %v2172_v12  ;;  %v5077_v26 = vpop.eup %5076  ;;  %v6936_v43 = vadd.f32 %v6254_v39, %v6802_v56  ;;  %v2175_v27 = vmul.f32 %v2075_v8, %v1775_v17  ;;  %v1681_v29 = vmul.f32 0.5, %v6817_v22  ;;  %v1986_v53 = vadd.f32 1.0, %v5075_v40  ;;  %v7410_v12 = vld [vmem:[#allocation23_spill] sm:$0xff]  ;;  %v7413_v17 = vld [vmem:[#allocation24_spill] sm:$0xff] }
 0x2ea   : > { %v2082_v21 = vmul.f32 %v1982_v13, %v1682_v63  ;;  %5088 = verf.f32 %v1797_v11  ;;  %v1801_v7 = vmul.f32 0.70710677, %v6929_v51  ;;  %v6942_v3 = vadd.f32 %v6246_v34, %v6798_v60 }
 0x2eb   : > { %v5079_v20 = vpop.eup %5078  ;;  %v2081_v6 = vmul.f32 %v1981_v24, %v1681_v29  ;;  %v1686_v45 = vmul.f32 0.5, %v6845_v62  ;;  %v1985_v57 = vadd.f32 1.0, %v5077_v26  ;;  %5090 = verf.f32 %v1802_v35 }
 0x2ec   : > { %2738 = vmatmul.mubr.f32.gmra.mrb[96].mxu0 %v2171_v42  ;;  %3168 = vmatmul.mubr.f32.gmra.mrb[96].mxu1 %v2171_v42  ;;  %v1806_v22 = vmul.f32 0.70710677, %v6936_v43  ;;  %v6948_v55 = vadd.f32 %v6270_v14, %v6802_v56  ;;  %v1990_v1 = vadd.f32 1.0, %v5079_v20  ;;  %v1685_v50 = vmul.f32 0.5, %v6860_v37  ;;  %v7414_v20 = vld [vmem:[#allocation27_spill] sm:$0xff] }
 0x2ed   : > { %2743 = vmatprep.mubr.f32.mxu0 %v2176_v36  ;;  %3173 = vmatprep.mubr.f32.mxu1 %v2176_v36  ;;  %v2086_v34 = vmul.f32 %v1986_v53, %v1686_v45  ;;  %5092 = verf.f32 %v1801_v7  ;;  %v1805_v62 = vmul.f32 0.70710677, %v6942_v3  ;;  %v6954_v31 = vadd.f32 %v7409_v16, %v6798_v60  ;;  %v7415_v45 = vld [vmem:[#allocation26_spill] sm:$0xff] }
 0x2ee   : > { %v5081_v39 = vpop.eup %5080  ;;  %v1690_v10 = vmul.f32 0.5, %v6872_v32  ;;  %5094 = verf.f32 %v1806_v22  ;;  %v1810_v49 = vmul.f32 0.70710677, %v6948_v55  ;;  %v6960_v37 = vadd.f32 %v7410_v12, %v6802_v56 }
 0x2ef   : > { %v5083_v47 = vpop.eup %5082  ;;  %v1989_v25 = vadd.f32 1.0, %v5081_v39  ;;  %v2085_v41 = vmul.f32 %v1985_v57, %v1685_v50  ;;  %v1689_v33 = vmul.f32 0.5, %v6885_v44  ;;  %5096 = verf.f32 %v1805_v62 }
 0x2f0   : > { %2744 = vmatmul.mubr.f32.gmra.mrb[98].mxu0 %v2175_v27  ;;  %3174 = vmatmul.mubr.f32.gmra.mrb[98].mxu1 %v2175_v27  ;;  %v5085_v14 = vpop.eup %5084  ;;  %v1994_v5 = vadd.f32 1.0, %v5083_v47  ;;  %v2090_v30 = vmul.f32 %v1990_v1, %v1690_v10  ;;  %v1809_v32 = vmul.f32 0.70710677, %v6954_v31  ;;  %v6966_v59 = vadd.f32 %v7411_v52, %v6798_v60 }
 0x2f1   : > { %2814 = vmatprep.mubr.f32.mxu0 %v2082_v21  ;;  %3244 = vmatprep.mubr.f32.mxu1 %v2082_v21  ;;  %v1993_v61 = vadd.f32 1.0, %v5085_v14  ;;  %v1694_v15 = vmul.f32 0.5, %v6894_v38  ;;  %5098 = verf.f32 %v1810_v49  ;;  %v1814_v48 = vmul.f32 0.70710677, %v6960_v37  ;;  %v7417_v14 = vld [vmem:[#allocation28_spill] sm:$0xff] }
 0x2f2   : > { %v5087_v4 = vpop.eup %5086  ;;  %v6972_v44 = vadd.f32 %v7412_v9, %v6802_v56  ;;  %v2089_v8 = vmul.f32 %v1989_v25, %v1689_v33  ;;  %v1693_v11 = vmul.f32 0.5, %v6904_v54  ;;  %5100 = verf.f32 %v1809_v32 }
 0x2f3   : > { %v1998_v42 = vadd.f32 1.0, %v5087_v4  ;;  %v2094_v13 = vmul.f32 %v1994_v5, %v1694_v15  ;;  %v1813_v38 = vmul.f32 0.70710677, %v6966_v59  ;;  %v6978_v26 = vadd.f32 %v7413_v17, %v6798_v60  ;;  %v7418_v4 = vld [vmem:[#allocation31_spill] sm:$0xff] }
 0x2f4   : > { %2815 = vmatmul.mubr.f32.vlgmr.msra.gmra.mrb[50].mxu0 %v2081_v6  ;;  %3245 = vmatmul.mubr.f32.vlgmr.msra.gmra.mrb[50].mxu1 %v2081_v6  ;;  %v5089_v36 = vpop.eup %5088  ;;  %v1698_v63 = vmul.f32 0.5, %v6912_v2  ;;  %5102 = verf.f32 %v1814_v48  ;;  %v1818_v27 = vmul.f32 0.70710677, %v6972_v44  ;;  %v6984_v54 = vadd.f32 %v7414_v20, %v6802_v56 }
 0x2f5   : > { %2820 = vmatprep.mubr.f32.mxu0 %v2086_v34  ;;  %3250 = vmatprep.mubr.f32.mxu1 %v2086_v34  ;;  %v5091_v40 = vpop.eup %5090  ;;  %v1997_v24 = vadd.f32 1.0, %v5089_v36  ;;  %v2093_v29 = vmul.f32 %v1993_v61, %v1693_v11  ;;  %v1697_v6 = vmul.f32 0.5, %v6918_v23  ;;  %5104 = verf.f32 %v1813_v38  ;;  %v7416_v34 = vld [vmem:[#allocation29_spill] sm:$0xff]  ;;  %v7419_v36 = vld [vmem:[#allocation30_spill] sm:$0xff] }
 0x2f6   : > { %v2002_v53 = vadd.f32 1.0, %v5091_v40  ;;  %v2098_v21 = vmul.f32 %v1998_v42, %v1698_v63  ;;  %v1817_v2 = vmul.f32 0.70710677, %v6978_v26  ;;  %v6990_v39 = vadd.f32 %v7415_v45, %v6798_v60  ;;  %v7420_v40 = vld [vmem:[#allocation33_spill] sm:$0xff] }
 0x2f7   : > { %v5093_v35 = vpop.eup %5092  ;;  %v1702_v22 = vmul.f32 0.5, %v6924_v46  ;;  %5106 = verf.f32 %v1818_v27  ;;  %v1822_v1 = vmul.f32 0.70710677, %v6984_v54  ;;  %v6996_v23 = vadd.f32 %v7416_v34, %v6802_v56 }
 0x2f8   : > { %2821 = vmatmul.mubr.f32.gmra.mrb[52].mxu0 %v2085_v41  ;;  %3251 = vmatmul.mubr.f32.gmra.mrb[52].mxu1 %v2085_v41  ;;  %v5095_v7 = vpop.eup %5094  ;;  %v2001_v57 = vadd.f32 1.0, %v5093_v35  ;;  %v2097_v50 = vmul.f32 %v1997_v24, %v1697_v6  ;;  %v1701_v10 = vmul.f32 0.5, %v6929_v51  ;;  %5108 = verf.f32 %v1817_v2  ;;  %v7421_v35 = vld [vmem:[#allocation32_spill] sm:$0xff] }
 0x2f9   : > { %2826 = vmatprep.mubr.f32.mxu0 %v2090_v30  ;;  %3256 = vmatprep.mubr.f32.mxu1 %v2090_v30  ;;  %v5097_v47 = vpop.eup %5096  ;;  %v2006_v62 = vadd.f32 1.0, %v5095_v7  ;;  %v2102_v16 = vmul.f32 %v2002_v53, %v1702_v22  ;;  %v1821_v46 = vmul.f32 0.70710677, %v6990_v39  ;;  %v7002_v49 = vadd.f32 %v7417_v14, %v6798_v60  ;;  %v7422_v7 = vld [vmem:[#allocation35_spill] sm:$0xff] }
 0x2fa   : > { %v2005_v12 = vadd.f32 1.0, %v5097_v47  ;;  %v1706_v41 = vmul.f32 0.5, %v6936_v43  ;;  %5110 = verf.f32 %v1822_v1  ;;  %v1826_v30 = vmul.f32 0.70710677, %v6996_v23  ;;  %v7423_v47 = vld [vmem:[#allocation34_spill] sm:$0xff] }
 0x2fb   : > { %v5099_v25 = vpop.eup %5098  ;;  %v7008_v51 = vadd.f32 %v7418_v4, %v6802_v56  ;;  %v2101_v33 = vmul.f32 %v2001_v57, %v1701_v10  ;;  %v1705_v15 = vmul.f32 0.5, %v6942_v3  ;;  %5112 = verf.f32 %v1821_v46 }
 0x2fc   : > { %2827 = vmatmul.mubr.f32.gmra.mrb[54].mxu0 %v2089_v8  ;;  %3257 = vmatmul.mubr.f32.gmra.mrb[54].mxu1 %v2089_v8  ;;  %v5101_v5 = vpop.eup %5100  ;;  %v2010_v32 = vadd.f32 1.0, %v5099_v25  ;;  %v2106_v52 = vmul.f32 %v2006_v62, %v1706_v41  ;;  %v1825_v43 = vmul.f32 0.70710677, %v7002_v49  ;;  %v7014_v48 = vadd.f32 %v7419_v36, %v6798_v60  ;;  %v7424_v25 = vld [vmem:[#allocation37_spill] sm:$0xff] }
 0x2fd   : > { %2832 = vmatprep.mubr.f32.mxu0 %v2094_v13  ;;  %3262 = vmatprep.mubr.f32.mxu1 %v2094_v13  ;;  %v2009_v9 = vadd.f32 1.0, %v5101_v5  ;;  %v1710_v8 = vmul.f32 0.5, %v6948_v55  ;;  %5114 = verf.f32 %v1826_v30  ;;  %v1830_v13 = vmul.f32 0.70710677, %v7008_v51  ;;  %v7425_v5 = vld [vmem:[#allocation36_spill] sm:$0xff] }
 0x2fe   : > { %v5103_v61 = vpop.eup %5102  ;;  %v7020_v3 = vadd.f32 %v7420_v40, %v6802_v56  ;;  %v2105_v11 = vmul.f32 %v2005_v12, %v1705_v15  ;;  %v1709_v63 = vmul.f32 0.5, %v6954_v31  ;;  %5116 = verf.f32 %v1825_v43 }
 0x2ff   : > { %v5105_v42 = vpop.eup %5104  ;;  %v2014_v38 = vadd.f32 1.0, %v5103_v61  ;;  %v2110_v17 = vmul.f32 %v2010_v32, %v1710_v8  ;;  %v1829_v55 = vmul.f32 0.70710677, %v7014_v48  ;;  %v7026_v27 = vadd.f32 %v7421_v35, %v6798_v60  ;;  %v7426_v8 = vld [vmem:[#allocation38_spill] sm:$0xff] }
 0x300   : > { %2833 = vmatmul.mubr.f32.gmra.mrb[56].mxu0 %v2093_v29  ;;  %3263 = vmatmul.mubr.f32.gmra.mrb[56].mxu1 %v2093_v29  ;;  %v2013_v20 = vadd.f32 1.0, %v5105_v42  ;;  %v1714_v29 = vmul.f32 0.5, %v6960_v37  ;;  %5118 = verf.f32 %v1830_v13  ;;  %v7032_v31 = vadd.f32 %v7422_v7, %v6802_v56 }
 0x301   : > { %2838 = vmatprep.mubr.f32.mxu0 %v2098_v21  ;;  %3268 = vmatprep.mubr.f32.mxu1 %v2098_v21  ;;  %v5107_v24 = vpop.eup %5106  ;;  %v1834_v21 = vmul.f32 0.70710677, %v7020_v3  ;;  %v2109_v6 = vmul.f32 %v2009_v9, %v1709_v63  ;;  %v1713_v22 = vmul.f32 0.5, %v6966_v59  ;;  %5120 = verf.f32 %v1829_v55 }
 0x302   : > { %v5109_v53 = vpop.eup %5108  ;;  %v2018_v2 = vadd.f32 1.0, %v5107_v24  ;;  %v2114_v45 = vmul.f32 %v2014_v38, %v1714_v29  ;;  %v1833_v37 = vmul.f32 0.70710677, %v7026_v27  ;;  %v7038_v1 = vadd.f32 %v7423_v47, %v6798_v60  ;;  %v7427_v38 = vld [vmem:[#allocation40_spill] sm:$0xff]  ;;  %v7429_v47 = vld [vmem:[#allocation41_spill] sm:$0xff] }
 0x303   : > { %v2017_v34 = vadd.f32 1.0, %v5109_v53  ;;  %5122 = verf.f32 %v1834_v21  ;;  %v7044_v59 = vadd.f32 %v7424_v25, %v6802_v56  ;;  %v2113_v10 = vmul.f32 %v2013_v20, %v1713_v22  ;;  %v7428_v20 = vld [vmem:[#allocation39_spill] sm:$0xff] }
 0x304   : > { %2839 = vmatmul.mubr.f32.gmra.mrb[58].mxu0 %v2097_v50  ;;  %3269 = vmatmul.mubr.f32.gmra.mrb[58].mxu1 %v2097_v50  ;;  %v5111_v57 = vpop.eup %5110  ;;  %v1718_v50 = vmul.f32 0.5, %v6972_v44  ;;  %v1717_v41 = vmul.f32 0.5, %v6978_v26  ;;  %5124 = verf.f32 %v1833_v37  ;;  %v1837_v44 = vmul.f32 0.70710677, %v7038_v1 }
 0x305   : > { %2844 = vmatprep.mubr.f32.mxu0 %v2102_v16  ;;  %3274 = vmatprep.mubr.f32.mxu1 %v2102_v16  ;;  %v5113_v62 = vpop.eup %5112  ;;  %v1838_v16 = vmul.f32 0.70710677, %v7032_v31  ;;  %v2022_v46 = vadd.f32 1.0, %v5111_v57  ;;  %v7050_v30 = vadd.f32 %v7425_v5, %v6798_v60  ;;  %v7056_v26 = vadd.f32 %v6575_v28, %v6802_v56 }
 0x306   : > { %v2118_v14 = vmul.f32 %v2018_v2, %v1718_v50  ;;  %v2021_v4 = vadd.f32 1.0, %v5113_v62  ;;  %v2117_v61 = vmul.f32 %v2017_v34, %v1717_v41  ;;  %v1721_v9 = vmul.f32 0.5, %v6990_v39 }
 0x307   : > { %v5115_v12 = vpop.eup %5114  ;;  %5126 = verf.f32 %v1838_v16  ;;  %v7062_v42 = vadd.f32 %v7426_v8, %v6798_v60  ;;  %v1726_v40 = vmul.f32 0.5, %v6996_v23  ;;  %v7068_v39 = vadd.f32 %v7427_v38, %v6802_v56  ;;  %v7431_v8 = vld [vmem:[#allocation44_spill] sm:$0xff] }
 0x308   : > { %2845 = vmatmul.mubr.f32.gmra.mrb[60].mxu0 %v2101_v33  ;;  %3275 = vmatmul.mubr.f32.gmra.mrb[60].mxu1 %v2101_v33  ;;  %v1722_v33 = vmul.f32 0.5, %v6984_v54  ;;  %v5117_v32 = vpop.eup %5116  ;;  %v2026_v15 = vadd.f32 1.0, %v5115_v12  ;;  %5128 = verf.f32 %v1837_v44  ;;  %v1841_v54 = vmul.f32 0.70710677, %v7050_v30 }
 0x309   : > { %2850 = vmatprep.mubr.f32.mxu0 %v2106_v52  ;;  %3280 = vmatprep.mubr.f32.mxu1 %v2106_v52  ;;  %v1842_v52 = vmul.f32 0.70710677, %v7044_v59  ;;  %v2025_v13 = vadd.f32 1.0, %v5117_v32  ;;  %v1725_v35 = vmul.f32 0.5, %v7002_v49  ;;  %v1845_v23 = vmul.f32 0.70710677, %v7062_v42 }
 0x30a   : > { %v2122_v43 = vmul.f32 %v2022_v46, %v1722_v33  ;;  %v5119_v36 = vpop.eup %5118  ;;  %v2126_v63 = vmul.f32 %v2026_v15, %v1726_v40  ;;  %v7074_v29 = vadd.f32 %v7428_v20, %v6798_v60  ;;  %v1730_v21 = vmul.f32 0.5, %v7008_v51  ;;  %v7433_v20 = vld [vmem:[#allocation46_spill] sm:$0xff] }
 0x30b   : > { %v5121_v28 = vpop.eup %5120  ;;  %5130 = verf.f32 %v1842_v52  ;;  %v2030_v24 = vadd.f32 1.0, %v5119_v36  ;;  %v7080_v49 = vadd.f32 %v6620_v0, %v6802_v56  ;;  %v2125_v2 = vmul.f32 %v2025_v13, %v1725_v35  ;;  %v7430_v36 = vld [vmem:[#allocation42_spill] sm:$0xff] }
 0x30c   : > { %2851 = vmatmul.mubr.f32.gmra.mrb[62].mxu0 %v2105_v11  ;;  %3281 = vmatmul.mubr.f32.gmra.mrb[62].mxu1 %v2105_v11  ;;  %v1846_v11 = vmul.f32 0.70710677, %v7056_v26  ;;  %5132 = verf.f32 %v1841_v54  ;;  %v2029_v53 = vadd.f32 1.0, %v5121_v28  ;;  %v1729_v37 = vmul.f32 0.5, %v7014_v48 }
 0x30d   : > { %2856 = vmatprep.mubr.f32.mxu0 %v2110_v17  ;;  %3286 = vmatprep.mubr.f32.mxu1 %v2110_v17  ;;  %v2121_v17 = vmul.f32 %v2021_v4, %v1721_v9  ;;  %v5123_v55 = vpop.eup %5122  ;;  %v2130_v57 = vmul.f32 %v2030_v24, %v1730_v21  ;;  %v1849_v51 = vmul.f32 0.70710677, %v7074_v29  ;;  %v7086_v34 = vadd.f32 %v7429_v47, %v6798_v60 }
 0x30e   : > { %v5125_v7 = vpop.eup %5124  ;;  %5134 = verf.f32 %v1846_v11  ;;  %v1734_v62 = vmul.f32 0.5, %v7020_v3  ;;  %v1854_v16 = vmul.f32 0.70710677, %v7080_v49  ;;  %v7092_v48 = vadd.f32 %v6639_v58, %v6802_v56 }
 0x30f   : > { %5136 = verf.f32 %v1845_v23  ;;  %v2033_v50 = vadd.f32 1.0, %v5125_v7  ;;  %v2129_v25 = vmul.f32 %v2029_v53, %v1729_v37  ;;  %v1733_v12 = vmul.f32 0.5, %v7026_v27 }
 0x310   : > { %2857 = vmatmul.mubr.f32.gmra.mrb[64].mxu0 %v2109_v6  ;;  %3287 = vmatmul.mubr.f32.gmra.mrb[64].mxu1 %v2109_v6  ;;  %v1850_v6 = vmul.f32 0.70710677, %v7068_v39  ;;  %v1853_v3 = vmul.f32 0.70710677, %v7086_v34  ;;  %v1738_v44 = vmul.f32 0.5, %v7032_v31  ;;  %v7099_v5 = vadd.f32 %v6634_v19, %v6798_v60 }
 0x311   : > { %2862 = vmatprep.mubr.f32.mxu0 %v2114_v45  ;;  %3292 = vmatprep.mubr.f32.mxu1 %v2114_v45  ;;  %v2034_v45 = vadd.f32 1.0, %v5123_v55  ;;  %v5127_v22 = vpop.eup %5126  ;;  %v1858_v4 = vmul.f32 0.70710677, %v7092_v48  ;;  %v7104_v27 = vadd.f32 %v6654_v18, %v6802_v56  ;;  %v2133_v33 = vmul.f32 %v2033_v50, %v1733_v12  ;;  %v7435_v50 = vld [vmem:[#allocation48_spill] sm:$0xff]  ;;  %v7436_v12 = vld [vmem:[#allocation47_spill] sm:$0xff] }
 0x312   : > { %v5129_v0 = vpop.eup %5128  ;;  %5138 = verf.f32 %v1850_v6  ;;  %v1737_v31 = vmul.f32 0.5, %v7038_v1  ;;  %v1742_v15 = vmul.f32 0.5, %v7044_v59  ;;  %v7111_v9 = vadd.f32 %v7430_v36, %v6798_v60 }
 0x313   : > { %v2134_v46 = vmul.f32 %v2034_v45, %v1734_v62  ;;  %5140 = verf.f32 %v1849_v51  ;;  %v2037_v41 = vadd.f32 1.0, %v5129_v0  ;;  %v1862_v54 = vmul.f32 0.70710677, %v7104_v27 }
 0x314   : > { %2863 = vmatmul.mubr.f32.gmra.mrb[66].mxu0 %v2113_v10  ;;  %3293 = vmatmul.mubr.f32.gmra.mrb[66].mxu1 %v2113_v10  ;;  %v2038_v10 = vadd.f32 1.0, %v5127_v22  ;;  %5142 = verf.f32 %v1854_v16  ;;  %v7116_v1 = vadd.f32 %v7431_v8, %v6802_v56  ;;  %v1741_v11 = vmul.f32 0.5, %v7050_v30  ;;  %v7434_v22 = vld [vmem:[#allocation45_spill] sm:$0xff] }
 0x315   : > { %2868 = vmatprep.mubr.f32.mxu0 %v2118_v14  ;;  %3298 = vmatprep.mubr.f32.mxu1 %v2118_v14  ;;  %v5131_v14 = vpop.eup %5130  ;;  %5144 = verf.f32 %v1853_v3  ;;  %v2137_v13 = vmul.f32 %v2037_v41, %v1737_v31  ;;  %v1746_v38 = vmul.f32 0.5, %v7056_v26  ;;  %v1861_v24 = vmul.f32 0.70710677, %v7111_v9 }
 0x316   : > { %v5133_v58 = vpop.eup %5132  ;;  %v2042_v32 = vadd.f32 1.0, %v5131_v14  ;;  %v2138_v52 = vmul.f32 %v2038_v10, %v1738_v44  ;;  %5146 = verf.f32 %v1858_v4  ;;  %v1866_v23 = vmul.f32 0.70710677, %v7116_v1  ;;  %v7437_v44 = vld [vmem:[#allocation50_spill] sm:$0xff] }
 0x317   : > { %v2041_v19 = vadd.f32 1.0, %v5133_v58  ;;  %v7128_v30 = vadd.f32 %v7433_v20, %v6802_v56  ;;  %v1745_v6 = vmul.f32 0.5, %v7062_v42  ;;  %v7135_v37 = vadd.f32 %v7434_v22, %v6798_v60 }
 0x318   : > { %2869 = vmatmul.mubr.f32.gmra.mrb[68].mxu0 %v2117_v61  ;;  %3299 = vmatmul.mubr.f32.gmra.mrb[68].mxu1 %v2117_v61  ;;  %v5135_v61 = vpop.eup %5134  ;;  %v2142_v59 = vmul.f32 %v2042_v32, %v1742_v15  ;;  %v7140_v42 = vadd.f32 %v7435_v50, %v6802_v56  ;;  %v1754_v10 = vmul.f32 0.5, %v7080_v49  ;;  %v7147_v3 = vadd.f32 %v7436_v12, %v6798_v60 }
 0x319   : > { %2874 = vmatprep.mubr.f32.mxu0 %v2122_v43  ;;  %3304 = vmatprep.mubr.f32.mxu1 %v2122_v43  ;;  %v1857_v43 = vmul.f32 0.70710677, %v7099_v5  ;;  %v5137_v18 = vpop.eup %5136  ;;  %v2046_v40 = vadd.f32 1.0, %v5135_v61  ;;  %v2141_v26 = vmul.f32 %v2041_v19, %v1741_v11  ;;  %v1870_v47 = vmul.f32 0.70710677, %v7128_v30  ;;  %v7438_v19 = vld [vmem:[#allocation49_spill] sm:$0xff] }
 0x31a   : > { %v1869_v14 = vmul.f32 0.70710677, %v7135_v37  ;;  %v1874_v41 = vmul.f32 0.70710677, %v7140_v42  ;;  %v7152_v58 = vadd.f32 %v7437_v44, %v6802_v56  ;;  %v1758_v61 = vmul.f32 0.5, %v7092_v48 }
 0x31b   : > { %5148 = verf.f32 %v1857_v43  ;;  %v2146_v21 = vmul.f32 %v2046_v40, %v1746_v38  ;;  %v1873_v31 = vmul.f32 0.70710677, %v7147_v3  ;;  %v7159_v15 = vadd.f32 %v7438_v19, %v6798_v60  ;;  %v2186_v19 = vld [vmem:[#allocation2 + $0x38] sm:$0xff] }
 0x31c   : > { %2875 = vmatmul.mubr.f32.gmra.mrb[70].mxu0 %v2121_v17  ;;  %3305 = vmatmul.mubr.f32.gmra.mrb[70].mxu1 %v2121_v17  ;;  %v5139_v28 = vpop.eup %5138  ;;  %v2045_v17 = vadd.f32 1.0, %v5137_v18  ;;  %5150 = verf.f32 %v1862_v54  ;;  %v1878_v43 = vmul.f32 0.70710677, %v7152_v58  ;;  %v1757_v48 = vmul.f32 0.5, %v7099_v5 }
 0x31d   : > { %2880 = vmatprep.mubr.f32.mxu0 %v2126_v63  ;;  %3310 = vmatprep.mubr.f32.mxu1 %v2126_v63  ;;  %v7432_v63 = vld [vmem:[#allocation43_spill] sm:$0xff]  ;;  %v5141_v35 = vpop.eup %5140  ;;  %v2050_v53 = vadd.f32 1.0, %v5139_v28  ;;  %5152 = verf.f32 %v1861_v24  ;;  %v1761_v24 = vmul.f32 0.5, %v7111_v9  ;;  %v1766_v5 = vmul.f32 0.5, %v7116_v1 }
 0x31e   : > { %v7123_v55 = vadd.f32 %v7432_v63, %v6798_v60  ;;  %v5143_v7 = vpop.eup %5142  ;;  %v2049_v45 = vadd.f32 1.0, %v5141_v35  ;;  %5154 = verf.f32 %v1866_v23  ;;  %v1877_v60 = vmul.f32 0.70710677, %v7159_v15 }
 0x31f   : > { %v5145_v51 = vpop.eup %5144  ;;  %v2054_v62 = vadd.f32 1.0, %v5143_v7  ;;  %v1774_v22 = vmul.f32 0.5, %v7140_v42  ;;  %v1777_v42 = vmul.f32 0.5, %v7159_v15 }
 0x320   : > { %2881 = vmatmul.mubr.f32.gmra.mrb[72].mxu0 %v2125_v2  ;;  %3311 = vmatmul.mubr.f32.gmra.mrb[72].mxu1 %v2125_v2  ;;  %v1750_v2 = vmul.f32 0.5, %v7068_v39  ;;  %v2145_v39 = vmul.f32 %v2045_v17, %v1745_v6  ;;  %v5147_v16 = vpop.eup %5146 }
 0x321   : > { %2886 = vmatprep.mubr.f32.mxu0 %v2130_v57  ;;  %3316 = vmatprep.mubr.f32.mxu1 %v2130_v57  ;;  %v1865_v57 = vmul.f32 0.70710677, %v7123_v55  ;;  %v2058_v4 = vadd.f32 1.0, %v5147_v16 }
 0x322   : > { %v2150_v0 = vmul.f32 %v2050_v53, %v1750_v2  ;;  %v1765_v53 = vmul.f32 0.5, %v7123_v55 }
 0x323   : > { %5156 = verf.f32 %v1865_v57  ;;  %v2158_v54 = vmul.f32 %v2058_v4, %v1758_v61  ;;  %v1769_v57 = vmul.f32 0.5, %v7135_v37  ;;  %v2184_v61 = vld [vmem:[#allocation2 + $0x28] sm:$0xff] }
 0x324   : > { %2887 = vmatmul.mubr.f32.gmra.mrb[74].mxu0 %v2129_v25  ;;  %3317 = vmatmul.mubr.f32.gmra.mrb[74].mxu1 %v2129_v25  ;;  %v1749_v25 = vmul.f32 0.5, %v7074_v29  ;;  %5158 = verf.f32 %v1870_v47 }
 0x325   : > { %2892 = vmatprep.mubr.f32.mxu0 %v2134_v46  ;;  %3322 = vmatprep.mubr.f32.mxu1 %v2134_v46  ;;  %v2053_v46 = vadd.f32 1.0, %v5145_v51  ;;  %v5149_v49 = vpop.eup %5148  ;;  %5160 = verf.f32 %v1869_v14  ;;  %v2180_v14 = vld [vmem:[#allocation2 + $0x8] sm:$0xff] }
 0x326   : > { %v2149_v29 = vmul.f32 %v2049_v45, %v1749_v25  ;;  %v5151_v32 = vpop.eup %5150  ;;  %v2057_v56 = vadd.f32 1.0, %v5149_v49  ;;  %5162 = verf.f32 %v1874_v41 }
 0x327   : > { %v5153_v18 = vpop.eup %5152  ;;  %5164 = verf.f32 %v1873_v31 }
 0x328   : > { %2893 = vmatmul.mubr.f32.gmra.mrb[76].mxu0 %v2133_v33  ;;  %3323 = vmatmul.mubr.f32.gmra.mrb[76].mxu1 %v2133_v33  ;;  %v2154_v33 = vmul.f32 %v2054_v62, %v1754_v10  ;;  %v5155_v8 = vpop.eup %5154  ;;  %v2061_v40 = vadd.f32 1.0, %v5153_v18  ;;  %5166 = verf.f32 %v1878_v43  ;;  %v1778_v62 = vmul.f32 0.5, %v7152_v58  ;;  %v2179_v10 = vld [vmem:[#allocation2] sm:$0xff] }
 0x329   : > { %2898 = vmatprep.mubr.f32.mxu0 %v2138_v52  ;;  %3328 = vmatprep.mubr.f32.mxu1 %v2138_v52  ;;  %v1753_v52 = vmul.f32 0.5, %v7086_v34  ;;  %v2062_v34 = vadd.f32 1.0, %v5151_v32  ;;  %v2066_v11 = vadd.f32 1.0, %v5155_v8  ;;  %5168 = verf.f32 %v1877_v60 }
 0x32a   : > { %v2161_v63 = vmul.f32 %v2061_v40, %v1761_v24  ;;  %v2190_v40 = vld [vmem:[#allocation2 + $0x58] sm:$0xff] }
 0x32b   : > { %v2153_v36 = vmul.f32 %v2053_v46, %v1753_v52  ;;  %v2166_v20 = vmul.f32 %v2066_v11, %v1766_v5  ;;  %v2181_v46 = vld [vmem:[#allocation2 + $0x10] sm:$0xff]  ;;  %v2191_v5 = vld [vmem:[#allocation2 + $0x60] sm:$0xff] }
 0x32c   : > { %2899 = vmatmul.mubr.f32.gmra.mrb[78].mxu0 %v2137_v13  ;;  %3329 = vmatmul.mubr.f32.gmra.mrb[78].mxu1 %v2137_v13  ;;  %v1762_v13 = vmul.f32 0.5, %v7104_v27  ;;  %v2185_v52 = vld [vmem:[#allocation2 + $0x30] sm:$0xff] }
 0x32d   : > { %2904 = vmatprep.mubr.f32.mxu0 %v2142_v59  ;;  %3334 = vmatprep.mubr.f32.mxu1 %v2142_v59  ;;  %v2157_v59 = vmul.f32 %v2057_v56, %v1757_v48  ;;  %v5157_v28 = vpop.eup %5156  ;;  %v2189_v48 = vld [vmem:[#allocation2 + $0x50] sm:$0xff] }
 0x32e   : > { %v2162_v38 = vmul.f32 %v2062_v34, %v1762_v13  ;;  %v5159_v17 = vpop.eup %5158  ;;  %v2065_v27 = vadd.f32 1.0, %v5157_v28  ;;  %v2188_v13 = vld [vmem:[#allocation2 + $0x48] sm:$0xff] }
 0x32f   : > { %v5161_v35 = vpop.eup %5160  ;;  %v2070_v23 = vadd.f32 1.0, %v5159_v17 }
 0x330   : > { %2905 = vmatmul.mubr.f32.gmra.mrb[80].mxu0 %v2141_v26  ;;  %3335 = vmatmul.mubr.f32.gmra.mrb[80].mxu1 %v2141_v26  ;;  %v5163_v26 = vpop.eup %5162  ;;  %v2069_v9 = vadd.f32 1.0, %v5161_v35  ;;  %v2165_v1 = vmul.f32 %v2065_v27, %v1765_v53  ;;  %v2192_v35 = vld [vmem:[#allocation2 + $0x68] sm:$0xff] }
 0x331   : > { %2910 = vmatprep.mubr.f32.mxu0 %v2146_v21  ;;  %3340 = vmatprep.mubr.f32.mxu1 %v2146_v21  ;;  %v1770_v21 = vmul.f32 0.5, %v7128_v30  ;;  %v5165_v7 = vpop.eup %5164  ;;  %v2074_v6 = vadd.f32 1.0, %v5163_v26 }
 0x332   : > { %v5167_v45 = vpop.eup %5166  ;;  %v2073_v55 = vadd.f32 1.0, %v5165_v7  ;;  %v2169_v51 = vmul.f32 %v2069_v9, %v1769_v57  ;;  %v2196_v57 = vld [vmem:[#allocation2 + $0x88] sm:$0xff] }
 0x333   : > { %v2170_v2 = vmul.f32 %v2070_v23, %v1770_v21  ;;  %v5169_v30 = vpop.eup %5168  ;;  %v2078_v47 = vadd.f32 1.0, %v5167_v45  ;;  %v2174_v50 = vmul.f32 %v2074_v6, %v1774_v22  ;;  %v2195_v6 = vld [vmem:[#allocation2 + $0x80] sm:$0xff]  ;;  %v2197_v45 = vld [vmem:[#allocation2 + $0x90] sm:$0xff] }
 0x334   : > { %2911 = vmatmul.mubr.f32.gmra.mrb[82].mxu0 %v2145_v39  ;;  %3341 = vmatmul.mubr.f32.gmra.mrb[82].mxu1 %v2145_v39  ;;  %v1773_v39 = vmul.f32 0.5, %v7147_v3  ;;  %v2182_v3 = vld [vmem:[#allocation2 + $0x18] sm:$0xff] }
 0x335   : > { %2916 = vmatprep.mubr.f32.mxu0 %v2150_v0  ;;  %3346 = vmatprep.mubr.f32.mxu1 %v2150_v0  ;;  %v2077_v0 = vadd.f32 1.0, %v5169_v30  ;;  %v2178_v16 = vmul.f32 %v2078_v47, %v1778_v62 }
 0x336   : > { %v2173_v37 = vmul.f32 %v2073_v55, %v1773_v39  ;;  %v2198_v55 = vld [vmem:[#allocation2 + $0x98] sm:$0xff] }
 0x337   : > { %v2177_v25 = vmul.f32 %v2077_v0, %v1777_v42  ;;  %v2199_v0 = vld [vmem:[#allocation2 + $0xa0] sm:$0xff]  ;;  %v2200_v42 = vld [vmem:[#allocation2 + $0xa8] sm:$0xff] }
 0x338   : > { %2917 = vmatmul.mubr.f32.gmra.mrb[84].mxu0 %v2149_v29  ;;  %3347 = vmatmul.mubr.f32.gmra.mrb[84].mxu1 %v2149_v29 }
 0x339   : > { %2922 = vmatprep.mubr.f32.mxu0 %v2154_v33  ;;  %3352 = vmatprep.mubr.f32.mxu1 %v2154_v33  ;;  %v2183_v33 = vld [vmem:[#allocation2 + $0x20] sm:$0xff] }
 0x33c   : > { %2923 = vmatmul.mubr.f32.gmra.mrb[86].mxu0 %v2153_v36  ;;  %3353 = vmatmul.mubr.f32.gmra.mrb[86].mxu1 %v2153_v36 }
 0x33d   : > { %2928 = vmatprep.mubr.f32.mxu0 %v2158_v54  ;;  %3358 = vmatprep.mubr.f32.mxu1 %v2158_v54  ;;  %v2187_v54 = vld [vmem:[#allocation2 + $0x40] sm:$0xff] }
 0x340   : > { %2929 = vmatmul.mubr.f32.gmra.mrb[88].mxu0 %v2157_v59  ;;  %3359 = vmatmul.mubr.f32.gmra.mrb[88].mxu1 %v2157_v59 }
 0x341   : > { %2934 = vmatprep.mubr.f32.mxu0 %v2162_v38  ;;  %3364 = vmatprep.mubr.f32.mxu1 %v2162_v38 }
 0x344   : > { %2935 = vmatmul.mubr.f32.gmra.mrb[90].mxu0 %v2161_v63  ;;  %3365 = vmatmul.mubr.f32.gmra.mrb[90].mxu1 %v2161_v63  ;;  %v2193_v63 = vld [vmem:[#allocation2 + $0x70] sm:$0xff] }
 0x345   : > { %2940 = vmatprep.mubr.f32.mxu0 %v2166_v20  ;;  %3370 = vmatprep.mubr.f32.mxu1 %v2166_v20  ;;  %v2194_v20 = vld [vmem:[#allocation2 + $0x78] sm:$0xff] }
 0x348   : > { %2941 = vmatmul.mubr.f32.gmra.mrb[92].mxu0 %v2165_v1  ;;  %3371 = vmatmul.mubr.f32.gmra.mrb[92].mxu1 %v2165_v1 }
 0x349   : > { %2946 = vmatprep.mubr.f32.mxu0 %v2170_v2  ;;  %3376 = vmatprep.mubr.f32.mxu1 %v2170_v2 }
 0x34c   : > { %2947 = vmatmul.mubr.f32.gmra.mrb[94].mxu0 %v2169_v51  ;;  %3377 = vmatmul.mubr.f32.gmra.mrb[94].mxu1 %v2169_v51 }
 0x34d   : > { %2952 = vmatprep.mubr.f32.mxu0 %v2174_v50  ;;  %3382 = vmatprep.mubr.f32.mxu1 %v2174_v50 }
 0x350   : > { %2953 = vmatmul.mubr.f32.gmra.mrb[96].mxu0 %v2173_v37  ;;  %3383 = vmatmul.mubr.f32.gmra.mrb[96].mxu1 %v2173_v37 }
 0x351   : > { %2958 = vmatprep.mubr.f32.mxu0 %v2178_v16  ;;  %3388 = vmatprep.mubr.f32.mxu1 %v2178_v16  ;;  %v2201_v16 = vld [vmem:[#allocation2 + $0xb0] sm:$0xff] }
 0x354   : > { %2959 = vmatmul.mubr.f32.gmra.mrb[98].mxu0 %v2177_v25  ;;  %3389 = vmatmul.mubr.f32.gmra.mrb[98].mxu1 %v2177_v25 }
 0x3c7   : > { %v2816_v12 = vpop.f32.mrb[50].mxu0  ;;  %v3246_v44 = vpop.f32.mrb[50].mxu1 }
 0x3c8   : > { %v3395_v41 = vadd.f32 %v2816_v12, %v2179_v10  ;;  %v2818_v58 = vpop.f32.mrb[51].mxu0  ;;  %v3397_v29 = vadd.f32 %v3246_v44, %v2181_v46  ;;  %v3248_v4 = vpop.f32.mrb[51].mxu1  ;;  %v2202_v10 = vld [vmem:[#allocation2 + $0xb8] sm:$0xff] }
 0x3c9   : > { %v3396_v49 = vadd.f32 %v2818_v58, %v2180_v14  ;;  %v3398_v32 = vadd.f32 %v3248_v4, %v2182_v3  ;;  %v2203_v58 = vld [vmem:[#allocation2 + $0xc0] sm:$0xff]  ;;  %v2204_v4 = vld [vmem:[#allocation2 + $0xc8] sm:$0xff] }
 0x3ca   : > { %3495 = vst [vmem:[#allocation2] sm:$0xff] %v3395_v41  ;;  %3497 = vst [vmem:[#allocation2 + $0x10] sm:$0xff] %v3397_v29 }
 0x3cb   : > { %3496 = vst [vmem:[#allocation2 + $0x8] sm:$0xff] %v3396_v49  ;;  %v2822_v31 = vpop.f32.mrb[52].mxu0  ;;  %3498 = vst [vmem:[#allocation2 + $0x18] sm:$0xff] %v3398_v32  ;;  %v3252_v56 = vpop.f32.mrb[52].mxu1  ;;  %v2205_v49 = vld [vmem:[#allocation2 + $0xd0] sm:$0xff]  ;;  %v2206_v32 = vld [vmem:[#allocation2 + $0xd8] sm:$0xff] }
 0x3cc   : > { %v3399_v15 = vadd.f32 %v2822_v31, %v2183_v33  ;;  %v2824_v43 = vpop.f32.mrb[53].mxu0  ;;  %v3401_v36 = vadd.f32 %v3252_v56, %v2185_v52  ;;  %v3254_v34 = vpop.f32.mrb[53].mxu1 }
 0x3cd   : > { %v3400_v18 = vadd.f32 %v2824_v43, %v2184_v61  ;;  %v3402_v8 = vadd.f32 %v3254_v34, %v2186_v19  ;;  %v2207_v43 = vld [vmem:[#allocation2 + $0xe0] sm:$0xff]  ;;  %v2208_v34 = vld [vmem:[#allocation2 + $0xe8] sm:$0xff] }
 0x3ce   : > { %3499 = vst [vmem:[#allocation2 + $0x20] sm:$0xff] %v3399_v15  ;;  %3501 = vst [vmem:[#allocation2 + $0x30] sm:$0xff] %v3401_v36 }
 0x3cf   : > { %3500 = vst [vmem:[#allocation2 + $0x28] sm:$0xff] %v3400_v18  ;;  %v2828_v60 = vpop.f32.mrb[54].mxu0  ;;  %3502 = vst [vmem:[#allocation2 + $0x38] sm:$0xff] %v3402_v8  ;;  %v3258_v28 = vpop.f32.mrb[54].mxu1  ;;  %v2209_v18 = vld [vmem:[#allocation2 + $0xf0] sm:$0xff]  ;;  %v2210_v8 = vld [vmem:[#allocation2 + $0xf8] sm:$0xff] }
 0x3d0   : > { %v3403_v59 = vadd.f32 %v2828_v60, %v2187_v54  ;;  %v2830_v11 = vpop.f32.mrb[55].mxu0  ;;  %v3405_v38 = vadd.f32 %v3258_v28, %v2189_v48  ;;  %v3260_v24 = vpop.f32.mrb[55].mxu1 }
 0x3d1   : > { %v3404_v17 = vadd.f32 %v2830_v11, %v2188_v13  ;;  %v3406_v27 = vadd.f32 %v3260_v24, %v2190_v40  ;;  %v2211_v11 = vld [vmem:[#allocation2 + $0x100] sm:$0xff]  ;;  %v2212_v24 = vld [vmem:[#allocation2 + $0x108] sm:$0xff] }
 0x3d2   : > { %3503 = vst [vmem:[#allocation2 + $0x40] sm:$0xff] %v3403_v59  ;;  %3505 = vst [vmem:[#allocation2 + $0x50] sm:$0xff] %v3405_v38 }
 0x3d3   : > { %3504 = vst [vmem:[#allocation2 + $0x48] sm:$0xff] %v3404_v17  ;;  %v2834_v23 = vpop.f32.mrb[56].mxu0  ;;  %3506 = vst [vmem:[#allocation2 + $0x58] sm:$0xff] %v3406_v27  ;;  %v3264_v53 = vpop.f32.mrb[56].mxu1  ;;  %v2213_v17 = vld [vmem:[#allocation2 + $0x110] sm:$0xff]  ;;  %v2214_v27 = vld [vmem:[#allocation2 + $0x118] sm:$0xff] }
 0x3d4   : > { %v3407_v26 = vadd.f32 %v2834_v23, %v2191_v5  ;;  %v2836_v21 = vpop.f32.mrb[57].mxu0  ;;  %v3409_v9 = vadd.f32 %v3264_v53, %v2193_v63  ;;  %v3266_v7 = vpop.f32.mrb[57].mxu1 }
 0x3d5   : > { %v3408_v1 = vadd.f32 %v2836_v21, %v2192_v35  ;;  %v3410_v2 = vadd.f32 %v3266_v7, %v2194_v20  ;;  %v2215_v21 = vld [vmem:[#allocation2 + $0x120] sm:$0xff]  ;;  %v2216_v7 = vld [vmem:[#allocation2 + $0x128] sm:$0xff] }
 0x3d6   : > { %3507 = vst [vmem:[#allocation2 + $0x60] sm:$0xff] %v3407_v26  ;;  %3509 = vst [vmem:[#allocation2 + $0x70] sm:$0xff] %v3409_v9 }
 0x3d7   : > { %3508 = vst [vmem:[#allocation2 + $0x68] sm:$0xff] %v3408_v1  ;;  %v2840_v22 = vpop.f32.mrb[58].mxu0  ;;  %3510 = vst [vmem:[#allocation2 + $0x78] sm:$0xff] %v3410_v2  ;;  %v3270_v30 = vpop.f32.mrb[58].mxu1  ;;  %v2217_v1 = vld [vmem:[#allocation2 + $0x130] sm:$0xff]  ;;  %v2218_v2 = vld [vmem:[#allocation2 + $0x138] sm:$0xff] }
 0x3d8   : > { %v3411_v51 = vadd.f32 %v2840_v22, %v2195_v6  ;;  %v2842_v47 = vpop.f32.mrb[59].mxu0  ;;  %v3413_v50 = vadd.f32 %v3270_v30, %v2197_v45  ;;  %v3272_v62 = vpop.f32.mrb[59].mxu1 }
 0x3d9   : > { %v3412_v39 = vadd.f32 %v2842_v47, %v2196_v57  ;;  %v3414_v37 = vadd.f32 %v3272_v62, %v2198_v55  ;;  %v2219_v47 = vld [vmem:[#allocation2 + $0x140] sm:$0xff]  ;;  %v2220_v62 = vld [vmem:[#allocation2 + $0x148] sm:$0xff] }
 0x3da   : > { %3511 = vst [vmem:[#allocation2 + $0x80] sm:$0xff] %v3411_v51  ;;  %3513 = vst [vmem:[#allocation2 + $0x90] sm:$0xff] %v3413_v50 }
 0x3db   : > { %3512 = vst [vmem:[#allocation2 + $0x88] sm:$0xff] %v3412_v39  ;;  %v2846_v25 = vpop.f32.mrb[60].mxu0  ;;  %3514 = vst [vmem:[#allocation2 + $0x98] sm:$0xff] %v3414_v37  ;;  %v3276_v14 = vpop.f32.mrb[60].mxu1  ;;  %v2221_v39 = vld [vmem:[#allocation2 + $0x150] sm:$0xff]  ;;  %v2222_v37 = vld [vmem:[#allocation2 + $0x158] sm:$0xff] }
 0x3dc   : > { %v3415_v46 = vadd.f32 %v2846_v25, %v2199_v0  ;;  %v2848_v12 = vpop.f32.mrb[61].mxu0  ;;  %v3417_v3 = vadd.f32 %v3276_v14, %v2201_v16  ;;  %v3278_v44 = vpop.f32.mrb[61].mxu1 }
 0x3dd   : > { %v3416_v41 = vadd.f32 %v2848_v12, %v2200_v42  ;;  %v3418_v29 = vadd.f32 %v3278_v44, %v2202_v10  ;;  %v2223_v12 = vld [vmem:[#allocation2 + $0x160] sm:$0xff]  ;;  %v2224_v44 = vld [vmem:[#allocation2 + $0x168] sm:$0xff] }
 0x3de   : > { %3515 = vst [vmem:[#allocation2 + $0xa0] sm:$0xff] %v3415_v46  ;;  %3517 = vst [vmem:[#allocation2 + $0xb0] sm:$0xff] %v3417_v3 }
 0x3df   : > { %3516 = vst [vmem:[#allocation2 + $0xa8] sm:$0xff] %v3416_v41  ;;  %v2852_v33 = vpop.f32.mrb[62].mxu0  ;;  %3518 = vst [vmem:[#allocation2 + $0xb8] sm:$0xff] %v3418_v29  ;;  %v3282_v61 = vpop.f32.mrb[62].mxu1  ;;  %v2225_v41 = vld [vmem:[#allocation2 + $0x170] sm:$0xff]  ;;  %v2226_v29 = vld [vmem:[#allocation2 + $0x178] sm:$0xff] }
 0x3e0   : > { %v3419_v52 = vadd.f32 %v2852_v33, %v2203_v58  ;;  %v2854_v31 = vpop.f32.mrb[63].mxu0  ;;  %v3421_v19 = vadd.f32 %v3282_v61, %v2205_v49  ;;  %v3284_v56 = vpop.f32.mrb[63].mxu1 }
 0x3e1   : > { %v3420_v15 = vadd.f32 %v2854_v31, %v2204_v4  ;;  %v3422_v36 = vadd.f32 %v3284_v56, %v2206_v32  ;;  %v2227_v31 = vld [vmem:[#allocation2 + $0x180] sm:$0xff]  ;;  %v2228_v56 = vld [vmem:[#allocation2 + $0x188] sm:$0xff] }
 0x3e2   : > { %3519 = vst [vmem:[#allocation2 + $0xc0] sm:$0xff] %v3419_v52  ;;  %3521 = vst [vmem:[#allocation2 + $0xd0] sm:$0xff] %v3421_v19 }
 0x3e3   : > { %3520 = vst [vmem:[#allocation2 + $0xc8] sm:$0xff] %v3420_v15  ;;  %v2858_v54 = vpop.f32.mrb[64].mxu0  ;;  %3522 = vst [vmem:[#allocation2 + $0xd8] sm:$0xff] %v3422_v36  ;;  %v3288_v13 = vpop.f32.mrb[64].mxu1  ;;  %v2229_v15 = vld [vmem:[#allocation2 + $0x190] sm:$0xff]  ;;  %v2230_v36 = vld [vmem:[#allocation2 + $0x198] sm:$0xff] }
 0x3e4   : > { %v3423_v48 = vadd.f32 %v2858_v54, %v2207_v43  ;;  %v2860_v60 = vpop.f32.mrb[65].mxu0  ;;  %v3425_v40 = vadd.f32 %v3288_v13, %v2209_v18  ;;  %v3290_v28 = vpop.f32.mrb[65].mxu1 }
 0x3e5   : > { %v3424_v59 = vadd.f32 %v2860_v60, %v2208_v34  ;;  %v3426_v38 = vadd.f32 %v3290_v28, %v2210_v8  ;;  %v2231_v60 = vld [vmem:[#allocation2 + $0x1a0] sm:$0xff]  ;;  %v2232_v28 = vld [vmem:[#allocation2 + $0x1a8] sm:$0xff] }
 0x3e6   : > { %3523 = vst [vmem:[#allocation2 + $0xe0] sm:$0xff] %v3423_v48  ;;  %3525 = vst [vmem:[#allocation2 + $0xf0] sm:$0xff] %v3425_v40 }
 0x3e7   : > { %3524 = vst [vmem:[#allocation2 + $0xe8] sm:$0xff] %v3424_v59  ;;  %v2864_v5 = vpop.f32.mrb[66].mxu0  ;;  %3526 = vst [vmem:[#allocation2 + $0xf8] sm:$0xff] %v3426_v38  ;;  %v3294_v35 = vpop.f32.mrb[66].mxu1  ;;  %v2233_v59 = vld [vmem:[#allocation2 + $0x1b0] sm:$0xff]  ;;  %v2234_v38 = vld [vmem:[#allocation2 + $0x1b8] sm:$0xff] }
 0x3e8   : > { %v3427_v63 = vadd.f32 %v2864_v5, %v2211_v11  ;;  %v2866_v23 = vpop.f32.mrb[67].mxu0  ;;  %v3429_v20 = vadd.f32 %v3294_v35, %v2213_v17  ;;  %v3296_v53 = vpop.f32.mrb[67].mxu1 }
 0x3e9   : > { %v3428_v26 = vadd.f32 %v2866_v23, %v2212_v24  ;;  %v3430_v9 = vadd.f32 %v3296_v53, %v2214_v27  ;;  %v2235_v23 = vld [vmem:[#allocation2 + $0x1c0] sm:$0xff]  ;;  %v2236_v53 = vld [vmem:[#allocation2 + $0x1c8] sm:$0xff] }
 0x3ea   : > { %3527 = vst [vmem:[#allocation2 + $0x100] sm:$0xff] %v3427_v63  ;;  %3529 = vst [vmem:[#allocation2 + $0x110] sm:$0xff] %v3429_v20 }
 0x3eb   : > { %3528 = vst [vmem:[#allocation2 + $0x108] sm:$0xff] %v3428_v26  ;;  %v2870_v6 = vpop.f32.mrb[68].mxu0  ;;  %3530 = vst [vmem:[#allocation2 + $0x118] sm:$0xff] %v3430_v9  ;;  %v3300_v57 = vpop.f32.mrb[68].mxu1  ;;  %v2237_v26 = vld [vmem:[#allocation2 + $0x1d0] sm:$0xff]  ;;  %v2238_v9 = vld [vmem:[#allocation2 + $0x1d8] sm:$0xff] }
 0x3ec   : > { %v3431_v45 = vadd.f32 %v2870_v6, %v2215_v21  ;;  %v2872_v22 = vpop.f32.mrb[69].mxu0  ;;  %v3433_v55 = vadd.f32 %v3300_v57, %v2217_v1  ;;  %v3302_v30 = vpop.f32.mrb[69].mxu1 }
 0x3ed   : > { %v3432_v51 = vadd.f32 %v2872_v22, %v2216_v7  ;;  %v3434_v50 = vadd.f32 %v3302_v30, %v2218_v2  ;;  %v2239_v22 = vld [vmem:[#allocation2 + $0x1e0] sm:$0xff]  ;;  %v2240_v30 = vld [vmem:[#allocation2 + $0x1e8] sm:$0xff] }
 0x3ee   : > { %3531 = vst [vmem:[#allocation2 + $0x120] sm:$0xff] %v3431_v45  ;;  %3533 = vst [vmem:[#allocation2 + $0x130] sm:$0xff] %v3433_v55 }
 0x3ef   : > { %3532 = vst [vmem:[#allocation2 + $0x128] sm:$0xff] %v3432_v51  ;;  %v2876_v0 = vpop.f32.mrb[70].mxu0  ;;  %3534 = vst [vmem:[#allocation2 + $0x138] sm:$0xff] %v3434_v50  ;;  %v3306_v42 = vpop.f32.mrb[70].mxu1  ;;  %v2241_v51 = vld [vmem:[#allocation2 + $0x1f0] sm:$0xff]  ;;  %v2242_v50 = vld [vmem:[#allocation2 + $0x1f8] sm:$0xff] }
 0x3f0   : > { %v3435_v16 = vadd.f32 %v2876_v0, %v2219_v47  ;;  %v2878_v25 = vpop.f32.mrb[71].mxu0  ;;  %v3437_v10 = vadd.f32 %v3306_v42, %v2221_v39  ;;  %v3308_v14 = vpop.f32.mrb[71].mxu1 }
 0x3f1   : > { %v3436_v46 = vadd.f32 %v2878_v25, %v2220_v62  ;;  %v3438_v3 = vadd.f32 %v3308_v14, %v2222_v37  ;;  %v2243_v25 = vld [vmem:[#allocation2 + $0x200] sm:$0xff]  ;;  %v2244_v14 = vld [vmem:[#allocation2 + $0x208] sm:$0xff] }
 0x3f2   : > { %3535 = vst [vmem:[#allocation2 + $0x140] sm:$0xff] %v3435_v16  ;;  %3537 = vst [vmem:[#allocation2 + $0x150] sm:$0xff] %v3437_v10 }
 0x3f3   : > { %3536 = vst [vmem:[#allocation2 + $0x148] sm:$0xff] %v3436_v46  ;;  %v2882_v58 = vpop.f32.mrb[72].mxu0  ;;  %3538 = vst [vmem:[#allocation2 + $0x158] sm:$0xff] %v3438_v3  ;;  %v3312_v4 = vpop.f32.mrb[72].mxu1  ;;  %v2245_v46 = vld [vmem:[#allocation2 + $0x210] sm:$0xff]  ;;  %v2246_v3 = vld [vmem:[#allocation2 + $0x218] sm:$0xff] }
 0x3f4   : > { %v3439_v49 = vadd.f32 %v2882_v58, %v2223_v12  ;;  %v2884_v33 = vpop.f32.mrb[73].mxu0  ;;  %v3441_v32 = vadd.f32 %v3312_v4, %v2225_v41  ;;  %v3314_v61 = vpop.f32.mrb[73].mxu1 }
 0x3f5   : > { %v3440_v52 = vadd.f32 %v2884_v33, %v2224_v44  ;;  %v3442_v19 = vadd.f32 %v3314_v61, %v2226_v29  ;;  %v2247_v33 = vld [vmem:[#allocation2 + $0x220] sm:$0xff]  ;;  %v2248_v61 = vld [vmem:[#allocation2 + $0x228] sm:$0xff] }
 0x3f6   : > { %3539 = vst [vmem:[#allocation2 + $0x160] sm:$0xff] %v3439_v49  ;;  %3541 = vst [vmem:[#allocation2 + $0x170] sm:$0xff] %v3441_v32 }
 0x3f7   : > { %3540 = vst [vmem:[#allocation2 + $0x168] sm:$0xff] %v3440_v52  ;;  %v2888_v43 = vpop.f32.mrb[74].mxu0  ;;  %3542 = vst [vmem:[#allocation2 + $0x178] sm:$0xff] %v3442_v19  ;;  %v3318_v34 = vpop.f32.mrb[74].mxu1  ;;  %v2249_v52 = vld [vmem:[#allocation2 + $0x230] sm:$0xff]  ;;  %v2250_v19 = vld [vmem:[#allocation2 + $0x238] sm:$0xff] }
 0x3f8   : > { %v3443_v18 = vadd.f32 %v2888_v43, %v2227_v31  ;;  %v2890_v54 = vpop.f32.mrb[75].mxu0  ;;  %v3445_v8 = vadd.f32 %v3318_v34, %v2229_v15  ;;  %v3320_v13 = vpop.f32.mrb[75].mxu1 }
 0x3f9   : > { %v3444_v48 = vadd.f32 %v2890_v54, %v2228_v56  ;;  %v3446_v40 = vadd.f32 %v3320_v13, %v2230_v36  ;;  %v2251_v54 = vld [vmem:[#allocation2 + $0x240] sm:$0xff]  ;;  %v2252_v13 = vld [vmem:[#allocation2 + $0x248] sm:$0xff] }
 0x3fa   : > { %3543 = vst [vmem:[#allocation2 + $0x180] sm:$0xff] %v3443_v18  ;;  %3545 = vst [vmem:[#allocation2 + $0x190] sm:$0xff] %v3445_v8 }
 0x3fb   : > { %3544 = vst [vmem:[#allocation2 + $0x188] sm:$0xff] %v3444_v48  ;;  %v2894_v11 = vpop.f32.mrb[76].mxu0  ;;  %3546 = vst [vmem:[#allocation2 + $0x198] sm:$0xff] %v3446_v40  ;;  %v3324_v24 = vpop.f32.mrb[76].mxu1  ;;  %v2253_v48 = vld [vmem:[#allocation2 + $0x250] sm:$0xff]  ;;  %v2254_v40 = vld [vmem:[#allocation2 + $0x258] sm:$0xff] }
 0x3fc   : > { %v3447_v17 = vadd.f32 %v2894_v11, %v2231_v60  ;;  %v2896_v5 = vpop.f32.mrb[77].mxu0  ;;  %v3449_v27 = vadd.f32 %v3324_v24, %v2233_v59  ;;  %v3326_v35 = vpop.f32.mrb[77].mxu1 }
 0x3fd   : > { %v3448_v63 = vadd.f32 %v2896_v5, %v2232_v28  ;;  %v3450_v20 = vadd.f32 %v3326_v35, %v2234_v38  ;;  %v2255_v5 = vld [vmem:[#allocation2 + $0x260] sm:$0xff]  ;;  %v2256_v35 = vld [vmem:[#allocation2 + $0x268] sm:$0xff] }
 0x3fe   : > { %3547 = vst [vmem:[#allocation2 + $0x1a0] sm:$0xff] %v3447_v17  ;;  %3549 = vst [vmem:[#allocation2 + $0x1b0] sm:$0xff] %v3449_v27 }
 0x3ff   : > { %3548 = vst [vmem:[#allocation2 + $0x1a8] sm:$0xff] %v3448_v63  ;;  %v2900_v21 = vpop.f32.mrb[78].mxu0  ;;  %3550 = vst [vmem:[#allocation2 + $0x1b8] sm:$0xff] %v3450_v20  ;;  %v3330_v7 = vpop.f32.mrb[78].mxu1  ;;  %v2257_v63 = vld [vmem:[#allocation2 + $0x270] sm:$0xff]  ;;  %v2258_v20 = vld [vmem:[#allocation2 + $0x278] sm:$0xff] }
 0x400   : > { %v3451_v1 = vadd.f32 %v2900_v21, %v2235_v23  ;;  %v2902_v6 = vpop.f32.mrb[79].mxu0  ;;  %v3453_v2 = vadd.f32 %v3330_v7, %v2237_v26  ;;  %v3332_v57 = vpop.f32.mrb[79].mxu1 }
 0x401   : > { %v3452_v45 = vadd.f32 %v2902_v6, %v2236_v53  ;;  %v3454_v55 = vadd.f32 %v3332_v57, %v2238_v9  ;;  %v2259_v6 = vld [vmem:[#allocation2 + $0x280] sm:$0xff]  ;;  %v2260_v57 = vld [vmem:[#allocation2 + $0x288] sm:$0xff] }
 0x402   : > { %3551 = vst [vmem:[#allocation2 + $0x1c0] sm:$0xff] %v3451_v1  ;;  %3553 = vst [vmem:[#allocation2 + $0x1d0] sm:$0xff] %v3453_v2 }
 0x403   : > { %3552 = vst [vmem:[#allocation2 + $0x1c8] sm:$0xff] %v3452_v45  ;;  %v2906_v47 = vpop.f32.mrb[80].mxu0  ;;  %3554 = vst [vmem:[#allocation2 + $0x1d8] sm:$0xff] %v3454_v55  ;;  %v3336_v62 = vpop.f32.mrb[80].mxu1  ;;  %v2261_v45 = vld [vmem:[#allocation2 + $0x290] sm:$0xff]  ;;  %v2262_v55 = vld [vmem:[#allocation2 + $0x298] sm:$0xff] }
 0x404   : > { %v3455_v39 = vadd.f32 %v2906_v47, %v2239_v22  ;;  %v2908_v0 = vpop.f32.mrb[81].mxu0  ;;  %v3457_v37 = vadd.f32 %v3336_v62, %v2241_v51  ;;  %v3338_v42 = vpop.f32.mrb[81].mxu1 }
 0x405   : > { %v3456_v16 = vadd.f32 %v2908_v0, %v2240_v30  ;;  %v3458_v10 = vadd.f32 %v3338_v42, %v2242_v50  ;;  %v2263_v0 = vld [vmem:[#allocation2 + $0x2a0] sm:$0xff]  ;;  %v2264_v42 = vld [vmem:[#allocation2 + $0x2a8] sm:$0xff] }
 0x406   : > { %3555 = vst [vmem:[#allocation2 + $0x1e0] sm:$0xff] %v3455_v39  ;;  %3557 = vst [vmem:[#allocation2 + $0x1f0] sm:$0xff] %v3457_v37 }
 0x407   : > { %3556 = vst [vmem:[#allocation2 + $0x1e8] sm:$0xff] %v3456_v16  ;;  %v2912_v12 = vpop.f32.mrb[82].mxu0  ;;  %3558 = vst [vmem:[#allocation2 + $0x1f8] sm:$0xff] %v3458_v10  ;;  %v3342_v44 = vpop.f32.mrb[82].mxu1  ;;  %v2265_v16 = vld [vmem:[#allocation2 + $0x2b0] sm:$0xff]  ;;  %v2266_v10 = vld [vmem:[#allocation2 + $0x2b8] sm:$0xff] }
 0x408   : > { %v3459_v41 = vadd.f32 %v2912_v12, %v2243_v25  ;;  %v2914_v58 = vpop.f32.mrb[83].mxu0  ;;  %v3461_v29 = vadd.f32 %v3342_v44, %v2245_v46  ;;  %v3344_v4 = vpop.f32.mrb[83].mxu1 }
 0x409   : > { %v3460_v49 = vadd.f32 %v2914_v58, %v2244_v14  ;;  %v3462_v32 = vadd.f32 %v3344_v4, %v2246_v3  ;;  %v2267_v58 = vld [vmem:[#allocation2 + $0x2c0] sm:$0xff]  ;;  %v2268_v4 = vld [vmem:[#allocation2 + $0x2c8] sm:$0xff] }
 0x40a   : > { %3559 = vst [vmem:[#allocation2 + $0x200] sm:$0xff] %v3459_v41  ;;  %3561 = vst [vmem:[#allocation2 + $0x210] sm:$0xff] %v3461_v29 }
 0x40b   : > { %3560 = vst [vmem:[#allocation2 + $0x208] sm:$0xff] %v3460_v49  ;;  %v2918_v31 = vpop.f32.mrb[84].mxu0  ;;  %3562 = vst [vmem:[#allocation2 + $0x218] sm:$0xff] %v3462_v32  ;;  %v3348_v56 = vpop.f32.mrb[84].mxu1  ;;  %v2269_v49 = vld [vmem:[#allocation2 + $0x2d0] sm:$0xff]  ;;  %v2270_v32 = vld [vmem:[#allocation2 + $0x2d8] sm:$0xff] }
 0x40c   : > { %v3463_v15 = vadd.f32 %v2918_v31, %v2247_v33  ;;  %v2920_v43 = vpop.f32.mrb[85].mxu0  ;;  %v3465_v36 = vadd.f32 %v3348_v56, %v2249_v52  ;;  %v3350_v34 = vpop.f32.mrb[85].mxu1 }
 0x40d   : > { %v3464_v18 = vadd.f32 %v2920_v43, %v2248_v61  ;;  %v3466_v8 = vadd.f32 %v3350_v34, %v2250_v19  ;;  %v2271_v43 = vld [vmem:[#allocation2 + $0x2e0] sm:$0xff]  ;;  %v2272_v34 = vld [vmem:[#allocation2 + $0x2e8] sm:$0xff] }
 0x40e   : > { %3563 = vst [vmem:[#allocation2 + $0x220] sm:$0xff] %v3463_v15  ;;  %3565 = vst [vmem:[#allocation2 + $0x230] sm:$0xff] %v3465_v36 }
 0x40f   : > { %3564 = vst [vmem:[#allocation2 + $0x228] sm:$0xff] %v3464_v18  ;;  %v2924_v60 = vpop.f32.mrb[86].mxu0  ;;  %3566 = vst [vmem:[#allocation2 + $0x238] sm:$0xff] %v3466_v8  ;;  %v3354_v28 = vpop.f32.mrb[86].mxu1  ;;  %v2273_v18 = vld [vmem:[#allocation2 + $0x2f0] sm:$0xff]  ;;  %v2274_v8 = vld [vmem:[#allocation2 + $0x2f8] sm:$0xff] }
 0x410   : > { %v3467_v59 = vadd.f32 %v2924_v60, %v2251_v54  ;;  %v2926_v11 = vpop.f32.mrb[87].mxu0  ;;  %v3469_v38 = vadd.f32 %v3354_v28, %v2253_v48  ;;  %v3356_v24 = vpop.f32.mrb[87].mxu1 }
 0x411   : > { %v3468_v17 = vadd.f32 %v2926_v11, %v2252_v13  ;;  %v3470_v27 = vadd.f32 %v3356_v24, %v2254_v40  ;;  %v2275_v11 = vld [vmem:[#allocation2 + $0x300] sm:$0xf]  ;;  %v2276_v24 = vld [vmem:[#allocation2 + $0x308] sm:$0xf] }
 0x412   : > { %3567 = vst [vmem:[#allocation2 + $0x240] sm:$0xff] %v3467_v59  ;;  %3569 = vst [vmem:[#allocation2 + $0x250] sm:$0xff] %v3469_v38 }
 0x413   : > { %3568 = vst [vmem:[#allocation2 + $0x248] sm:$0xff] %v3468_v17  ;;  %v2930_v23 = vpop.f32.mrb[88].mxu0  ;;  %3570 = vst [vmem:[#allocation2 + $0x258] sm:$0xff] %v3470_v27  ;;  %v3360_v53 = vpop.f32.mrb[88].mxu1  ;;  %v2277_v17 = vld [vmem:[#allocation2 + $0x310] sm:$0xf] }
 0x414   : > { %v3471_v26 = vadd.f32 %v2930_v23, %v2255_v5  ;;  %v2932_v21 = vpop.f32.mrb[89].mxu0  ;;  %v3473_v9 = vadd.f32 %v3360_v53, %v2257_v63  ;;  %v3362_v7 = vpop.f32.mrb[89].mxu1  ;;  %v2278_v27 = vld [vmem:[#allocation2 + $0x318] sm:$0xf] }
 0x415   : > { %v3472_v1 = vadd.f32 %v2932_v21, %v2256_v35  ;;  %v3474_v2 = vadd.f32 %v3362_v7, %v2258_v20  ;;  %v3600_v7 = vld [vmem:[#allocation2 + $0x8] sm:$0xff] (!%p4066_p8) }
 0x416   : > { %3571 = vst [vmem:[#allocation2 + $0x260] sm:$0xff] %v3471_v26  ;;  %3573 = vst [vmem:[#allocation2 + $0x270] sm:$0xff] %v3473_v9  ;;  %v3599_v9 = vld [vmem:[#allocation2] sm:$0xff] (!%p4066_p8) }
 0x417   : > { %3572 = vst [vmem:[#allocation2 + $0x268] sm:$0xff] %v3472_v1  ;;  %v2936_v22 = vpop.f32.mrb[90].mxu0  ;;  %3574 = vst [vmem:[#allocation2 + $0x278] sm:$0xff] %v3474_v2  ;;  %v3366_v30 = vpop.f32.mrb[90].mxu1  ;;  %v3699_v1 = vld [vmem:[#allocation11] sm:$0xf] (!%p4066_p8) }
 0x418   : > { %v3475_v51 = vadd.f32 %v2936_v22, %v2259_v6  ;;  %v2938_v47 = vpop.f32.mrb[91].mxu0  ;;  %v3477_v50 = vadd.f32 %v3366_v30, %v2261_v45  ;;  %v3368_v62 = vpop.f32.mrb[91].mxu1  ;;  %v7439_v6 = vld [vmem:[#allocation20_spill] sm:$0xff] (!%p4066_p8) }
 0x419   : > { %v3476_v39 = vadd.f32 %v2938_v47, %v2260_v57  ;;  %v3478_v37 = vadd.f32 %v3368_v62, %v2262_v55  ;;  %v7440_v2 = vsub.s32 (!%p4066_p8), 0, %v7439_v6  ;;  %v7441_v57 = vsub.s32 (!%p4066_p8), 1, %v7439_v6  ;;  %v3601_v55 = vld [vmem:[#allocation2 + $0x10] sm:$0xff] (!%p4066_p8)  ;;  %v3602_v47 = vld [vmem:[#allocation2 + $0x18] sm:$0xff] (!%p4066_p8)  ;;  %v3603_v62 = vld [vmem:[#allocation2 + $0x20] sm:$0xff] (!%p4066_p8) }
 0x41a   : > { %3575 = vst [vmem:[#allocation2 + $0x280] sm:$0xff] %v3475_v51  ;;  %3577 = vst [vmem:[#allocation2 + $0x290] sm:$0xff] %v3477_v50  ;;  %v7442_v51 = vsub.s32 (!%p4066_p8), 2, %v7439_v6  ;;  %v7443_v50 = vsub.s32 (!%p4066_p8), 3, %v7439_v6 }
 0x41b   : > { %3576 = vst [vmem:[#allocation2 + $0x288] sm:$0xff] %v3476_v39  ;;  %v2942_v25 = vpop.f32.mrb[92].mxu0  ;;  %3578 = vst [vmem:[#allocation2 + $0x298] sm:$0xff] %v3478_v37  ;;  %v3372_v14 = vpop.f32.mrb[92].mxu1  ;;  %v7177_v45 = vrot.slane (!%p4066_p8), %v3699_v1, %v7440_v2  ;;  %v7181_v22 = vrot.slane (!%p4066_p8), %v3699_v1, %v7441_v57  ;;  %v3605_v37 = vld [vmem:[#allocation2 + $0x30] sm:$0xff] (!%p4066_p8)  ;;  %v3628_v2 = vld [vmem:[#allocation2 + $0xe8] sm:$0xff] (!%p4066_p8) }
 0x41c   : > { %v3479_v46 = vadd.f32 %v2942_v25, %v2263_v0  ;;  %v2944_v12 = vpop.f32.mrb[93].mxu0  ;;  %v3481_v3 = vadd.f32 %v3372_v14, %v2265_v16  ;;  %v3374_v44 = vpop.f32.mrb[93].mxu1  ;;  %v7185_v30 = vrot.slane (!%p4066_p8), %v3699_v1, %v7442_v51  ;;  %v7189_v39 = vrot.slane (!%p4066_p8), %v3699_v1, %v7443_v50  ;;  %v3604_v0 = vld [vmem:[#allocation2 + $0x28] sm:$0xff] (!%p4066_p8)  ;;  %v3606_v16 = vld [vmem:[#allocation2 + $0x38] sm:$0xff] (!%p4066_p8)  ;;  %v3607_v14 = vld [vmem:[#allocation2 + $0x40] sm:$0xff] (!%p4066_p8) }
 0x41d   : > { %v3480_v41 = vadd.f32 %v2944_v12, %v2264_v42  ;;  %v3482_v29 = vadd.f32 %v3374_v44, %v2266_v10  ;;  %v3721_v42 = vadd.f32 (!%p4066_p8), %v7177_v45, %v3599_v9  ;;  %v3722_v25 = vadd.f32 (!%p4066_p8), %v7181_v22, %v3600_v7  ;;  %v3608_v12 = vld [vmem:[#allocation2 + $0x48] sm:$0xff] (!%p4066_p8)  ;;  %v3627_v9 = vld [vmem:[#allocation2 + $0xe0] sm:$0xff] (!%p4066_p8)  ;;  %v3629_v57 = vld [vmem:[#allocation2 + $0xf0] sm:$0xff] (!%p4066_p8) }
 0x41e   : > { %3579 = vst [vmem:[#allocation2 + $0x2a0] sm:$0xff] %v3479_v46  ;;  %3581 = vst [vmem:[#allocation2 + $0x2b0] sm:$0xff] %v3481_v3  ;;  %v3723_v10 = vadd.f32 (!%p4066_p8), %v7185_v30, %v3601_v55  ;;  %v3724_v46 = vadd.f32 (!%p4066_p8), %v7189_v39, %v3602_v47  ;;  %v3609_v3 = vld [vmem:[#allocation2 + $0x50] sm:$0xff] (!%p4066_p8)  ;;  %v3726_v44 = vadd.f32 (!%p4066_p8), %v7181_v22, %v3604_v0  ;;  %v3630_v55 = vld [vmem:[#allocation2 + $0xf8] sm:$0xff] (!%p4066_p8) }
 0x41f   : > { %3580 = vst [vmem:[#allocation2 + $0x2a8] sm:$0xff] %v3480_v41  ;;  %v2948_v33 = vpop.f32.mrb[94].mxu0  ;;  %3582 = vst [vmem:[#allocation2 + $0x2b8] sm:$0xff] %v3482_v29  ;;  %v3378_v61 = vpop.f32.mrb[94].mxu1  ;;  %v3725_v41 = vadd.f32 (!%p4066_p8), %v7177_v45, %v3603_v62  ;;  %v3728_v29 = vadd.f32 (!%p4066_p8), %v7189_v39, %v3606_v16  ;;  %v3749_v6 = vadd.f32 (!%p4066_p8), %v7177_v45, %v3627_v9  ;;  %v3631_v62 = vld [vmem:[#allocation2 + $0x100] sm:$0xff] (!%p4066_p8)  ;;  %v3632_v0 = vld [vmem:[#allocation2 + $0x108] sm:$0xff] (!%p4066_p8) }
 0x420   : > { %v3483_v52 = vadd.f32 %v2948_v33, %v2267_v58  ;;  %v2950_v31 = vpop.f32.mrb[95].mxu0  ;;  %v3485_v19 = vadd.f32 %v3378_v61, %v2269_v49  ;;  %v3380_v56 = vpop.f32.mrb[95].mxu1  ;;  %v3727_v58 = vadd.f32 (!%p4066_p8), %v7185_v30, %v3605_v37  ;;  %v3610_v49 = vld [vmem:[#allocation2 + $0x58] sm:$0xff] (!%p4066_p8)  ;;  %v3612_v33 = vld [vmem:[#allocation2 + $0x68] sm:$0xff] (!%p4066_p8)  ;;  %3821 = vst [vmem:[#allocation12] sm:$0xff] (!%p4066_p8), %v3721_v42  ;;  %3822 = vst [vmem:[#allocation12 + $0x8] sm:$0xff] (!%p4066_p8), %v3722_v25 }
 0x421   : > { %v3484_v15 = vadd.f32 %v2950_v31, %v2268_v4  ;;  %v3486_v36 = vadd.f32 %v3380_v56, %v2270_v32  ;;  %v3611_v4 = vld [vmem:[#allocation2 + $0x60] sm:$0xff] (!%p4066_p8)  ;;  %3823 = vst [vmem:[#allocation12 + $0x10] sm:$0xff] (!%p4066_p8), %v3723_v10  ;;  %3824 = vst [vmem:[#allocation12 + $0x18] sm:$0xff] (!%p4066_p8), %v3724_v46  ;;  %v3729_v32 = vadd.f32 (!%p4066_p8), %v7177_v45, %v3607_v14  ;;  %v3633_v37 = vld [vmem:[#allocation2 + $0x110] sm:$0xff] (!%p4066_p8) }
 0x422   : > { %3583 = vst [vmem:[#allocation2 + $0x2c0] sm:$0xff] %v3483_v52  ;;  %3585 = vst [vmem:[#allocation2 + $0x2d0] sm:$0xff] %v3485_v19  ;;  %v3730_v52 = vadd.f32 (!%p4066_p8), %v7181_v22, %v3608_v12  ;;  %v3731_v61 = vadd.f32 (!%p4066_p8), %v7185_v30, %v3609_v3  ;;  %v3732_v31 = vadd.f32 (!%p4066_p8), %v7189_v39, %v3610_v49  ;;  %v3613_v19 = vld [vmem:[#allocation2 + $0x70] sm:$0xff] (!%p4066_p8)  ;;  %v3615_v56 = vld [vmem:[#allocation2 + $0x80] sm:$0xff] (!%p4066_p8) }
 0x423   : > { %3584 = vst [vmem:[#allocation2 + $0x2c8] sm:$0xff] %v3484_v15  ;;  %v2954_v54 = vpop.f32.mrb[96].mxu0  ;;  %3586 = vst [vmem:[#allocation2 + $0x2d8] sm:$0xff] %v3486_v36  ;;  %v3384_v13 = vpop.f32.mrb[96].mxu1  ;;  %v3614_v15 = vld [vmem:[#allocation2 + $0x78] sm:$0xff] (!%p4066_p8)  ;;  %v3734_v36 = vadd.f32 (!%p4066_p8), %v7181_v22, %v3612_v33  ;;  %v3750_v51 = vadd.f32 (!%p4066_p8), %v7181_v22, %v3628_v2  ;;  %v3751_v47 = vadd.f32 (!%p4066_p8), %v7185_v30, %v3629_v57  ;;  %v3635_v46 = vld [vmem:[#allocation2 + $0x120] sm:$0xff] (!%p4066_p8) }
 0x424   : > { %v3487_v48 = vadd.f32 %v2954_v54, %v2271_v43  ;;  %v2956_v60 = vpop.f32.mrb[97].mxu0  ;;  %v3489_v40 = vadd.f32 %v3384_v13, %v2273_v18  ;;  %v3386_v28 = vpop.f32.mrb[97].mxu1  ;;  %3825 = vst [vmem:[#allocation12 + $0x20] sm:$0xff] (!%p4066_p8), %v3725_v41  ;;  %3826 = vst [vmem:[#allocation12 + $0x28] sm:$0xff] (!%p4066_p8), %v3726_v44  ;;  %v3733_v43 = vadd.f32 (!%p4066_p8), %v7177_v45, %v3611_v4  ;;  %v3616_v54 = vld [vmem:[#allocation2 + $0x88] sm:$0xff] (!%p4066_p8)  ;;  %v3634_v10 = vld [vmem:[#allocation2 + $0x118] sm:$0xff] (!%p4066_p8) }
 0x425   : > { %v3488_v59 = vadd.f32 %v2956_v60, %v2272_v34  ;;  %v3490_v38 = vadd.f32 %v3386_v28, %v2274_v8  ;;  %3598 = sbr.rel (%p4066_p8) target bundleno = 1112 (0x458), region = 68  ;;  %3827 = vst [vmem:[#allocation12 + $0x30] sm:$0xff] (!%p4066_p8), %v3727_v58  ;;  %3828 = vst [vmem:[#allocation12 + $0x38] sm:$0xff] (!%p4066_p8), %v3728_v29  ;;  %v3735_v18 = vadd.f32 (!%p4066_p8), %v7185_v30, %v3613_v19  ;;  %v3617_v8 = vld [vmem:[#allocation2 + $0x90] sm:$0xff] (!%p4066_p8)  ;;  %v3619_v28 = vld [vmem:[#allocation2 + $0xa0] sm:$0xff] (!%p4066_p8) }
 0x426   : > { %3587 = vst [vmem:[#allocation2 + $0x2e0] sm:$0xff] %v3487_v48  ;;  %3589 = vst [vmem:[#allocation2 + $0x2f0] sm:$0xff] %v3489_v40  ;;  %v3736_v34 = vadd.f32 (!%p4066_p8), %v7189_v39, %v3614_v15  ;;  %v3618_v48 = vld [vmem:[#allocation2 + $0x98] sm:$0xff] (!%p4066_p8)  ;;  %v3737_v13 = vadd.f32 (!%p4066_p8), %v7177_v45, %v3615_v56  ;;  %v3738_v60 = vadd.f32 (!%p4066_p8), %v7181_v22, %v3616_v54  ;;  %v3636_v14 = vld [vmem:[#allocation2 + $0x128] sm:$0xff] (!%p4066_p8) }
 0x427   : > { %3588 = vst [vmem:[#allocation2 + $0x2e8] sm:$0xff] %v3488_v59  ;;  %v2960_v5 = vpop.f32.mrb[98].mxu0  ;;  %3590 = vst [vmem:[#allocation2 + $0x2f8] sm:$0xff] %v3490_v38  ;;  %v3390_v35 = vpop.f32.mrb[98].mxu1  ;;  %v3739_v40 = vadd.f32 (!%p4066_p8), %v7185_v30, %v3617_v8  ;;  %v3740_v59 = vadd.f32 (!%p4066_p8), %v7189_v39, %v3618_v48  ;;  %v3621_v38 = vld [vmem:[#allocation2 + $0xb0] sm:$0xff] (!%p4066_p8)  ;;  %v3752_v50 = vadd.f32 (!%p4066_p8), %v7189_v39, %v3630_v55  ;;  %v3638_v58 = vld [vmem:[#allocation2 + $0x138] sm:$0xff] (!%p4066_p8) }
 0x428   : > { %v3491_v63 = vadd.f32 %v2960_v5, %v2275_v11  ;;  %v2962_v23 = vpop.f32.mrb[99].mxu0  ;;  %v3493_v20 = vadd.f32 %v3390_v35, %v2277_v17  ;;  %v3392_v53 = vpop.f32.mrb[99].mxu1  ;;  %3829 = vst [vmem:[#allocation12 + $0x40] sm:$0xff] (!%p4066_p8), %v3729_v32  ;;  %3830 = vst [vmem:[#allocation12 + $0x48] sm:$0xff] (!%p4066_p8), %v3730_v52  ;;  %v3620_v11 = vld [vmem:[#allocation2 + $0xa8] sm:$0xff] (!%p4066_p8)  ;;  %v3741_v17 = vadd.f32 (!%p4066_p8), %v7177_v45, %v3619_v28  ;;  %v3637_v44 = vld [vmem:[#allocation2 + $0x130] sm:$0xff] (!%p4066_p8) }
 0x429   : > { %v3492_v26 = vadd.f32 %v2962_v23, %v2276_v24  ;;  %v3494_v21 = vadd.f32 %v3392_v53, %v2278_v27  ;;  %3831 = vst [vmem:[#allocation12 + $0x50] sm:$0xff] (!%p4066_p8), %v3731_v61  ;;  %3832 = vst [vmem:[#allocation12 + $0x58] sm:$0xff] (!%p4066_p8), %v3732_v31  ;;  %v3742_v24 = vadd.f32 (!%p4066_p8), %v7181_v22, %v3620_v11  ;;  %v3622_v27 = vld [vmem:[#allocation2 + $0xb8] sm:$0xff] (!%p4066_p8)  ;;  %v3624_v35 = vld [vmem:[#allocation2 + $0xc8] sm:$0xff] (!%p4066_p8) }
 0x42a   : > { %3591 = vst [vmem:[#allocation2 + $0x300] sm:$0xf] %v3491_v63  ;;  %3593 = vst [vmem:[#allocation2 + $0x310] sm:$0xf] %v3493_v20  ;;  %v3743_v5 = vadd.f32 (!%p4066_p8), %v7185_v30, %v3621_v38  ;;  %v3623_v63 = vld [vmem:[#allocation2 + $0xc0] sm:$0xff] (!%p4066_p8)  ;;  %v3744_v23 = vadd.f32 (!%p4066_p8), %v7189_v39, %v3622_v27  ;;  %v3625_v53 = vld [vmem:[#allocation2 + $0xd0] sm:$0xff] (!%p4066_p8)  ;;  %v3753_v16 = vadd.f32 (!%p4066_p8), %v7177_v45, %v3631_v62 }
 0x42b   : > { %3592 = vst [vmem:[#allocation2 + $0x308] sm:$0xf] %v3492_v26  ;;  %3594 = vst [vmem:[#allocation2 + $0x318] sm:$0xf] %v3494_v21  ;;  %v3745_v20 = vadd.f32 (!%p4066_p8), %v7177_v45, %v3623_v63  ;;  %v3746_v26 = vadd.f32 (!%p4066_p8), %v7181_v22, %v3624_v35  ;;  %v3626_v21 = vld [vmem:[#allocation2 + $0xd8] sm:$0xff] (!%p4066_p8)  ;;  %v3747_v1 = vadd.f32 (!%p4066_p8), %v7185_v30, %v3625_v53  ;;  %v3639_v29 = vld [vmem:[#allocation2 + $0x140] sm:$0xff] (!%p4066_p8) }
 0x42c   : > { %3833 = vst [vmem:[#allocation12 + $0x60] sm:$0xff] %v3733_v43  ;;  %3834 = vst [vmem:[#allocation12 + $0x68] sm:$0xff] %v3734_v36  ;;  %v3748_v7 = vadd.f32 %v7189_v39, %v3626_v21  ;;  %v3754_v42 = vadd.f32 %v7181_v22, %v3632_v0  ;;  %v3755_v25 = vadd.f32 %v7185_v30, %v3633_v37  ;;  %v3640_v32 = vld [vmem:[#allocation2 + $0x148] sm:$0xff]  ;;  %v3641_v52 = vld [vmem:[#allocation2 + $0x150] sm:$0xff] }
 0x42d   : > { %3835 = vst [vmem:[#allocation12 + $0x70] sm:$0xff] %v3735_v18  ;;  %3836 = vst [vmem:[#allocation12 + $0x78] sm:$0xff] %v3736_v34  ;;  %v3756_v12 = vadd.f32 %v7189_v39, %v3634_v10  ;;  %v3757_v3 = vadd.f32 %v7177_v45, %v3635_v46  ;;  %v3758_v41 = vadd.f32 %v7181_v22, %v3636_v14  ;;  %v3642_v61 = vld [vmem:[#allocation2 + $0x158] sm:$0xff]  ;;  %v3643_v56 = vld [vmem:[#allocation2 + $0x160] sm:$0xff] }
 0x42e   : > { %3837 = vst [vmem:[#allocation12 + $0x80] sm:$0xff] %v3737_v13  ;;  %3838 = vst [vmem:[#allocation12 + $0x88] sm:$0xff] %v3738_v60  ;;  %v3759_v49 = vadd.f32 %v7185_v30, %v3637_v44  ;;  %v3760_v4 = vadd.f32 %v7189_v39, %v3638_v58  ;;  %v3761_v33 = vadd.f32 %v7177_v45, %v3639_v29  ;;  %v3644_v43 = vld [vmem:[#allocation2 + $0x168] sm:$0xff]  ;;  %v3645_v36 = vld [vmem:[#allocation2 + $0x170] sm:$0xff] }
 0x42f   : > { %3839 = vst [vmem:[#allocation12 + $0x90] sm:$0xff] %v3739_v40  ;;  %3840 = vst [vmem:[#allocation12 + $0x98] sm:$0xff] %v3740_v59  ;;  %v3762_v31 = vadd.f32 %v7181_v22, %v3640_v32  ;;  %v3763_v19 = vadd.f32 %v7185_v30, %v3641_v52  ;;  %v3764_v15 = vadd.f32 %v7189_v39, %v3642_v61  ;;  %v3646_v8 = vld [vmem:[#allocation2 + $0x178] sm:$0xff]  ;;  %v3647_v48 = vld [vmem:[#allocation2 + $0x180] sm:$0xff] }
 0x430   : > { %3841 = vst [vmem:[#allocation12 + $0xa0] sm:$0xff] %v3741_v17  ;;  %3842 = vst [vmem:[#allocation12 + $0xa8] sm:$0xff] %v3742_v24  ;;  %v3765_v18 = vadd.f32 %v7177_v45, %v3643_v56  ;;  %v3766_v34 = vadd.f32 %v7181_v22, %v3644_v43  ;;  %v3767_v54 = vadd.f32 %v7185_v30, %v3645_v36  ;;  %v3648_v13 = vld [vmem:[#allocation2 + $0x188] sm:$0xff]  ;;  %v3649_v28 = vld [vmem:[#allocation2 + $0x190] sm:$0xff] }
 0x431   : > { %3843 = vst [vmem:[#allocation12 + $0xb0] sm:$0xff] %v3743_v5  ;;  %3844 = vst [vmem:[#allocation12 + $0xb8] sm:$0xff] %v3744_v23  ;;  %v3768_v60 = vadd.f32 %v7189_v39, %v3646_v8  ;;  %v3769_v40 = vadd.f32 %v7177_v45, %v3647_v48  ;;  %v3770_v59 = vadd.f32 %v7181_v22, %v3648_v13  ;;  %v3650_v11 = vld [vmem:[#allocation2 + $0x198] sm:$0xff]  ;;  %v3651_v38 = vld [vmem:[#allocation2 + $0x1a0] sm:$0xff] }
 0x432   : > { %3845 = vst [vmem:[#allocation12 + $0xc0] sm:$0xff] %v3745_v20  ;;  %3846 = vst [vmem:[#allocation12 + $0xc8] sm:$0xff] %v3746_v26  ;;  %v3771_v17 = vadd.f32 %v7185_v30, %v3649_v28  ;;  %v3772_v24 = vadd.f32 %v7189_v39, %v3650_v11  ;;  %v3773_v5 = vadd.f32 %v7177_v45, %v3651_v38  ;;  %v3652_v27 = vld [vmem:[#allocation2 + $0x1a8] sm:$0xff]  ;;  %v3653_v63 = vld [vmem:[#allocation2 + $0x1b0] sm:$0xff] }
 0x433   : > { %3847 = vst [vmem:[#allocation12 + $0xd0] sm:$0xff] %v3747_v1  ;;  %3848 = vst [vmem:[#allocation12 + $0xd8] sm:$0xff] %v3748_v7  ;;  %v3654_v35 = vld [vmem:[#allocation2 + $0x1b8] sm:$0xff]  ;;  %v3774_v23 = vadd.f32 %v7181_v22, %v3652_v27  ;;  %v3775_v20 = vadd.f32 %v7185_v30, %v3653_v63  ;;  %v3655_v53 = vld [vmem:[#allocation2 + $0x1c0] sm:$0xff] }
 0x434   : > { %3849 = vst [vmem:[#allocation12 + $0xe0] sm:$0xff] %v3749_v6  ;;  %3850 = vst [vmem:[#allocation12 + $0xe8] sm:$0xff] %v3750_v51  ;;  %v3776_v26 = vadd.f32 %v7189_v39, %v3654_v35  ;;  %v3656_v21 = vld [vmem:[#allocation2 + $0x1c8] sm:$0xff]  ;;  %v3657_v9 = vld [vmem:[#allocation2 + $0x1d0] sm:$0xff]  ;;  %v3777_v1 = vadd.f32 %v7177_v45, %v3655_v53 }
 0x435   : > { %3851 = vst [vmem:[#allocation12 + $0xf0] sm:$0xff] %v3751_v47  ;;  %3852 = vst [vmem:[#allocation12 + $0xf8] sm:$0xff] %v3752_v50  ;;  %v3778_v7 = vadd.f32 %v7181_v22, %v3656_v21  ;;  %v3779_v6 = vadd.f32 %v7185_v30, %v3657_v9  ;;  %v3658_v2 = vld [vmem:[#allocation2 + $0x1d8] sm:$0xff]  ;;  %v3659_v57 = vld [vmem:[#allocation2 + $0x1e0] sm:$0xff] }
 0x436   : > { %3853 = vst [vmem:[#allocation12 + $0x100] sm:$0xff] %v3753_v16  ;;  %3854 = vst [vmem:[#allocation12 + $0x108] sm:$0xff] %v3754_v42  ;;  %v3660_v55 = vld [vmem:[#allocation2 + $0x1e8] sm:$0xff]  ;;  %v3780_v51 = vadd.f32 %v7189_v39, %v3658_v2  ;;  %v3781_v47 = vadd.f32 %v7177_v45, %v3659_v57  ;;  %v3661_v62 = vld [vmem:[#allocation2 + $0x1f0] sm:$0xff] }
 0x437   : > { %3855 = vst [vmem:[#allocation12 + $0x110] sm:$0xff] %v3755_v25  ;;  %3856 = vst [vmem:[#allocation12 + $0x118] sm:$0xff] %v3756_v12  ;;  %v3782_v50 = vadd.f32 %v7181_v22, %v3660_v55  ;;  %v3662_v0 = vld [vmem:[#allocation2 + $0x1f8] sm:$0xff]  ;;  %v3663_v37 = vld [vmem:[#allocation2 + $0x200] sm:$0xff]  ;;  %v3783_v16 = vadd.f32 %v7185_v30, %v3661_v62 }
 0x438   : > { %3857 = vst [vmem:[#allocation12 + $0x120] sm:$0xff] %v3757_v3  ;;  %3858 = vst [vmem:[#allocation12 + $0x128] sm:$0xff] %v3758_v41  ;;  %v3784_v42 = vadd.f32 %v7189_v39, %v3662_v0  ;;  %v3785_v25 = vadd.f32 %v7177_v45, %v3663_v37  ;;  %v3664_v10 = vld [vmem:[#allocation2 + $0x208] sm:$0xff]  ;;  %v3665_v46 = vld [vmem:[#allocation2 + $0x210] sm:$0xff] }
 0x439   : > { %3859 = vst [vmem:[#allocation12 + $0x130] sm:$0xff] %v3759_v49  ;;  %3860 = vst [vmem:[#allocation12 + $0x138] sm:$0xff] %v3760_v4  ;;  %v3666_v14 = vld [vmem:[#allocation2 + $0x218] sm:$0xff]  ;;  %v3786_v12 = vadd.f32 %v7181_v22, %v3664_v10  ;;  %v3787_v3 = vadd.f32 %v7185_v30, %v3665_v46  ;;  %v3667_v44 = vld [vmem:[#allocation2 + $0x220] sm:$0xff] }
 0x43a   : > { %3861 = vst [vmem:[#allocation12 + $0x140] sm:$0xff] %v3761_v33  ;;  %3862 = vst [vmem:[#allocation12 + $0x148] sm:$0xff] %v3762_v31  ;;  %v3788_v41 = vadd.f32 %v7189_v39, %v3666_v14  ;;  %v3668_v58 = vld [vmem:[#allocation2 + $0x228] sm:$0xff]  ;;  %v3669_v29 = vld [vmem:[#allocation2 + $0x230] sm:$0xff]  ;;  %v3789_v49 = vadd.f32 %v7177_v45, %v3667_v44 }
 0x43b   : > { %3863 = vst [vmem:[#allocation12 + $0x150] sm:$0xff] %v3763_v19  ;;  %3864 = vst [vmem:[#allocation12 + $0x158] sm:$0xff] %v3764_v15  ;;  %v3790_v4 = vadd.f32 %v7181_v22, %v3668_v58  ;;  %v3791_v33 = vadd.f32 %v7185_v30, %v3669_v29  ;;  %v3670_v32 = vld [vmem:[#allocation2 + $0x238] sm:$0xff]  ;;  %v3671_v52 = vld [vmem:[#allocation2 + $0x240] sm:$0xff] }
 0x43c   : > { %3865 = vst [vmem:[#allocation12 + $0x160] sm:$0xff] %v3765_v18  ;;  %3866 = vst [vmem:[#allocation12 + $0x168] sm:$0xff] %v3766_v34  ;;  %v3672_v61 = vld [vmem:[#allocation2 + $0x248] sm:$0xff]  ;;  %v3792_v31 = vadd.f32 %v7189_v39, %v3670_v32  ;;  %v3793_v19 = vadd.f32 %v7177_v45, %v3671_v52  ;;  %v3673_v56 = vld [vmem:[#allocation2 + $0x250] sm:$0xff] }
 0x43d   : > { %3867 = vst [vmem:[#allocation12 + $0x170] sm:$0xff] %v3767_v54  ;;  %3868 = vst [vmem:[#allocation12 + $0x178] sm:$0xff] %v3768_v60  ;;  %v3794_v15 = vadd.f32 %v7181_v22, %v3672_v61  ;;  %v3674_v43 = vld [vmem:[#allocation2 + $0x258] sm:$0xff]  ;;  %v3675_v36 = vld [vmem:[#allocation2 + $0x260] sm:$0xff]  ;;  %v3795_v18 = vadd.f32 %v7185_v30, %v3673_v56 }
 0x43e   : > { %3869 = vst [vmem:[#allocation12 + $0x180] sm:$0xff] %v3769_v40  ;;  %3870 = vst [vmem:[#allocation12 + $0x188] sm:$0xff] %v3770_v59  ;;  %v3796_v34 = vadd.f32 %v7189_v39, %v3674_v43  ;;  %v3797_v54 = vadd.f32 %v7177_v45, %v3675_v36  ;;  %v3676_v8 = vld [vmem:[#allocation2 + $0x268] sm:$0xff]  ;;  %v3677_v48 = vld [vmem:[#allocation2 + $0x270] sm:$0xff] }
 0x43f   : > { %3871 = vst [vmem:[#allocation12 + $0x190] sm:$0xff] %v3771_v17  ;;  %3872 = vst [vmem:[#allocation12 + $0x198] sm:$0xff] %v3772_v24  ;;  %v3678_v13 = vld [vmem:[#allocation2 + $0x278] sm:$0xff]  ;;  %v3798_v60 = vadd.f32 %v7181_v22, %v3676_v8  ;;  %v3799_v40 = vadd.f32 %v7185_v30, %v3677_v48  ;;  %v3679_v28 = vld [vmem:[#allocation2 + $0x280] sm:$0xff] }
 0x440   : > { %3873 = vst [vmem:[#allocation12 + $0x1a0] sm:$0xff] %v3773_v5  ;;  %3874 = vst [vmem:[#allocation12 + $0x1a8] sm:$0xff] %v3774_v23  ;;  %v3800_v59 = vadd.f32 %v7189_v39, %v3678_v13  ;;  %v3680_v11 = vld [vmem:[#allocation2 + $0x288] sm:$0xff]  ;;  %v3681_v38 = vld [vmem:[#allocation2 + $0x290] sm:$0xff]  ;;  %v3801_v17 = vadd.f32 %v7177_v45, %v3679_v28 }
 0x441   : > { %3875 = vst [vmem:[#allocation12 + $0x1b0] sm:$0xff] %v3775_v20  ;;  %3876 = vst [vmem:[#allocation12 + $0x1b8] sm:$0xff] %v3776_v26  ;;  %v3802_v24 = vadd.f32 %v7181_v22, %v3680_v11  ;;  %v3803_v5 = vadd.f32 %v7185_v30, %v3681_v38  ;;  %v3682_v27 = vld [vmem:[#allocation2 + $0x298] sm:$0xff]  ;;  %v3683_v63 = vld [vmem:[#allocation2 + $0x2a0] sm:$0xff] }
 0x442   : > { %3877 = vst [vmem:[#allocation12 + $0x1c0] sm:$0xff] %v3777_v1  ;;  %3878 = vst [vmem:[#allocation12 + $0x1c8] sm:$0xff] %v3778_v7  ;;  %v3684_v35 = vld [vmem:[#allocation2 + $0x2a8] sm:$0xff]  ;;  %v3804_v23 = vadd.f32 %v7189_v39, %v3682_v27  ;;  %v3805_v20 = vadd.f32 %v7177_v45, %v3683_v63  ;;  %v3685_v53 = vld [vmem:[#allocation2 + $0x2b0] sm:$0xff] }
 0x443   : > { %3879 = vst [vmem:[#allocation12 + $0x1d0] sm:$0xff] %v3779_v6  ;;  %3880 = vst [vmem:[#allocation12 + $0x1d8] sm:$0xff] %v3780_v51  ;;  %v3806_v26 = vadd.f32 %v7181_v22, %v3684_v35  ;;  %v3686_v21 = vld [vmem:[#allocation2 + $0x2b8] sm:$0xff]  ;;  %v3687_v9 = vld [vmem:[#allocation2 + $0x2c0] sm:$0xff]  ;;  %v3807_v1 = vadd.f32 %v7185_v30, %v3685_v53 }
 0x444   : > { %3881 = vst [vmem:[#allocation12 + $0x1e0] sm:$0xff] %v3781_v47  ;;  %3882 = vst [vmem:[#allocation12 + $0x1e8] sm:$0xff] %v3782_v50  ;;  %v3808_v7 = vadd.f32 %v7189_v39, %v3686_v21  ;;  %v3809_v6 = vadd.f32 %v7177_v45, %v3687_v9  ;;  %v3688_v2 = vld [vmem:[#allocation2 + $0x2c8] sm:$0xff]  ;;  %v3689_v57 = vld [vmem:[#allocation2 + $0x2d0] sm:$0xff] }
 0x445   : > { %3883 = vst [vmem:[#allocation12 + $0x1f0] sm:$0xff] %v3783_v16  ;;  %3884 = vst [vmem:[#allocation12 + $0x1f8] sm:$0xff] %v3784_v42  ;;  %v3690_v55 = vld [vmem:[#allocation2 + $0x2d8] sm:$0xff]  ;;  %v3810_v51 = vadd.f32 %v7181_v22, %v3688_v2  ;;  %v3811_v47 = vadd.f32 %v7185_v30, %v3689_v57  ;;  %v3691_v62 = vld [vmem:[#allocation2 + $0x2e0] sm:$0xff] }
 0x446   : > { %3885 = vst [vmem:[#allocation12 + $0x200] sm:$0xff] %v3785_v25  ;;  %3886 = vst [vmem:[#allocation12 + $0x208] sm:$0xff] %v3786_v12  ;;  %v3812_v50 = vadd.f32 %v7189_v39, %v3690_v55  ;;  %v3692_v0 = vld [vmem:[#allocation2 + $0x2e8] sm:$0xff]  ;;  %v3693_v37 = vld [vmem:[#allocation2 + $0x2f0] sm:$0xff]  ;;  %v3813_v16 = vadd.f32 %v7177_v45, %v3691_v62 }
 0x447   : > { %3887 = vst [vmem:[#allocation12 + $0x210] sm:$0xff] %v3787_v3  ;;  %3888 = vst [vmem:[#allocation12 + $0x218] sm:$0xff] %v3788_v41  ;;  %v3814_v42 = vadd.f32 %v7181_v22, %v3692_v0  ;;  %v3815_v25 = vadd.f32 %v7185_v30, %v3693_v37  ;;  %v3694_v10 = vld [vmem:[#allocation2 + $0x2f8] sm:$0xff]  ;;  %v3695_v46 = vld [vmem:[#allocation2 + $0x300] sm:$0xf] }
 0x448   : > { %3889 = vst [vmem:[#allocation12 + $0x220] sm:$0xff] %v3789_v49  ;;  %3890 = vst [vmem:[#allocation12 + $0x228] sm:$0xff] %v3790_v4  ;;  %v3696_v14 = vld [vmem:[#allocation2 + $0x308] sm:$0xf]  ;;  %v3816_v12 = vadd.f32 %v7189_v39, %v3694_v10  ;;  %v3817_v3 = vadd.f32 %v7177_v45, %v3695_v46  ;;  %v3697_v44 = vld [vmem:[#allocation2 + $0x310] sm:$0xf] }
 0x449   : > { %3891 = vst [vmem:[#allocation12 + $0x230] sm:$0xff] %v3791_v33  ;;  %3892 = vst [vmem:[#allocation12 + $0x238] sm:$0xff] %v3792_v31  ;;  %v3818_v41 = vadd.f32 %v7181_v22, %v3696_v14  ;;  %v3698_v58 = vld [vmem:[#allocation2 + $0x318] sm:$0xf]  ;;  %v3819_v29 = vadd.f32 %v7185_v30, %v3697_v44 }
 0x44a   : > { %3893 = vst [vmem:[#allocation12 + $0x240] sm:$0xff] %v3793_v19  ;;  %3894 = vst [vmem:[#allocation12 + $0x248] sm:$0xff] %v3794_v15  ;;  %v3820_v49 = vadd.f32 %v7189_v39, %v3698_v58 }
 0x44b   : > { %3895 = vst [vmem:[#allocation12 + $0x250] sm:$0xff] %v3795_v18  ;;  %3896 = vst [vmem:[#allocation12 + $0x258] sm:$0xff] %v3796_v34 }
 0x44c   : > { %3897 = vst [vmem:[#allocation12 + $0x260] sm:$0xff] %v3797_v54  ;;  %3898 = vst [vmem:[#allocation12 + $0x268] sm:$0xff] %v3798_v60 }
 0x44d   : > { %3899 = vst [vmem:[#allocation12 + $0x270] sm:$0xff] %v3799_v40  ;;  %3900 = vst [vmem:[#allocation12 + $0x278] sm:$0xff] %v3800_v59 }
 0x44e   : > { %3901 = vst [vmem:[#allocation12 + $0x280] sm:$0xff] %v3801_v17  ;;  %3902 = vst [vmem:[#allocation12 + $0x288] sm:$0xff] %v3802_v24 }
 0x44f   : > { %3903 = vst [vmem:[#allocation12 + $0x290] sm:$0xff] %v3803_v5  ;;  %3904 = vst [vmem:[#allocation12 + $0x298] sm:$0xff] %v3804_v23 }
 0x450   : > { %3905 = vst [vmem:[#allocation12 + $0x2a0] sm:$0xff] %v3805_v20  ;;  %3906 = vst [vmem:[#allocation12 + $0x2a8] sm:$0xff] %v3806_v26 }
 0x451   : > { %3907 = vst [vmem:[#allocation12 + $0x2b0] sm:$0xff] %v3807_v1  ;;  %3908 = vst [vmem:[#allocation12 + $0x2b8] sm:$0xff] %v3808_v7 }
 0x452   : > { %3909 = vst [vmem:[#allocation12 + $0x2c0] sm:$0xff] %v3809_v6  ;;  %3910 = vst [vmem:[#allocation12 + $0x2c8] sm:$0xff] %v3810_v51 }
 0x453   : > { %3911 = vst [vmem:[#allocation12 + $0x2d0] sm:$0xff] %v3811_v47  ;;  %3912 = vst [vmem:[#allocation12 + $0x2d8] sm:$0xff] %v3812_v50 }
 0x454   : > { %3913 = vst [vmem:[#allocation12 + $0x2e0] sm:$0xff] %v3813_v16  ;;  %3914 = vst [vmem:[#allocation12 + $0x2e8] sm:$0xff] %v3814_v42 }
 0x455   : > { %3915 = vst [vmem:[#allocation12 + $0x2f0] sm:$0xff] %v3815_v25  ;;  %3916 = vst [vmem:[#allocation12 + $0x2f8] sm:$0xff] %v3816_v12 }
 0x456   : > { %3917 = vst [vmem:[#allocation12 + $0x300] sm:$0xf] %v3817_v3  ;;  %3918 = vst [vmem:[#allocation12 + $0x308] sm:$0xf] %v3818_v41 }
 0x457   : > { %3919 = vst [vmem:[#allocation12 + $0x310] sm:$0xf] %v3819_v29  ;;  %3920 = vst [vmem:[#allocation12 + $0x318] sm:$0xf] %v3820_v49 }
 0x458 PF: > { %p4927_p13 = scmp.eq.s32.totalorder %s5456_s22, 3  ;;  %s5404_s28 = smov [#allocation12]  }
 0x459   : > { %s3927_s7 = sshll.u32 %s5404_s28, 4  ;;  %s3928_s7 = int_to_ptr.vmem [resolvable:$true] %s3927_s7 }
 0x45a   : > { %s5317_s17 = scalar_lea.vmem %s3928_s7, 12800  ;;  %p5324_p12 = scmp.lt.s32.totalorder %s3928_s7, %s3928_s7 }
 0x45b   : > { %p5318_p2 = scmp.ne.s32.totalorder %s3928_s7, %s5317_s17  ;;  %p5325_p5 = scmp.lt.s32.totalorder %s5317_s17, %s5317_s17 }
 0x45d   : > { %p5319_p6 = pnand %p5318_p2, %p4927_p13  ;;  %p5326_p9 = por %p5325_p5, %p5324_p12 }
 0x45f   : > { %p5320_p7 = pneg %p5319_p6 }
 0x461   : > { %p5327_p11 = pnand %p5326_p9, %p5320_p7 }
 0x463   : > { %5330 = shalt.err (!%p5327_p11)
}
 0x464   : > { %s5331_s1 = scalar_lea.hbm %s7332_s5, 12800 }
 0x465   : > { %p5332_p10 = scmp.ne.s32.totalorder %s7332_s5, %s5331_s1  ;;  %p5337_p3 = scmp.lt.u32.totalorder %s5331_s1, %s7332_s5 }
 0x467   : > { %p5333_p1 = pnand %p5332_p10, %p4927_p13 }
 0x469   : > { %p5334_p4 = pneg %p5333_p1 }
 0x46b   : > { %p5339_p0 = pnand %p5337_p3, %p5334_p4 }
 0x46d   : > { %5342 = shalt.err (!%p5339_p0)
}
 0x46e   : > { %s5405_s13 = smov 512   ;;  %s5406_s21 = smov 32  }
 0x46f   : > { %4902 = dma.vmem_to_hbm [thread:$0]  (%p4927_p13), %s3928_s7, 12800, %s7332_s5, [#allocation5], %s5405_s13, %s5405_s13, %s5406_s21  }
 0x470   : > { %5376 = dma.done.wait (%p4927_p13), [#allocation5], 12800  }
 0x471   : > { %5378 = vsyncadd (%p4927_p13), [#allocation5], 4294954496 }
 0x472 PF: > { %s7444_s21 = sld [smem:[#allocation18_spill]]  ;;  %s7445_s23 = sld [smem:[#allocation19_spill]] }
 0x473   : > { %s7446_s18 = smov %s5385_s19  ;;  %s7447_s19 = smov %s5389_s20 }
 0x478   : > { %p20_p8 = scmp.ge.s32.totalorder %s7444_s21, 6   ;;  %s7448_s20 = smov %s7445_s23 }
 0x47a   :  { %22 = sbr.rel (!%p20_p8) target bundleno = 10 (0xa), region = 118 }
 0x481   :  { %3943 = vsyncpa [#allocation4], 1 }
 0x482   :  { %3945 = vsyncpa [#allocation4 + $0x1], 1 }
 0x483   :  { %3946 = vsyncpa [#allocation7], 1 }
 0x484   :  { %3948 = vsyncpa [#allocation7 + $0x1], 1 }
 0x485   :  { %3949 = vsyncpa [#allocation10], 1 }
 0x486   :  { %3951 = vsyncpa [#allocation10 + $0x1], 1 }
 0x487   :  { %3952 = vsyncpa [#allocation5], 1 }
 0x488   :  { %3954 = vsyncpa [#allocation5 + $0x1], 1 }

</bundles_post_ra>
